<compile_context>
chip_gen: v7x
topology: tpu7x:2x2x1
jax: 0.10.0
libtpu: 0.0.40
codegen_flags: <defaults>
</compile_context>

<pallas_src>
import jax
import jax.numpy as jnp
from jax.experimental import pallas as pl
from jax.experimental.pallas import tpu as pltpu

LEAKY_SLOPE = 0.2
LANE = 128


def _round_up(x, m):
    return ((x + m - 1) // m) * m


def _cdiv(a, b):
    return -(-a // b)


def generator_kernel(x_ref,
                     w0_ref, b0_ref,
                     w1_ref, b1_ref,
                     w2_ref, b2_ref,
                     w3_ref, b3_ref,
                     o_ref):
    """Fused 4-layer MLP on one batch tile.

    Each layer: cast activations to bf16, bf16 x bf16 MXU matmul with f32
    accumulation, f32 bias add, f32 LeakyReLU (single jnp.maximum).
    """
    def layer(h, w_ref, b_ref, activate):
        y = jnp.dot(h.astype(jnp.bfloat16), w_ref[...],
                    preferred_element_type=jnp.float32) + b_ref[...]
        if activate:
            y = jnp.maximum(y, LEAKY_SLOPE * y)   # LeakyReLU(0.2), one VALU op
        return y

    h = x_ref[...]
    h = layer(h, w0_ref, b0_ref, True)    # hidden_0
    h = layer(h, w1_ref, b1_ref, True)    # hidden_1
    h = layer(h, w2_ref, b2_ref, True)    # hidden_2
    h = layer(h, w3_ref, b3_ref, False)   # out (escalonate=False: no activation)
    o_ref[...] = h.astype(o_ref.dtype)


def init_params(key, in_features=100, hidden_layers=(256, 512, 1024), out_features=784):
    """Deterministic synthetic init (PyTorch-Linear-style uniform bounds).

    Weights are (in, out) — the transpose of nn.Linear's (out, in) — so y = x @ W + b.
    """
    dims = [in_features, *hidden_layers, out_features]
    params = []
    for i in range(len(dims) - 1):
        fan_in, fan_out = dims[i], dims[i + 1]
        key, kw, kb = jax.random.split(key, 3)
        bound = 1.0 / jnp.sqrt(jnp.float32(fan_in))
        w = jax.random.uniform(kw, (fan_in, fan_out), jnp.float32, -bound, bound)
        b = jax.random.uniform(kb, (1, fan_out), jnp.float32, -bound, bound)
        params.append((w, b))
    return params


def prepare_params(params):
    """Cast weights to bf16 and zero-pad only the first layer's input dim to 128.

    - first-layer input dim 100 -> 128 with zero rows (x columns are zero-padded
      to match, so the extra products are exact zeros).
    - all other dims (256/512/1024 and the final out_features) are left as-is:
      they are full-array block dims, so no output padding/slicing is needed.
    Biases stay f32 (tiny) so the bias-add / LeakyReLU path is pure f32.
    """
    in_logical = params[0][0].shape[0]
    out_features = params[-1][0].shape[1]
    in_pad = _round_up(in_logical, LANE)

    prepared = []
    for i, (w, b) in enumerate(params):
        rows, cols = w.shape
        r_pad = in_pad if i == 0 else rows
        w_p = jnp.zeros((r_pad, cols), jnp.float32).at[:rows, :cols].set(w)
        prepared.append((w_p.astype(jnp.bfloat16), b.astype(jnp.float32)))

    return {
        "layers": prepared,
        "in_logical": in_logical,
        "in_pad": in_pad,
        "out_features": out_features,
    }


def generator_forward(x, prepared, max_block_batch=256):
    """x: (B, in_features) f32. Returns (B, out_features) f32."""
    B, in_logical = x.shape
    assert in_logical == prepared["in_logical"]
    in_pad = prepared["in_pad"]
    out_features = prepared["out_features"]

    # Padding-aware batch tile: split B into n_tiles ~equal tiles, round each up
    # to a sublane multiple (8). Cap at 256 rows (fills v6e/v7x 256-wide MXU;
    # v5e just runs two 128-row passes per tile).
    n_tiles = _cdiv(B, max_block_batch)
    tb = _round_up(_cdiv(B, n_tiles), 8)
    b_pad = n_tiles * tb

    # Zero-pad input to (b_pad, in_pad): extra rows/cols are zeros (exact no-ops).
    x_p = jnp.zeros((b_pad, in_pad), jnp.float32).at[:B, :in_logical].set(x)

    flat_args = [x_p]
    in_specs = [pl.BlockSpec((tb, in_pad), lambda i: (i, 0))]
    for w, b in prepared["layers"]:
        flat_args.append(w)
        flat_args.append(b)
        # Constant index_map -> weights/biases DMA'd once, stay VMEM-resident
        # across all batch tiles (the compiler skips re-fetch of revisited blocks).
        in_specs.append(pl.BlockSpec(w.shape, lambda i: (0, 0)))
        in_specs.append(pl.BlockSpec(b.shape, lambda i: (0, 0)))

    out = pl.pallas_call(
        generator_kernel,
        out_shape=jax.ShapeDtypeStruct((b_pad, out_features), jnp.float32),
        grid=(n_tiles,),
        in_specs=in_specs,
        # out_features is the full array dim -> exempt from the 128-lane rule,
        # so no output padding or host-side column slice is needed.
        out_specs=pl.BlockSpec((tb, out_features), lambda i: (i, 0)),
        compiler_params=pltpu.CompilerParams(
            dimension_semantics=("parallel",),   # batch tiles are independent
            vmem_limit_bytes=32 << 20,           # fits v7x's 64 MiB physical VMEM
        ),
    )(*flat_args)

    return out[:B] if b_pad != B else out


def reference_forward(x, params):
    """Pure-JAX reference matching the kernel's numerics:
    bf16 activations/weights into the matmul, f32 accumulation, f32 bias + LeakyReLU."""
    h = x
    for i, (w, b) in enumerate(params):
        h = jnp.dot(h.astype(jnp.bfloat16), w.astype(jnp.bfloat16),
                    preferred_element_type=jnp.float32) + b
        if i < len(params) - 1:
            h = jnp.maximum(h, LEAKY_SLOPE * h)
    return h


if __name__ == "__main__":
    key = jax.random.PRNGKey(0)
    k_params, k_noise = jax.random.split(key)

    in_features = 100
    hidden_layers = (256, 512, 1024)
    out_features = 784
    batch = 200            # non-multiple of the tile cap: exercises padding-aware tiling
    max_block_batch = 128  # -> 2 tiles of 104 rows (b_pad=208, only 8 wasted rows)

    params = init_params(k_params, in_features, hidden_layers, out_features)
    prepared = prepare_params(params)

    # `noise(quantity, size)` equivalent: standard-normal latent points.
    x = jax.random.normal(k_noise, (batch, in_features), dtype=jnp.float32)

    out = generator_forward(x, prepared, max_block_batch=max_block_batch)
    out = jax.block_until_ready(out)

    ref = reference_forward(x, params)
    assert out.shape == (batch, out_features)
    assert jnp.allclose(out, ref, atol=5e-3, rtol=5e-3), float(jnp.max(jnp.abs(out - ref)))

    print("KERNEL_OK")
</pallas_src>

<mosaic_0001>
module attributes {stable_mosaic.version = 11 : i64} {
  func.func @generator_kernel(%arg0: i32, %arg1: memref<104x128xf32, #tpu.memory_space<vmem>>, %arg2: memref<128x256xbf16, #tpu.memory_space<vmem>>, %arg3: memref<1x256xf32, #tpu.memory_space<vmem>>, %arg4: memref<256x512xbf16, #tpu.memory_space<vmem>>, %arg5: memref<1x512xf32, #tpu.memory_space<vmem>>, %arg6: memref<512x1024xbf16, #tpu.memory_space<vmem>>, %arg7: memref<1x1024xf32, #tpu.memory_space<vmem>>, %arg8: memref<1024x784xbf16, #tpu.memory_space<vmem>>, %arg9: memref<1x784xf32, #tpu.memory_space<vmem>>, %arg10: memref<104x784xf32, #tpu.memory_space<vmem>>) attributes {dimension_semantics = [#tpu.dimension_semantics<parallel>], iteration_bounds = array<i64: 2>, scalar_prefetch = 0 : i64, scratch_operands = 0 : i64, tpu.core_type = #tpu.core_type<tc>, window_params = [{transform_indices = @transform_0, window_bounds = array<i64: 104, 128>}, {pipeline_mode = #tpu.pipeline_mode<synchronous>, transform_indices = @transform_1, window_bounds = array<i64: 128, 256>}, {pipeline_mode = #tpu.pipeline_mode<synchronous>, transform_indices = @transform_2, window_bounds = array<i64: 1, 256>}, {pipeline_mode = #tpu.pipeline_mode<synchronous>, transform_indices = @transform_3, window_bounds = array<i64: 256, 512>}, {pipeline_mode = #tpu.pipeline_mode<synchronous>, transform_indices = @transform_4, window_bounds = array<i64: 1, 512>}, {pipeline_mode = #tpu.pipeline_mode<synchronous>, transform_indices = @transform_5, window_bounds = array<i64: 512, 1024>}, {pipeline_mode = #tpu.pipeline_mode<synchronous>, transform_indices = @transform_6, window_bounds = array<i64: 1, 1024>}, {pipeline_mode = #tpu.pipeline_mode<synchronous>, transform_indices = @transform_7, window_bounds = array<i64: 1024, 784>}, {pipeline_mode = #tpu.pipeline_mode<synchronous>, transform_indices = @transform_8, window_bounds = array<i64: 1, 784>}, {transform_indices = @transform_9, window_bounds = array<i64: 104, 784>}]} {
    %c0 = arith.constant 0 : index
    %c0_0 = arith.constant 0 : index
    %0 = vector.load %arg1[%c0, %c0_0] : memref<104x128xf32, #tpu.memory_space<vmem>>, vector<104x128xf32>
    %1 = arith.truncf %0 : vector<104x128xf32> to vector<104x128xbf16>
    %c0_1 = arith.constant 0 : index
    %c0_2 = arith.constant 0 : index
    %2 = vector.load %arg2[%c0_1, %c0_2] : memref<128x256xbf16, #tpu.memory_space<vmem>>, vector<128x256xbf16>
    %cst = arith.constant dense<0.000000e+00> : vector<104x256xf32>
    %3 = tpu.matmul %1, %2, %cst {dimension_numbers = #tpu.dot_dimension_numbers<[1], [0], [0], [1], [0, 0, 1, 1], [], []>} : vector<104x128xbf16>, vector<128x256xbf16>, vector<104x256xf32> -> vector<104x256xf32>
    %c0_3 = arith.constant 0 : index
    %c0_4 = arith.constant 0 : index
    %4 = vector.load %arg3[%c0_3, %c0_4] : memref<1x256xf32, #tpu.memory_space<vmem>>, vector<1x256xf32>
    %5 = vector.broadcast %4 : vector<1x256xf32> to vector<104x256xf32>
    %6 = arith.addf %3, %5 : vector<104x256xf32>
    %cst_5 = arith.constant 2.000000e-01 : f32
    %7 = vector.broadcast %cst_5 : f32 to vector<104x256xf32>
    %8 = arith.mulf %7, %6 : vector<104x256xf32>
    %9 = arith.maximumf %6, %8 : vector<104x256xf32>
    %10 = arith.truncf %9 : vector<104x256xf32> to vector<104x256xbf16>
    %c0_6 = arith.constant 0 : index
    %c0_7 = arith.constant 0 : index
    %11 = vector.load %arg4[%c0_6, %c0_7] : memref<256x512xbf16, #tpu.memory_space<vmem>>, vector<256x512xbf16>
    %cst_8 = arith.constant dense<0.000000e+00> : vector<104x512xf32>
    %12 = tpu.matmul %10, %11, %cst_8 {dimension_numbers = #tpu.dot_dimension_numbers<[1], [0], [0], [1], [0, 0, 1, 1], [], []>} : vector<104x256xbf16>, vector<256x512xbf16>, vector<104x512xf32> -> vector<104x512xf32>
    %c0_9 = arith.constant 0 : index
    %c0_10 = arith.constant 0 : index
    %13 = vector.load %arg5[%c0_9, %c0_10] : memref<1x512xf32, #tpu.memory_space<vmem>>, vector<1x512xf32>
    %14 = vector.broadcast %13 : vector<1x512xf32> to vector<104x512xf32>
    %15 = arith.addf %12, %14 : vector<104x512xf32>
    %cst_11 = arith.constant 2.000000e-01 : f32
    %16 = vector.broadcast %cst_11 : f32 to vector<104x512xf32>
    %17 = arith.mulf %16, %15 : vector<104x512xf32>
    %18 = arith.maximumf %15, %17 : vector<104x512xf32>
    %19 = arith.truncf %18 : vector<104x512xf32> to vector<104x512xbf16>
    %c0_12 = arith.constant 0 : index
    %c0_13 = arith.constant 0 : index
    %20 = vector.load %arg6[%c0_12, %c0_13] : memref<512x1024xbf16, #tpu.memory_space<vmem>>, vector<512x1024xbf16>
    %cst_14 = arith.constant dense<0.000000e+00> : vector<104x1024xf32>
    %21 = tpu.matmul %19, %20, %cst_14 {dimension_numbers = #tpu.dot_dimension_numbers<[1], [0], [0], [1], [0, 0, 1, 1], [], []>} : vector<104x512xbf16>, vector<512x1024xbf16>, vector<104x1024xf32> -> vector<104x1024xf32>
    %c0_15 = arith.constant 0 : index
    %c0_16 = arith.constant 0 : index
    %22 = vector.load %arg7[%c0_15, %c0_16] : memref<1x1024xf32, #tpu.memory_space<vmem>>, vector<1x1024xf32>
    %23 = vector.broadcast %22 : vector<1x1024xf32> to vector<104x1024xf32>
    %24 = arith.addf %21, %23 : vector<104x1024xf32>
    %cst_17 = arith.constant 2.000000e-01 : f32
    %25 = vector.broadcast %cst_17 : f32 to vector<104x1024xf32>
    %26 = arith.mulf %25, %24 : vector<104x1024xf32>
    %27 = arith.maximumf %24, %26 : vector<104x1024xf32>
    %28 = arith.truncf %27 : vector<104x1024xf32> to vector<104x1024xbf16>
    %c0_18 = arith.constant 0 : index
    %c0_19 = arith.constant 0 : index
    %29 = vector.load %arg8[%c0_18, %c0_19] : memref<1024x784xbf16, #tpu.memory_space<vmem>>, vector<1024x784xbf16>
    %cst_20 = arith.constant dense<0.000000e+00> : vector<104x784xf32>
    %30 = tpu.matmul %28, %29, %cst_20 {dimension_numbers = #tpu.dot_dimension_numbers<[1], [0], [0], [1], [0, 0, 1, 1], [], []>} : vector<104x1024xbf16>, vector<1024x784xbf16>, vector<104x784xf32> -> vector<104x784xf32>
    %c0_21 = arith.constant 0 : index
    %c0_22 = arith.constant 0 : index
    %31 = vector.load %arg9[%c0_21, %c0_22] : memref<1x784xf32, #tpu.memory_space<vmem>>, vector<1x784xf32>
    %32 = vector.broadcast %31 : vector<1x784xf32> to vector<104x784xf32>
    %33 = arith.addf %30, %32 : vector<104x784xf32>
    %c0_23 = arith.constant 0 : index
    %c0_24 = arith.constant 0 : index
    %34 = vector.load %arg10[%c0_23, %c0_24] : memref<104x784xf32, #tpu.memory_space<vmem>>, vector<104x784xf32>
    tpu.vector_store %arg10[%c0_23, %c0_24], %33 {strides = array<i32>} : memref<104x784xf32, #tpu.memory_space<vmem>>, vector<104x784xf32>,
    return
  }
  func.func @transform_0(%arg0: i32) -> (i32, i32) {
    %c0_i32 = arith.constant 0 : i32
    %c0_i32_0 = arith.constant 0 : i32
    return %arg0, %c0_i32 : i32, i32
  }
  func.func @transform_1(%arg0: i32) -> (i32, i32) {
    %c0_i32 = arith.constant 0 : i32
    %c0_i32_0 = arith.constant 0 : i32
    %c0_i32_1 = arith.constant 0 : i32
    return %c0_i32, %c0_i32_0 : i32, i32
  }
  func.func @transform_2(%arg0: i32) -> (i32, i32) {
    %c0_i32 = arith.constant 0 : i32
    %c0_i32_0 = arith.constant 0 : i32
    %c0_i32_1 = arith.constant 0 : i32
    return %c0_i32, %c0_i32_0 : i32, i32
  }
  func.func @transform_3(%arg0: i32) -> (i32, i32) {
    %c0_i32 = arith.constant 0 : i32
    %c0_i32_0 = arith.constant 0 : i32
    %c0_i32_1 = arith.constant 0 : i32
    return %c0_i32, %c0_i32_0 : i32, i32
  }
  func.func @transform_4(%arg0: i32) -> (i32, i32) {
    %c0_i32 = arith.constant 0 : i32
    %c0_i32_0 = arith.constant 0 : i32
    %c0_i32_1 = arith.constant 0 : i32
    return %c0_i32, %c0_i32_0 : i32, i32
  }
  func.func @transform_5(%arg0: i32) -> (i32, i32) {
    %c0_i32 = arith.constant 0 : i32
    %c0_i32_0 = arith.constant 0 : i32
    %c0_i32_1 = arith.constant 0 : i32
    return %c0_i32, %c0_i32_0 : i32, i32
  }
  func.func @transform_6(%arg0: i32) -> (i32, i32) {
    %c0_i32 = arith.constant 0 : i32
    %c0_i32_0 = arith.constant 0 : i32
    %c0_i32_1 = arith.constant 0 : i32
    return %c0_i32, %c0_i32_0 : i32, i32
  }
  func.func @transform_7(%arg0: i32) -> (i32, i32) {
    %c0_i32 = arith.constant 0 : i32
    %c0_i32_0 = arith.constant 0 : i32
    %c0_i32_1 = arith.constant 0 : i32
    return %c0_i32, %c0_i32_0 : i32, i32
  }
  func.func @transform_8(%arg0: i32) -> (i32, i32) {
    %c0_i32 = arith.constant 0 : i32
    %c0_i32_0 = arith.constant 0 : i32
    %c0_i32_1 = arith.constant 0 : i32
    return %c0_i32, %c0_i32_0 : i32, i32
  }
  func.func @transform_9(%arg0: i32) -> (i32, i32) {
    %c0_i32 = arith.constant 0 : i32
    %c0_i32_0 = arith.constant 0 : i32
    return %arg0, %c0_i32 : i32, i32
  }
}

</mosaic_0001>

<bundles_post_ra>
// kernel: tpu_custom_call.1
= control target key start
LH: loop header
LB: loop body
LE: loop exit
PB: predicated region body
PF: predicated region fallthrough
CT: control target
= control target key end

     0   :  { %14 = vsyncpa [#allocation3], 0  ;;  %s14905_s0 = inlined_call_operand.vmem [shape: f32[208,128], index: 0, kind: input, shape index: {}]   ;;  %s14906_s1 = inlined_call_operand.vmem [shape: bf16[128,256], index: 1, kind: input, shape index: {}]   ;;  %s14907_s2 = inlined_call_operand.vmem [shape: f32[1,256], index: 2, kind: input, shape index: {}]   ;;  %s14908_s3 = inlined_call_operand.vmem [shape: bf16[256,512], index: 3, kind: input, shape index: {}]   ;;  %s14909_s4 = inlined_call_operand.vmem [shape: f32[1,512], index: 4, kind: input, shape index: {}]   ;;  %s14910_s5 = inlined_call_operand.vmem [shape: bf16[512,1024], index: 5, kind: input, shape index: {}]   ;;  %s14911_s6 = inlined_call_operand.vmem [shape: f32[1,1024], index: 6, kind: input, shape index: {}]   ;;  %s14912_s7 = inlined_call_operand.vmem [shape: bf16[1024,784], index: 7, kind: input, shape index: {}]   ;;  %s14913_s8 = inlined_call_operand.vmem [shape: f32[1,784], index: 8, kind: input, shape index: {}]   ;;  %s14914_s9 = inlined_call_operand.hbm [shape: f32[208,784], index: 9, kind: output, shape index: {}]  }
   0x1   :  { %16 = vsyncpa [#allocation3 + $0x1], 0  ;;  %s11100_s30 = smov 0   ;;  %s11102_s10 = smov 0  }
   0x2   :  { %s11104_s11 = smov 0   ;;  %s11106_s12 = smov 0  }
   0x3 LB: > { %s11121_s13 = sadd.s32 4294967295, %s11044_s12   ;;  %s8606_s14 = sadd.s32 4294967294, %s11044_s12   ;;  %s11044_s12 = sphi %s11106_s12, %s15061_s12   ;;  %s11040_s11 = sphi %s11104_s11, %s15060_s11   ;;  %s11036_s10 = sphi %s11102_s10, %s15059_s10   ;;  %s11032_s30 = sphi %s11100_s30, %s15058_s30  }
   0x4   : > { %s11125_s15 = sadd.s32 1, %s11044_s12   ;;  %s223_s16 = sadd.s32 1, %s11040_s11 }
   0x5   : > { %s220_s17 = ssub.s32 %s11044_s12, %s11125_s15  ;;  %p233_p0 = scmp.ne.s32.totalorder %s11040_s11, %s11036_s10 }
   0x6   : > { %p221_p1 = scmp.eq.s32.totalorder %s220_s17, 0  ;;  %p234_p2 = scmp.eq.s32.totalorder %s11121_s13, 1 }
   0x7   : > { %p239_p3 = scmp.ne.s32.totalorder %s11036_s10, %s11032_s30  ;;  %p240_p4 = scmp.eq.s32.totalorder %s8606_s14, 1 }
   0x8   : > { %s11136_s18 = scalar_select %p221_p1, %s11040_s11, %s223_s16  }
   0x9   : > { %p11138_p5 = por %p234_p2, %p233_p0  ;;  %p11142_p6 = por %p240_p4, %p239_p3 }
   0xa   : > { %p8609_p7 = scmp.ge.s32.totalorder %s11044_s12, 1  ;;  %p291_p8 = scmp.lt.s32.totalorder %s11044_s12, 3 }
   0xc   : > { %p292_p9 = pnand %p8609_p7, %p291_p8 }
   0xe   : > { %295 = sbr.rel (%p292_p9) target bundleno = 1527 (0x5f7), region = 56 }
  0x15   : > { %v10221_v0 = vld [vmem:[%s14906_s1 + $0x4] ss:$8 sps:$4 sm:$0xff]   ;;  %v10223_v1 = vld [vmem:[%s14906_s1] ss:$8 sps:$4 sm:$0xff]   ;;  %v11046_v2 = vmov 0   ;;  %s327_s21 = smul.u32 13, %s11121_s13 }
  0x16   : > { %495 = vmatprep.mubr.bf16.mxu0 %v11046_v2  ;;  %463 = vmatprep.subr.bf16.mxu0 %v10221_v0  ;;  %v10224_v3 = vld [vmem:[%s14906_s1 + $0x14] ss:$8 sps:$4 sm:$0xff]   ;;  %v10226_v4 = vld [vmem:[%s14906_s1 + $0x10] ss:$8 sps:$4 sm:$0xff]   ;;  %v10227_v5 = vld [vmem:[%s14906_s1 + $0x24] ss:$8 sps:$4 sm:$0xff]  }
  0x17   : > { %464 = vmatpush1.bf16.msra.mxu0 %v10223_v1  ;;  %v10229_v6 = vld [vmem:[%s14906_s1 + $0x20] ss:$8 sps:$4 sm:$0xff]   ;;  %v10230_v7 = vld [vmem:[%s14906_s1 + $0x34] ss:$8 sps:$4 sm:$0xff]   ;;  %v10232_v8 = vld [vmem:[%s14906_s1 + $0x30] ss:$8 sps:$4 sm:$0xff]  }
  0x18   : > { %465 = vmatprep.subr.bf16.mxu0 %v10224_v3  ;;  %p328_p10 = scmp.lt.s32.totalorder %s327_s21, 25  ;;  %v10233_v9 = vld [vmem:[%s14906_s1 + $0x44] ss:$8 sps:$4 sm:$0xff]   ;;  %v10235_v10 = vld [vmem:[%s14906_s1 + $0x40] ss:$8 sps:$4 sm:$0xff]   ;;  %vm8443_vm0 = vcmask 130048  }
  0x19   : > { %v10245_v11 = vld [vmem:[%s14908_s3 + $0x4] ss:$16 sps:$4 sm:$0xff]   ;;  %v10250_v13 = vld [vmem:[%s14908_s3] ss:$16 sps:$4 sm:$0xff]   ;;  %v10249_v26 = vld [vmem:[%s14908_s3 + $0xc] ss:$16 sps:$4 sm:$0xff]  }
  0x1a   : > { %s15063_s21 = smov (!%p328_p10, %s327_s21), 25  ;;  %v10236_v12 = vld [vmem:[%s14906_s1 + $0x54] ss:$8 sps:$4 sm:$0xff]   ;;  %1036 = vmatprep.subr.bf16.mxu1 %v10245_v11  ;;  %v10238_v15 = vld [vmem:[%s14906_s1 + $0x50] ss:$8 sps:$4 sm:$0xff]   ;;  %s11047_s25 = smov [#allocation2]  }
  0x1b   : > { %466 = vmatpush1.bf16.msra.mxu0 %v10226_v4  ;;  %v10251_v14 = vld [vmem:[%s14908_s3 + $0x24] ss:$16 sps:$4 sm:$0xff]   ;;  %s8610_s16 = sshll.u32 %s15063_s21, 3  ;;  %1037 = vmatpush1.bf16.msra.mxu1 %v10250_v13  ;;  %v10256_v17 = vld [vmem:[%s14908_s3 + $0x20] ss:$16 sps:$4 sm:$0xff]   ;;  %s324_s21 = sand.u32 1, %s11036_s10  }
  0x1c   : > { %467 = vmatprep.subr.bf16.mxu0 %v10227_v5  ;;  %v10239_v16 = vld [vmem:[%s14906_s1 + $0x64] ss:$8 sps:$4 sm:$0xff]   ;;  %1038 = vmatprep.subr.bf16.mxu1 %v10251_v14  ;;  %v10241_v19 = vld [vmem:[%s14906_s1 + $0x60] ss:$8 sps:$4 sm:$0xff]   ;;  %v10242_v20 = vld [vmem:[%s14906_s1 + $0x74] ss:$8 sps:$4 sm:$0xff]   ;;  %s11213_s14 = scalar_lea.vmem %s14905_s0, %s8610_s16 }
  0x1d   : > { %v10257_v18 = vld [vmem:[%s14908_s3 + $0x44] ss:$16 sps:$4 sm:$0xff]   ;;  %v10262_v21 = vld [vmem:[%s14908_s3 + $0x40] ss:$16 sps:$4 sm:$0xff]   ;;  %v336_v25 = vld [vmem:[%s11213_s14 + $0x8] sm:$0xff]  ;;  %s10176_s24 = smul.u32 728, %s324_s21 }
  0x1e   : > { %v10263_v22 = vld [vmem:[%s14908_s3 + $0x64] ss:$16 sps:$4 sm:$0xff]   ;;  %v10244_v23 = vld [vmem:[%s14906_s1 + $0x70] ss:$8 sps:$4 sm:$0xff]   ;;  %v10255_v31 = vld [vmem:[%s14908_s3 + $0x2c] ss:$16 sps:$4 sm:$0xff]  }
  0x1f   : > { %468 = vmatpush1.bf16.msra.mxu0 %v10229_v6  ;;  %1039 = vmatpush1.bf16.msra.mxu1 %v10256_v17  ;;  %v335_v24 = vld [vmem:[%s11213_s14] sm:$0xff]  ;;  %v10247_v30 = vld [vmem:[%s14908_s3 + $0x8] ss:$16 sps:$4 sm:$0xff]   ;;  %v337_v33 = vld [vmem:[%s11213_s14 + $0x10] sm:$0xff]  ;;  %s14515_s29 = scalar_lea.vmem [#allocation2], %s10176_s24  ;;  %s10986_s26 = sshll.u32 %s11047_s25, 4  ;;  %s10987_s26 = int_to_ptr.vmem [resolvable:$false] %s10986_s26 }
  0x20   : > { %469 = vmatprep.subr.bf16.mxu0 %v10230_v7  ;;  %1040 = vmatprep.subr.bf16.mxu1 %v10257_v18  ;;  %v10268_v27 = vld [vmem:[%s14908_s3 + $0x60] ss:$16 sps:$4 sm:$0xff]   ;;  %v10269_v28 = vld [vmem:[%s14908_s3 + $0x84] ss:$16 sps:$4 sm:$0xff]   ;;  %v348_v29 = vpack.c.bf16 %v336_v25, %v335_v24  ;;  %v338_v35 = vld [vmem:[%s11213_s14 + $0x18] sm:$0xff]  ;;  %s8544_s28 = sshll.u32 %s14515_s29, 4  ;;  %s14857_s28 = int_to_ptr.vmem [resolvable:$true] %s8544_s28 }
  0x21   : > { %v10274_v32 = vld [vmem:[%s14908_s3 + $0x80] ss:$16 sps:$4 sm:$0xff]   ;;  %v10275_v34 = vld [vmem:[%s14908_s3 + $0xa4] ss:$16 sps:$4 sm:$0xff]   ;;  %v10253_v36 = vld [vmem:[%s14908_s3 + $0x28] ss:$16 sps:$4 sm:$0xff]   ;;  %v349_v40 = vpack.c.bf16 %v338_v35, %v337_v33  ;;  %p10989_p0 = scmp.lt.s32.totalorder %s14857_s28, %s10987_s26 }
  0x22   : > { %v10261_v37 = vld [vmem:[%s14908_s3 + $0x4c] ss:$16 sps:$4 sm:$0xff]   ;;  %v10280_v38 = vld [vmem:[%s14908_s3 + $0xa0] ss:$16 sps:$4 sm:$0xff]   ;;  %v10281_v39 = vld [vmem:[%s14908_s3 + $0xc4] ss:$16 sps:$4 sm:$0xff]  }
  0x23   : > { %470 = vmatpush1.bf16.msra.mxu0 %v10232_v8  ;;  %1041 = vmatpush1.bf16.msra.mxu1 %v10262_v21  ;;  %v10259_v41 = vld [vmem:[%s14908_s3 + $0x48] ss:$16 sps:$4 sm:$0xff]   ;;  %v10267_v42 = vld [vmem:[%s14908_s3 + $0x6c] ss:$16 sps:$4 sm:$0xff]   ;;  %v10286_v43 = vld [vmem:[%s14908_s3 + $0xc0] ss:$16 sps:$4 sm:$0xff]  }
  0x24   : > { %471 = vmatprep.subr.bf16.mxu0 %v10233_v9  ;;  %1042 = vmatprep.subr.bf16.mxu1 %v10263_v22  ;;  %v339_v44 = vld [vmem:[%s11213_s14 + $0x20] sm:$0xff]  ;;  %v340_v46 = vld [vmem:[%s11213_s14 + $0x28] sm:$0xff]  ;;  %v341_v55 = vld [vmem:[%s11213_s14 + $0x30] sm:$0xff]  ;;  %s10982_s24 = scalar_lea.vmem %s14857_s28, 11648  ;;  %s10988_s16 = scalar_lea.vmem %s10987_s26, 23296 }
  0x25   : > { %v10287_v45 = vld [vmem:[%s14908_s3 + $0xe4] ss:$16 sps:$4 sm:$0xff]   ;;  %v10265_v47 = vld [vmem:[%s14908_s3 + $0x68] ss:$16 sps:$4 sm:$0xff]   ;;  %v10273_v48 = vld [vmem:[%s14908_s3 + $0x8c] ss:$16 sps:$4 sm:$0xff]   ;;  %v350_v51 = vpack.c.bf16 %v340_v46, %v339_v44  ;;  %p10983_p11 = scmp.ne.s32.totalorder %s14857_s28, %s10982_s24  ;;  %p10990_p1 = scmp.lt.s32.totalorder %s10988_s16, %s10982_s24 }
  0x26   : > { %v10292_v49 = vld [vmem:[%s14908_s3 + $0xe0] ss:$16 sps:$4 sm:$0xff]   ;;  %v10293_v50 = vld [vmem:[%s14908_s3 + $0x104] ss:$16 sps:$4 sm:$0xff]   ;;  %v10271_v52 = vld [vmem:[%s14908_s3 + $0x88] ss:$16 sps:$4 sm:$0xff]  }
  0x27   : > { %472 = vmatpush1.bf16.msra.mxu0 %v10235_v10  ;;  %1043 = vmatpush1.bf16.msra.mxu1 %v10268_v27  ;;  %v10279_v53 = vld [vmem:[%s14908_s3 + $0xac] ss:$16 sps:$4 sm:$0xff]   ;;  %v10298_v54 = vld [vmem:[%s14908_s3 + $0x100] ss:$16 sps:$4 sm:$0xff]   ;;  %v10277_v57 = vld [vmem:[%s14908_s3 + $0xa8] ss:$16 sps:$4 sm:$0xff]   ;;  %p10984_p12 = pnand %p10983_p11, %p11138_p5  ;;  %p10991_p2 = por %p10990_p1, %p10989_p0 }
  0x28   : > { %473 = vmatprep.subr.bf16.mxu0 %v10236_v12  ;;  %1044 = vmatprep.subr.bf16.mxu1 %v10269_v28  ;;  %v342_v56 = vld [vmem:[%s11213_s14 + $0x38] sm:$0xff]  ;;  %v10299_v58 = vld [vmem:[%s14908_s3 + $0x124] ss:$16 sps:$4 sm:$0xff]   ;;  %v10304_v60 = vld [vmem:[%s14908_s3 + $0x120] ss:$16 sps:$4 sm:$0xff]  }
  0x29   : > { %v10285_v59 = vld [vmem:[%s14908_s3 + $0xcc] ss:$16 sps:$4 sm:$0xff]   ;;  %v10305_v61 = vld [vmem:[%s14908_s3 + $0x144] ss:$16 sps:$4 sm:$0xff]   ;;  %v10283_v62 = vld [vmem:[%s14908_s3 + $0xc8] ss:$16 sps:$4 sm:$0xff]   ;;  %v351_v63 = vpack.c.bf16 %v342_v56, %v341_v55  ;;  %p10985_p13 = pneg %p10984_p12 }
  0x2a   : > { %v10291_v0 = vld [vmem:[%s14908_s3 + $0xec] ss:$16 sps:$4 sm:$0xff]   ;;  %v10310_v1 = vld [vmem:[%s14908_s3 + $0x140] ss:$16 sps:$4 sm:$0xff]   ;;  %v10311_v3 = vld [vmem:[%s14908_s3 + $0x164] ss:$16 sps:$4 sm:$0xff]  }
  0x2b   : > { %474 = vmatpush1.bf16.msra.mxu0 %v10238_v15  ;;  %1045 = vmatpush1.bf16.msra.mxu1 %v10274_v32  ;;  %v343_v4 = vld [vmem:[%s11213_s14 + $0x40] sm:$0xff]  ;;  %v344_v5 = vld [vmem:[%s11213_s14 + $0x48] sm:$0xff]  ;;  %v345_v14 = vld [vmem:[%s11213_s14 + $0x50] sm:$0xff]  ;;  %p10992_p3 = pnand %p10991_p2, %p10985_p13 }
  0x2c   : > { %475 = vmatprep.subr.bf16.mxu0 %v10239_v16  ;;  %1046 = vmatprep.subr.bf16.mxu1 %v10275_v34  ;;  %v10289_v6 = vld [vmem:[%s14908_s3 + $0xe8] ss:$16 sps:$4 sm:$0xff]   ;;  %v10297_v7 = vld [vmem:[%s14908_s3 + $0x10c] ss:$16 sps:$4 sm:$0xff]   ;;  %v10316_v8 = vld [vmem:[%s14908_s3 + $0x160] ss:$16 sps:$4 sm:$0xff]   ;;  %v352_v11 = vpack.c.bf16 %v344_v5, %v343_v4 }
  0x2d   : > { %v10317_v9 = vld [vmem:[%s14908_s3 + $0x184] ss:$16 sps:$4 sm:$0xff]   ;;  %v10295_v10 = vld [vmem:[%s14908_s3 + $0x108] ss:$16 sps:$4 sm:$0xff]   ;;  %v10303_v12 = vld [vmem:[%s14908_s3 + $0x12c] ss:$16 sps:$4 sm:$0xff]  }
  0x2e   : > { %v10322_v13 = vld [vmem:[%s14908_s3 + $0x180] ss:$16 sps:$4 sm:$0xff]   ;;  %v346_v15 = vld [vmem:[%s11213_s14 + $0x58] sm:$0xff]  ;;  %v10335_v33 = vld [vmem:[%s14908_s3 + $0x1e4] ss:$16 sps:$4 sm:$0xff]  }
  0x2f   : > { %476 = vmatpush1.bf16.msra.mxu0 %v10241_v19  ;;  %1047 = vmatpush1.bf16.msra.mxu1 %v10280_v38  ;;  %v10301_v16 = vld [vmem:[%s14908_s3 + $0x128] ss:$16 sps:$4 sm:$0xff]   ;;  %v10309_v17 = vld [vmem:[%s14908_s3 + $0x14c] ss:$16 sps:$4 sm:$0xff]   ;;  %v353_v19 = vpack.c.bf16 %v346_v15, %v345_v14  ;;  %v347_v21 = vld [vmem:[%s11213_s14 + $0x60] sm:$0xff]  ;;  %s10184_s14 = smul.u32 11648, %s11121_s13 }
  0x30   : > { %477 = vmatprep.subr.bf16.mxu0 %v10242_v20  ;;  %1048 = vmatprep.subr.bf16.mxu1 %v10281_v39  ;;  %v10307_v18 = vld [vmem:[%s14908_s3 + $0x148] ss:$16 sps:$4 sm:$0xff]   ;;  %v10315_v20 = vld [vmem:[%s14908_s3 + $0x16c] ss:$16 sps:$4 sm:$0xff]   ;;  %v354_v25 = vpack.c.bf16 %v347_v21, %v347_v21  ;;  %v10328_v28 = vld [vmem:[%s14908_s3 + $0x1a0] ss:$16 sps:$4 sm:$0xff]  }
  0x31   : > { %v10313_v22 = vld [vmem:[%s14908_s3 + $0x168] ss:$16 sps:$4 sm:$0xff]   ;;  %v10327_v27 = vld [vmem:[%s14908_s3 + $0x1ac] ss:$16 sps:$4 sm:$0xff]   ;;  %v10334_v32 = vld [vmem:[%s14908_s3 + $0x1c0] ss:$16 sps:$4 sm:$0xff]   ;;  %s14855_s23 = scalar_lea.hbm %s14914_s9, %s10184_s14 }
  0x32   : > { %v10319_v24 = vld [vmem:[%s14908_s3 + $0x188] ss:$16 sps:$4 sm:$0xff]   ;;  %v10339_v34 = vld [vmem:[%s14908_s3 + $0x1ec] ss:$16 sps:$4 sm:$0xff]   ;;  %v1374_v38 = vld [vmem:[%s14910_s5 + $0x20] sm:$0xff]  ;;  %s14864_s13 = scalar_lea.sflag [#allocation3], %s324_s21 }
  0x33   : > { %478 = vmatpush1.bf16.msra.mxu0 %v10244_v23  ;;  %1049 = vmatpush1.bf16.msra.mxu1 %v10286_v43  ;;  %v10321_v23 = vld [vmem:[%s14908_s3 + $0x18c] ss:$16 sps:$4 sm:$0xff]   ;;  %v10337_v35 = vld [vmem:[%s14908_s3 + $0x1e8] ss:$16 sps:$4 sm:$0xff]   ;;  %v1386_v21 = vld [vmem:[%s14910_s5 + $0x80] sm:$0xff] }
  0x34   : > { %1137 = vmatprep.subr.bf16.mxu0 %v10249_v26  ;;  %1050 = vmatprep.subr.bf16.mxu1 %v10287_v45  ;;  %v10323_v26 = vld [vmem:[%s14908_s3 + $0x1a4] ss:$16 sps:$4 sm:$0xff]   ;;  %v1371_v39 = vld [vmem:[%s14910_s5 + $0x8] sm:$0xff]  ;;  %v373_v45 = vlaneseq }
  0x36   : > { %496 = vmatmul.mubr.bf16.vlgmr.msra.gmra.mrb[0].mxu0 %v348_v29  ;;  %v10329_v29 = vld [vmem:[%s14908_s3 + $0x1c4] ss:$16 sps:$4 sm:$0xff]   ;;  %v11430_v46 = vshrl.u32 %v373_v45, 7 }
  0x37   : > { %505 = vmatprep.mubr.bf16.mxu0 %v11046_v2  ;;  %1138 = vmatpush1.bf16.msra.mxu0 %v10247_v30  ;;  %v10333_v30 = vld [vmem:[%s14908_s3 + $0x1cc] ss:$16 sps:$4 sm:$0xff]  }
  0x38   : > { %1139 = vmatprep.subr.bf16.mxu0 %v10255_v31  ;;  %1051 = vmatpush1.bf16.msra.mxu1 %v10292_v49  ;;  %v10331_v31 = vld [vmem:[%s14908_s3 + $0x1c8] ss:$16 sps:$4 sm:$0xff]   ;;  %14968 = vst [vmem:[#allocation5_spill] sm:$0xff] %v11430_v46  ;;  %v11439_v49 = vsub.s32 1, %v11430_v46 }
  0x39   : > { %1052 = vmatprep.subr.bf16.mxu1 %v10293_v50 }
  0x3a   : > { %14970 = vst [vmem:[#allocation7_spill] sm:$0xff] %v11439_v49 }
  0x3b   : > { %1140 = vmatpush1.bf16.msra.mxu0 %v10253_v36  ;;  %v10340_v36 = vld [vmem:[%s14908_s3 + $0x1e0] ss:$16 sps:$4 sm:$0xff]  }
  0x3c   : > { %1141 = vmatprep.subr.bf16.mxu0 %v10261_v37  ;;  %1053 = vmatpush1.bf16.msra.mxu1 %v10298_v54  ;;  %v11417_v37 = vld [vmem:[%s14910_s5] sm:$0xff] }
  0x3d   : > { %1054 = vmatprep.subr.bf16.mxu1 %v10299_v58 }
  0x3e   : > { %506 = vmatmul.mubr.bf16.gmra.mrb[4].mxu0 %v349_v40  ;;  %v8691_v40 = vcombine.low %v11417_v37, %v1374_v38 }
  0x3f   : > { %515 = vmatprep.mubr.bf16.mxu0 %v11046_v2  ;;  %1142 = vmatpush1.bf16.msra.mxu0 %v10259_v41  ;;  %v8692_v41 = vcombine.high %v11417_v37, %v1374_v38  ;;  %v1398_v38 = vld [vmem:[%s14910_s5 + $0xe0] sm:$0xff] }
  0x40   : > { %1143 = vmatprep.subr.bf16.mxu0 %v10267_v42  ;;  %1055 = vmatpush1.bf16.msra.mxu1 %v10304_v60  ;;  %v1375_v42 = vld [vmem:[%s14910_s5 + $0x28] sm:$0xff] }
  0x41   : > { %1056 = vmatprep.subr.bf16.mxu1 %v10305_v61  ;;  %v8693_v43 = vcombine.low %v1371_v39, %v1375_v42  ;;  %v8694_v44 = vcombine.high %v1371_v39, %v1375_v42  ;;  %v1395_v39 = vld [vmem:[%s14910_s5 + $0xc8] sm:$0xff] }
  0x43   : > { %1144 = vmatpush1.bf16.msra.mxu0 %v10265_v47  ;;  %v371_v47 = vld [vmem:[%s14907_s2] sm:$0x3] }
  0x44   : > { %1145 = vmatprep.subr.bf16.mxu0 %v10273_v48  ;;  %1057 = vmatpush1.bf16.msra.mxu1 %v10310_v1  ;;  %v11436_v48 = vsub.s32 0, %v11430_v46 }
  0x45   : > { %1058 = vmatprep.subr.bf16.mxu1 %v10311_v3  ;;  %v1378_v3 = vld [vmem:[%s14910_s5 + $0x40] sm:$0xff] }
  0x46   : > { %516 = vmatmul.mubr.bf16.gmra.mrb[8].mxu0 %v350_v51  ;;  %14969 = vst [vmem:[#allocation6_spill] sm:$0xff] %v11436_v48  ;;  %v11442_v50 = vrot.slane %v371_v47, %v11436_v48  ;;  %v11445_v51 = vrot.slane %v371_v47, %v11439_v49 }
  0x47   : > { %525 = vmatprep.mubr.bf16.mxu0 %v11046_v2  ;;  %1146 = vmatpush1.bf16.msra.mxu0 %v10271_v52 }
  0x48   : > { %1147 = vmatprep.subr.bf16.mxu0 %v10279_v53  ;;  %1059 = vmatpush1.bf16.msra.mxu1 %v10316_v8  ;;  %v1379_v8 = vld [vmem:[%s14910_s5 + $0x48] sm:$0xff] }
  0x49   : > { %1060 = vmatprep.subr.bf16.mxu1 %v10317_v9  ;;  %v1383_v9 = vld [vmem:[%s14910_s5 + $0x68] sm:$0xff] }
  0x4b   : > { %1148 = vmatpush1.bf16.msra.mxu0 %v10277_v57 }
  0x4c   : > { %1149 = vmatprep.subr.bf16.mxu0 %v10285_v59  ;;  %1061 = vmatpush1.bf16.msra.mxu1 %v10322_v13 }
  0x4d   : > { %1062 = vmatprep.subr.bf16.mxu1 %v10323_v26  ;;  %v1391_v26 = vld [vmem:[%s14910_s5 + $0xa8] sm:$0xff] }
  0x4e   : > { %526 = vmatmul.mubr.bf16.gmra.mrb[12].mxu0 %v351_v63 }
  0x4f   : > { %535 = vmatprep.mubr.bf16.mxu0 %v11046_v2  ;;  %1150 = vmatpush1.bf16.msra.mxu0 %v10283_v62 }
  0x50   : > { %1151 = vmatprep.subr.bf16.mxu0 %v10291_v0  ;;  %1063 = vmatpush1.bf16.msra.mxu1 %v10328_v28 }
  0x51   : > { %1064 = vmatprep.subr.bf16.mxu1 %v10329_v29 }
  0x53   : > { %1152 = vmatpush1.bf16.msra.mxu0 %v10289_v6 }
  0x54   : > { %1153 = vmatprep.subr.bf16.mxu0 %v10297_v7  ;;  %1065 = vmatpush1.bf16.msra.mxu1 %v10334_v32  ;;  %v1382_v7 = vld [vmem:[%s14910_s5 + $0x60] sm:$0xff] }
  0x55   : > { %1066 = vmatprep.subr.bf16.mxu1 %v10335_v33 }
  0x56   : > { %536 = vmatmul.mubr.bf16.gmra.mrb[16].mxu0 %v352_v11 }
  0x57   : > { %545 = vmatprep.mubr.bf16.mxu0 %v11046_v2  ;;  %1154 = vmatpush1.bf16.msra.mxu0 %v10295_v10 }
  0x58   : > { %1155 = vmatprep.subr.bf16.mxu0 %v10303_v12  ;;  %1067 = vmatpush1.bf16.msra.mxu1 %v10340_v36 }
  0x59   : > { %2948 = vmatprep.subr.bf16.mxu1 %v8692_v41 }
  0x5b   : > { %1156 = vmatpush1.bf16.msra.mxu0 %v10301_v16 }
  0x5c   : > { %1157 = vmatprep.subr.bf16.mxu0 %v10309_v17 }
  0x5e   : > { %546 = vmatmul.mubr.bf16.gmra.mrb[20].mxu0 %v353_v19  ;;  %v8700_v19 = vcombine.high %v1378_v3, %v1382_v7 }
  0x5f   : > { %555 = vmatprep.mubr.bf16.mxu0 %v11046_v2  ;;  %1158 = vmatpush1.bf16.msra.mxu0 %v10307_v18  ;;  %v10325_v2 = vld [vmem:[%s14908_s3 + $0x1a8] ss:$16 sps:$4 sm:$0xff]  }
  0x60   : > { %1159 = vmatprep.subr.bf16.mxu0 %v10315_v20  ;;  %v8702_v20 = vcombine.high %v1379_v8, %v1383_v9 }
  0x63   : > { %1160 = vmatpush1.bf16.msra.mxu0 %v10313_v22 }
  0x64   : > { %1161 = vmatprep.subr.bf16.mxu0 %v10321_v23 }
  0x66   : > { %556 = vmatmul.mubr.bf16.gmra.mrb[24].mxu0 %v354_v25  ;;  %v1387_v25 = vld [vmem:[%s14910_s5 + $0x88] sm:$0xff] }
  0x67   : > { %1162 = vmatpush1.bf16.msra.mxu0 %v10319_v24  ;;  %v1390_v24 = vld [vmem:[%s14910_s5 + $0xa0] sm:$0xff] }
  0x68   : > { %1163 = vmatprep.subr.bf16.mxu0 %v10327_v27  ;;  %v8708_v33 = vcombine.high %v1386_v21, %v1390_v24 }
  0x6b   : > { %1164 = vmatpush1.bf16.msra.mxu0 %v10325_v2 }
  0x6c   : > { %1165 = vmatprep.subr.bf16.mxu0 %v10333_v30  ;;  %v8699_v30 = vcombine.low %v1378_v3, %v1382_v7 }
  0x6f   : > { %1166 = vmatpush1.bf16.msra.mxu0 %v10331_v31  ;;  %v8701_v31 = vcombine.low %v1379_v8, %v1383_v9 }
  0x70   : > { %1167 = vmatprep.subr.bf16.mxu0 %v10339_v34  ;;  %v8710_v34 = vcombine.high %v1387_v25, %v1391_v26 }
  0x73   : > { %1168 = vmatpush1.bf16.msra.mxu0 %v10337_v35  ;;  %v1394_v35 = vld [vmem:[%s14910_s5 + $0xc0] sm:$0xff] }
  0x74   : > { %3150 = vmatprep.subr.bf16.mxu0 %v8694_v44  ;;  %v8707_v44 = vcombine.low %v1386_v21, %v1390_v24 }
 0x109   : > { %v497_v52 = vpop.f32.mrb[0].mxu0 }
 0x10a   : > { %v498_v53 = vadd.f32 %v497_v52, %v11442_v50  ;;  %v499_v54 = vpop.f32.mrb[1].mxu0 }
 0x10b   : > { %v500_v55 = vadd.f32 %v499_v54, %v11445_v51  ;;  %v501_v56 = vpop.f32.mrb[2].mxu0 }
 0x10c   : > { %v564_v57 = vmul.f32 0.2, %v498_v53  ;;  %v502_v58 = vadd.f32 %v501_v56, %v11442_v50  ;;  %v503_v59 = vpop.f32.mrb[3].mxu0 }
 0x10d   : > { %v565_v60 = vmul.f32 0.2, %v500_v55  ;;  %v504_v61 = vadd.f32 %v503_v59, %v11445_v51  ;;  %v1402_v59 = vld [vmem:[%s14910_s5 + $0x100] sm:$0xff] }
 0x10e   : > { %v566_v62 = vmul.f32 0.2, %v502_v58  ;;  %v590_v0 = vmax.f32 %v498_v53, %v564_v57  ;;  %v8709_v53 = vcombine.low %v1387_v25, %v1391_v26  ;;  %v8716_v57 = vcombine.high %v1394_v35, %v1398_v38 }
 0x10f   : > { %v567_v63 = vmul.f32 0.2, %v504_v61  ;;  %v591_v4 = vmax.f32 %v500_v55, %v565_v60 }
 0x110   : > { %v592_v1 = vmax.f32 %v502_v58, %v566_v62  ;;  %v1406_v62 = vld [vmem:[%s14910_s5 + $0x120] sm:$0xff] }
 0x111   : > { %v593_v5 = vmax.f32 %v504_v61, %v567_v63  ;;  %v507_v6 = vpop.f32.mrb[4].mxu0  ;;  %v1403_v63 = vld [vmem:[%s14910_s5 + $0x108] sm:$0xff]  ;;  %v8724_v9 = vcombine.high %v1402_v59, %v1406_v62 }
 0x112   : > { %v508_v10 = vadd.f32 %v507_v6, %v11442_v50  ;;  %v509_v11 = vpop.f32.mrb[5].mxu0  ;;  %v616_v12 = vpack.c.bf16 %v592_v1, %v590_v0  ;;  %v1407_v0 = vld [vmem:[%s14910_s5 + $0x128] sm:$0xff]  ;;  %v8715_v6 = vcombine.low %v1394_v35, %v1398_v38 }
 0x113   : > { %v510_v13 = vadd.f32 %v509_v11, %v11445_v51  ;;  %v511_v14 = vpop.f32.mrb[6].mxu0  ;;  %v617_v15 = vpack.c.bf16 %v593_v5, %v591_v4  ;;  %v1410_v11 = vld [vmem:[%s14910_s5 + $0x140] sm:$0xff]  ;;  %v8725_v24 = vcombine.low %v1403_v63, %v1407_v0 }
 0x114   : > { %v568_v16 = vmul.f32 0.2, %v508_v10  ;;  %v512_v17 = vadd.f32 %v511_v14, %v11442_v50  ;;  %v513_v18 = vpop.f32.mrb[7].mxu0  ;;  %v1414_v14 = vld [vmem:[%s14910_s5 + $0x160] sm:$0xff] }
 0x115   : > { %v569_v22 = vmul.f32 0.2, %v510_v13  ;;  %v514_v23 = vadd.f32 %v513_v18, %v11445_v51  ;;  %1068 = vmatprep.mubr.bf16.mxu1 %v617_v15  ;;  %1169 = vmatprep.mubr.bf16.mxu0 %v617_v15  ;;  %v1411_v15 = vld [vmem:[%s14910_s5 + $0x148] sm:$0xff] }
 0x116   : > { %v594_v27 = vmax.f32 %v508_v10, %v568_v16  ;;  %v570_v2 = vmul.f32 0.2, %v512_v17  ;;  %1069 = vmatmul.mubr.bf16.vlgmr.msra.gmra.mrb[0].mxu1 %v616_v12  ;;  %1170 = vmatmul.mubr.bf16.vlgmr.msra.gmra.mrb[28].mxu0 %v616_v12  ;;  %v8726_v10 = vcombine.high %v1403_v63, %v1407_v0  ;;  %v1415_v16 = vld [vmem:[%s14910_s5 + $0x168] sm:$0xff] }
 0x117   : > { %v595_v28 = vmax.f32 %v510_v13, %v569_v22  ;;  %v571_v29 = vmul.f32 0.2, %v514_v23  ;;  %2949 = vmatpush1.bf16.msra.mxu1 %v8691_v40  ;;  %3151 = vmatpush1.bf16.msra.mxu0 %v8693_v43  ;;  %v1399_v40 = vld [vmem:[%s14910_s5 + $0xe8] sm:$0xff] }
 0x118   : > { %v596_v32 = vmax.f32 %v512_v17, %v570_v2  ;;  %2950 = vmatprep.subr.bf16.mxu1 %v8700_v19  ;;  %3152 = vmatprep.subr.bf16.mxu0 %v8702_v20  ;;  %v8718_v58 = vcombine.high %v1395_v39, %v1399_v40  ;;  %v8717_v7 = vcombine.low %v1395_v39, %v1399_v40 }
 0x119   : > { %v597_v36 = vmax.f32 %v514_v23, %v571_v29  ;;  %v517_v37 = vpop.f32.mrb[8].mxu0  ;;  %v8723_v20 = vcombine.low %v1402_v59, %v1406_v62  ;;  %v8732_v2 = vcombine.high %v1410_v11, %v1414_v14  ;;  %v1418_v29 = vld [vmem:[%s14910_s5 + $0x180] sm:$0xff]  ;;  %v8731_v39 = vcombine.low %v1410_v11, %v1414_v14 }
 0x11a   : > { %v518_v41 = vadd.f32 %v517_v37, %v11442_v50  ;;  %v519_v42 = vpop.f32.mrb[9].mxu0  ;;  %v618_v43 = vpack.c.bf16 %v596_v32, %v594_v27  ;;  %v1422_v32 = vld [vmem:[%s14910_s5 + $0x1a0] sm:$0xff]  ;;  %v8733_v40 = vcombine.low %v1411_v15, %v1415_v16 }
 0x11b   : > { %v520_v45 = vadd.f32 %v519_v42, %v11445_v51  ;;  %v521_v47 = vpop.f32.mrb[10].mxu0  ;;  %v619_v52 = vpack.c.bf16 %v597_v36, %v595_v28  ;;  %2951 = vmatpush1.bf16.msra.mxu1 %v8699_v30  ;;  %3153 = vmatpush1.bf16.msra.mxu0 %v8701_v31  ;;  %v8734_v28 = vcombine.high %v1411_v15, %v1415_v16 }
 0x11c   : > { %v572_v54 = vmul.f32 0.2, %v518_v41  ;;  %v522_v55 = vadd.f32 %v521_v47, %v11442_v50  ;;  %v523_v56 = vpop.f32.mrb[11].mxu0  ;;  %2952 = vmatprep.subr.bf16.mxu1 %v8708_v33  ;;  %3154 = vmatprep.subr.bf16.mxu0 %v8710_v34  ;;  %v1419_v33 = vld [vmem:[%s14910_s5 + $0x188] sm:$0xff]  ;;  %v8740_v42 = vcombine.high %v1418_v29, %v1422_v32 }
 0x11d   : > { %v573_v60 = vmul.f32 0.2, %v520_v45  ;;  %v524_v61 = vadd.f32 %v523_v56, %v11445_v51  ;;  %1078 = vmatprep.mubr.bf16.mxu1 %v619_v52  ;;  %1179 = vmatprep.mubr.bf16.mxu0 %v619_v52  ;;  %v1423_v34 = vld [vmem:[%s14910_s5 + $0x1a8] sm:$0xff]  ;;  %v1430_v52 = vld [vmem:[%s14910_s5 + $0x1e0] sm:$0xff] }
 0x11e   : > { %v598_v1 = vmax.f32 %v518_v41, %v572_v54  ;;  %v574_v3 = vmul.f32 0.2, %v522_v55  ;;  %1079 = vmatmul.mubr.bf16.gmra.mrb[4].mxu1 %v618_v43  ;;  %1180 = vmatmul.mubr.bf16.gmra.mrb[32].mxu0 %v618_v43  ;;  %v8742_v43 = vcombine.high %v1419_v33, %v1423_v34  ;;  %v1431_v54 = vld [vmem:[%s14910_s5 + $0x1e8] sm:$0xff]  ;;  %v8741_v62 = vcombine.low %v1419_v33, %v1423_v34 }
 0x11f   : > { %v599_v4 = vmax.f32 %v520_v45, %v573_v60  ;;  %v575_v5 = vmul.f32 0.2, %v524_v61  ;;  %2953 = vmatpush1.bf16.msra.mxu1 %v8707_v44  ;;  %3155 = vmatpush1.bf16.msra.mxu0 %v8709_v53  ;;  %v1426_v44 = vld [vmem:[%s14910_s5 + $0x1c0] sm:$0xff]  ;;  %v1427_v53 = vld [vmem:[%s14910_s5 + $0x1c8] sm:$0xff] }
 0x120   : > { %v600_v8 = vmax.f32 %v522_v55, %v574_v3  ;;  %2954 = vmatprep.subr.bf16.mxu1 %v8716_v57  ;;  %3156 = vmatprep.subr.bf16.mxu0 %v8718_v58  ;;  %v8739_v58 = vcombine.low %v1418_v29, %v1422_v32  ;;  %v8748_v3 = vcombine.high %v1426_v44, %v1430_v52 }
 0x121   : > { %v601_v12 = vmax.f32 %v524_v61, %v575_v5  ;;  %v527_v13 = vpop.f32.mrb[12].mxu0  ;;  %v1434_v5 = vld [vmem:[%s14910_s5 + $0x200] sm:$0xff]  ;;  %v8747_v15 = vcombine.low %v1426_v44, %v1430_v52  ;;  %v8749_v16 = vcombine.low %v1427_v53, %v1431_v54 }
 0x122   : > { %v528_v17 = vadd.f32 %v527_v13, %v11442_v50  ;;  %v529_v18 = vpop.f32.mrb[13].mxu0  ;;  %v620_v19 = vpack.c.bf16 %v600_v8, %v598_v1  ;;  %v1438_v8 = vld [vmem:[%s14910_s5 + $0x220] sm:$0xff] }
 0x123   : > { %v530_v21 = vadd.f32 %v529_v18, %v11445_v51  ;;  %v531_v22 = vpop.f32.mrb[14].mxu0  ;;  %v621_v23 = vpack.c.bf16 %v601_v12, %v599_v4  ;;  %2955 = vmatpush1.bf16.msra.mxu1 %v8715_v6  ;;  %3157 = vmatpush1.bf16.msra.mxu0 %v8717_v7  ;;  %v8750_v4 = vcombine.high %v1427_v53, %v1431_v54 }
 0x124   : > { %v576_v25 = vmul.f32 0.2, %v528_v17  ;;  %v532_v26 = vadd.f32 %v531_v22, %v11442_v50  ;;  %v533_v27 = vpop.f32.mrb[15].mxu0  ;;  %2956 = vmatprep.subr.bf16.mxu1 %v8724_v9  ;;  %3158 = vmatprep.subr.bf16.mxu0 %v8726_v10  ;;  %v1435_v9 = vld [vmem:[%s14910_s5 + $0x208] sm:$0xff]  ;;  %v8756_v18 = vcombine.high %v1434_v5, %v1438_v8 }
 0x125   : > { %v577_v30 = vmul.f32 0.2, %v530_v21  ;;  %v534_v31 = vadd.f32 %v533_v27, %v11445_v51  ;;  %1088 = vmatprep.mubr.bf16.mxu1 %v621_v23  ;;  %1189 = vmatprep.mubr.bf16.mxu0 %v621_v23  ;;  %v1439_v10 = vld [vmem:[%s14910_s5 + $0x228] sm:$0xff]  ;;  %v1446_v23 = vld [vmem:[%s14910_s5 + $0x260] sm:$0xff] }
 0x126   : > { %v602_v35 = vmax.f32 %v528_v17, %v576_v25  ;;  %v578_v36 = vmul.f32 0.2, %v532_v26  ;;  %1089 = vmatmul.mubr.bf16.gmra.mrb[8].mxu1 %v620_v19  ;;  %1190 = vmatmul.mubr.bf16.gmra.mrb[36].mxu0 %v620_v19  ;;  %v8758_v19 = vcombine.high %v1435_v9, %v1439_v10  ;;  %v1447_v25 = vld [vmem:[%s14910_s5 + $0x268] sm:$0xff]  ;;  %v8757_v32 = vcombine.low %v1435_v9, %v1439_v10 }
 0x127   : > { %v603_v37 = vmax.f32 %v530_v21, %v577_v30  ;;  %v579_v38 = vmul.f32 0.2, %v534_v31  ;;  %2957 = vmatpush1.bf16.msra.mxu1 %v8723_v20  ;;  %3159 = vmatpush1.bf16.msra.mxu0 %v8725_v24  ;;  %v1442_v20 = vld [vmem:[%s14910_s5 + $0x240] sm:$0xff]  ;;  %v1443_v24 = vld [vmem:[%s14910_s5 + $0x248] sm:$0xff] }
 0x128   : > { %v604_v41 = vmax.f32 %v532_v26, %v578_v36  ;;  %2958 = vmatprep.subr.bf16.mxu1 %v8732_v2  ;;  %3160 = vmatprep.subr.bf16.mxu0 %v8734_v28  ;;  %v8755_v28 = vcombine.low %v1434_v5, %v1438_v8  ;;  %v8764_v36 = vcombine.high %v1442_v20, %v1446_v23 }
 0x129   : > { %v605_v45 = vmax.f32 %v534_v31, %v579_v38  ;;  %v537_v47 = vpop.f32.mrb[16].mxu0  ;;  %v1450_v38 = vld [vmem:[%s14910_s5 + $0x280] sm:$0xff]  ;;  %v8763_v53 = vcombine.low %v1442_v20, %v1446_v23  ;;  %v8765_v54 = vcombine.low %v1443_v24, %v1447_v25 }
 0x12a   : > { %v538_v55 = vadd.f32 %v537_v47, %v11442_v50  ;;  %v539_v56 = vpop.f32.mrb[17].mxu0  ;;  %v622_v57 = vpack.c.bf16 %v604_v41, %v602_v35  ;;  %v1454_v41 = vld [vmem:[%s14910_s5 + $0x2a0] sm:$0xff] }
 0x12b   : > { %v540_v59 = vadd.f32 %v539_v56, %v11445_v51  ;;  %v541_v60 = vpop.f32.mrb[18].mxu0  ;;  %v623_v61 = vpack.c.bf16 %v605_v45, %v603_v37  ;;  %2959 = vmatpush1.bf16.msra.mxu1 %v8731_v39  ;;  %3161 = vmatpush1.bf16.msra.mxu0 %v8733_v40  ;;  %v8766_v37 = vcombine.high %v1443_v24, %v1447_v25 }
 0x12c   : > { %v580_v63 = vmul.f32 0.2, %v538_v55  ;;  %v542_v0 = vadd.f32 %v541_v60, %v11442_v50  ;;  %v543_v1 = vpop.f32.mrb[19].mxu0  ;;  %2960 = vmatprep.subr.bf16.mxu1 %v8740_v42  ;;  %3162 = vmatprep.subr.bf16.mxu0 %v8742_v43  ;;  %v1451_v42 = vld [vmem:[%s14910_s5 + $0x288] sm:$0xff]  ;;  %v8772_v56 = vcombine.high %v1450_v38, %v1454_v41 }
 0x12d   : > { %v581_v6 = vmul.f32 0.2, %v540_v59  ;;  %v544_v7 = vadd.f32 %v543_v1, %v11445_v51  ;;  %1098 = vmatprep.mubr.bf16.mxu1 %v623_v61  ;;  %1199 = vmatprep.mubr.bf16.mxu0 %v623_v61  ;;  %v1455_v43 = vld [vmem:[%s14910_s5 + $0x2a8] sm:$0xff]  ;;  %v1462_v61 = vld [vmem:[%s14910_s5 + $0x2e0] sm:$0xff] }
 0x12e   : > { %v606_v11 = vmax.f32 %v538_v55, %v580_v63  ;;  %v582_v12 = vmul.f32 0.2, %v542_v0  ;;  %1099 = vmatmul.mubr.bf16.gmra.mrb[12].mxu1 %v622_v57  ;;  %1200 = vmatmul.mubr.bf16.gmra.mrb[40].mxu0 %v622_v57  ;;  %v8774_v57 = vcombine.high %v1451_v42, %v1455_v43  ;;  %v1463_v63 = vld [vmem:[%s14910_s5 + $0x2e8] sm:$0xff]  ;;  %v8773_v8 = vcombine.low %v1451_v42, %v1455_v43  ;;  %v1494_v42 = vld [vmem:[%s14910_s5 + $0x3e0] sm:$0xff] }
 0x12f   : > { %v607_v13 = vmax.f32 %v540_v59, %v581_v6  ;;  %v583_v14 = vmul.f32 0.2, %v544_v7  ;;  %2961 = vmatpush1.bf16.msra.mxu1 %v8739_v58  ;;  %3163 = vmatpush1.bf16.msra.mxu0 %v8741_v62  ;;  %v1458_v58 = vld [vmem:[%s14910_s5 + $0x2c0] sm:$0xff]  ;;  %v1459_v62 = vld [vmem:[%s14910_s5 + $0x2c8] sm:$0xff] }
 0x130   : > { %v608_v17 = vmax.f32 %v542_v0, %v582_v12  ;;  %2962 = vmatprep.subr.bf16.mxu1 %v8748_v3  ;;  %3164 = vmatprep.subr.bf16.mxu0 %v8750_v4  ;;  %v8771_v4 = vcombine.low %v1450_v38, %v1454_v41  ;;  %v8782_v12 = vcombine.high %v1459_v62, %v1463_v63  ;;  %v1490_v41 = vld [vmem:[%s14910_s5 + $0x3c0] sm:$0xff]  ;;  %v1491_v43 = vld [vmem:[%s14910_s5 + $0x3c8] sm:$0xff] }
 0x131   : > { %v609_v21 = vmax.f32 %v544_v7, %v583_v14  ;;  %v547_v22 = vpop.f32.mrb[20].mxu0 }
 0x132   : > { %v548_v26 = vadd.f32 %v547_v22, %v11442_v50  ;;  %v549_v27 = vpop.f32.mrb[21].mxu0  ;;  %v624_v2 = vpack.c.bf16 %v608_v17, %v606_v11  ;;  %v8780_v11 = vcombine.high %v1458_v58, %v1462_v61 }
 0x133   : > { %v550_v29 = vadd.f32 %v549_v27, %v11445_v51  ;;  %v551_v30 = vpop.f32.mrb[22].mxu0  ;;  %v625_v31 = vpack.c.bf16 %v609_v21, %v607_v13  ;;  %2963 = vmatpush1.bf16.msra.mxu1 %v8747_v15  ;;  %3165 = vmatpush1.bf16.msra.mxu0 %v8749_v16  ;;  %v1467_v15 = vld [vmem:[%s14910_s5 + $0x308] sm:$0xff]  ;;  %v1478_v27 = vld [vmem:[%s14910_s5 + $0x360] sm:$0xff] }
 0x134   : > { %v584_v33 = vmul.f32 0.2, %v548_v26  ;;  %v552_v34 = vadd.f32 %v551_v30, %v11442_v50  ;;  %v553_v35 = vpop.f32.mrb[23].mxu0  ;;  %2964 = vmatprep.subr.bf16.mxu1 %v8756_v18  ;;  %3166 = vmatprep.subr.bf16.mxu0 %v8758_v19  ;;  %v1471_v16 = vld [vmem:[%s14910_s5 + $0x328] sm:$0xff]  ;;  %v8779_v18 = vcombine.low %v1458_v58, %v1462_v61  ;;  %v8781_v19 = vcombine.low %v1459_v62, %v1463_v63  ;;  %v694_v63 = vld [vmem:[%s14909_s4] sm:$0xf] }
 0x135   : > { %v585_v39 = vmul.f32 0.2, %v550_v29  ;;  %v554_v40 = vadd.f32 %v553_v35, %v11445_v51  ;;  %1108 = vmatprep.mubr.bf16.mxu1 %v625_v31  ;;  %1209 = vmatprep.mubr.bf16.mxu0 %v625_v31  ;;  %v8790_v22 = vcombine.high %v1467_v15, %v1471_v16  ;;  %v8789_v25 = vcombine.low %v1467_v15, %v1471_v16  ;;  %v1483_v35 = vld [vmem:[%s14910_s5 + $0x388] sm:$0xff] }
 0x136   : > { %v610_v44 = vmax.f32 %v548_v26, %v584_v33  ;;  %v586_v45 = vmul.f32 0.2, %v552_v34  ;;  %1109 = vmatmul.mubr.bf16.gmra.mrb[16].mxu1 %v624_v2  ;;  %1210 = vmatmul.mubr.bf16.gmra.mrb[44].mxu0 %v624_v2  ;;  %v1474_v26 = vld [vmem:[%s14910_s5 + $0x340] sm:$0xff]  ;;  %v1475_v2 = vld [vmem:[%s14910_s5 + $0x348] sm:$0xff]  ;;  %v11682_v62 = vsub.s32 2, %v11430_v46 }
 0x137   : > { %v611_v47 = vmax.f32 %v550_v29, %v585_v39  ;;  %v587_v52 = vmul.f32 0.2, %v554_v40  ;;  %2965 = vmatpush1.bf16.msra.mxu1 %v8755_v28  ;;  %3167 = vmatpush1.bf16.msra.mxu0 %v8757_v32  ;;  %v8796_v28 = vcombine.high %v1474_v26, %v1478_v27  ;;  %v1479_v29 = vld [vmem:[%s14910_s5 + $0x368] sm:$0xff]  ;;  %v8795_v30 = vcombine.low %v1474_v26, %v1478_v27  ;;  %v1482_v33 = vld [vmem:[%s14910_s5 + $0x380] sm:$0xff] }
 0x138   : > { %v612_v55 = vmax.f32 %v552_v34, %v586_v45  ;;  %2966 = vmatprep.subr.bf16.mxu1 %v8764_v36  ;;  %3168 = vmatprep.subr.bf16.mxu0 %v8766_v37  ;;  %v8797_v31 = vcombine.low %v1475_v2, %v1479_v29  ;;  %v8798_v32 = vcombine.high %v1475_v2, %v1479_v29  ;;  %v1486_v34 = vld [vmem:[%s14910_s5 + $0x3a0] sm:$0xff]  ;;  %v1487_v37 = vld [vmem:[%s14910_s5 + $0x3a8] sm:$0xff] }
 0x139   : > { %v613_v59 = vmax.f32 %v554_v40, %v587_v52  ;;  %v557_v60 = vpop.f32.mrb[24].mxu0  ;;  %v8804_v36 = vcombine.high %v1482_v33, %v1486_v34  ;;  %v8803_v38 = vcombine.low %v1482_v33, %v1486_v34  ;;  %v8805_v39 = vcombine.low %v1483_v35, %v1487_v37  ;;  %v1495_v45 = vld [vmem:[%s14910_s5 + $0x3e8] sm:$0xff]  ;;  %14971 = vst [vmem:[#allocation8_spill] sm:$0xff] %v11682_v62  ;;  %v11805_v29 = vld [vmem:[%s14910_s5 + $0x540] sm:$0xff] }
 0x13a   : > { %v558_v0 = vadd.f32 %v557_v60, %v11442_v50  ;;  %v559_v1 = vpop.f32.mrb[25].mxu0  ;;  %v626_v3 = vpack.c.bf16 %v612_v55, %v610_v44  ;;  %v1466_v50 = vld [vmem:[%s14910_s5 + $0x300] sm:$0xff]  ;;  %v8806_v40 = vcombine.high %v1483_v35, %v1487_v37  ;;  %v8812_v44 = vcombine.high %v1490_v41, %v1494_v42  ;;  %v11673_v58 = vld [vmem:[%s14910_s5 + $0x428] sm:$0xff] }
 0x13b   : > { %v627_v5 = vpack.c.bf16 %v613_v59, %v611_v47  ;;  %v560_v6 = vadd.f32 %v559_v1, %v11445_v51  ;;  %v561_v7 = vpop.f32.mrb[26].mxu0  ;;  %2967 = vmatpush1.bf16.msra.mxu1 %v8763_v53  ;;  %3169 = vmatpush1.bf16.msra.mxu0 %v8765_v54  ;;  %v1470_v51 = vld [vmem:[%s14910_s5 + $0x320] sm:$0xff]  ;;  %v8811_v47 = vcombine.low %v1490_v41, %v1494_v42 }
 0x13c   : > { %v588_v9 = vmul.f32 0.2, %v558_v0  ;;  %v562_v10 = vpop.f32.mrb[27].mxu0  ;;  %2968 = vmatprep.subr.bf16.mxu1 %v8772_v56  ;;  %3170 = vmatprep.subr.bf16.mxu0 %v8774_v57  ;;  %v8788_v21 = vcombine.high %v1466_v50, %v1470_v51  ;;  %v8787_v24 = vcombine.low %v1466_v50, %v1470_v51  ;;  %v8813_v52 = vcombine.low %v1491_v43, %v1495_v45  ;;  %v11656_v54 = vld [vmem:[%s14910_s5 + $0x400] sm:$0xff]  ;;  %v11666_v56 = vld [vmem:[%s14910_s5 + $0x408] sm:$0xff] }
 0x13d   : > { %1118 = vmatprep.mubr.bf16.mxu1 %v627_v5  ;;  %1219 = vmatprep.mubr.bf16.mxu0 %v627_v5  ;;  %v589_v13 = vmul.f32 0.2, %v560_v6  ;;  %v8814_v53 = vcombine.high %v1491_v43, %v1495_v45  ;;  %v11661_v55 = vld [vmem:[%s14910_s5 + $0x420] sm:$0xff]  ;;  %v8822_v61 = vcombine.high %v11666_v56, %v11673_v58  ;;  %v11708_v5 = vld [vmem:[%s14910_s5 + $0x468] sm:$0xff]  ;;  %v11731_v10 = vrot.slane %v694_v63, %v11436_v48 }
 0x13e   : > { %v614_v14 = vmax.f32 %v558_v0, %v588_v9  ;;  %1119 = vmatmul.mubr.bf16.gmra.mrb[20].mxu1 %v626_v3  ;;  %1220 = vmatmul.mubr.bf16.gmra.mrb[48].mxu0 %v626_v3  ;;  %v8820_v57 = vcombine.high %v11656_v54, %v11661_v55  ;;  %v11688_v0 = vsub.s32 3, %v11430_v46  ;;  %v11693_v1 = vld [vmem:[%s14910_s5 + $0x440] sm:$0xff]  ;;  %v11728_v9 = vld [vmem:[%s14910_s5 + $0x4a8] sm:$0xff] }
 0x13f   : > { %v615_v17 = vmax.f32 %v560_v6, %v589_v13  ;;  %2969 = vmatpush1.bf16.msra.mxu1 %v8771_v4  ;;  %3171 = vmatpush1.bf16.msra.mxu0 %v8773_v8  ;;  %v11698_v3 = vld [vmem:[%s14910_s5 + $0x460] sm:$0xff]  ;;  %v11703_v4 = vld [vmem:[%s14910_s5 + $0x448] sm:$0xff] }
 0x140   : > { %2970 = vmatprep.subr.bf16.mxu1 %v8780_v11  ;;  %3172 = vmatprep.subr.bf16.mxu0 %v8782_v12  ;;  %v628_v23 = vpack.c.bf16 %v614_v14, %v614_v14  ;;  %14972 = vst [vmem:[#allocation9_spill] sm:$0xff] %v11688_v0  ;;  %v11713_v6 = vld [vmem:[%s14910_s5 + $0x480] sm:$0xff]  ;;  %v11723_v8 = vld [vmem:[%s14910_s5 + $0x488] sm:$0xff]  ;;  %v11734_v11 = vrot.slane %v694_v63, %v11682_v62 }
 0x141   : > { %v629_v20 = vpack.c.bf16 %v615_v17, %v615_v17  ;;  %v11718_v7 = vld [vmem:[%s14910_s5 + $0x4a0] sm:$0xff]  ;;  %v11749_v50 = vld [vmem:[%s14910_s5 + $0x4c8] sm:$0xff]  ;;  %v11752_v14 = vrot.slane %v694_v63, %v11439_v49  ;;  %v11755_v51 = vrot.slane %v694_v63, %v11688_v0 }
 0x142   : > { %v11739_v12 = vld [vmem:[%s14910_s5 + $0x4c0] sm:$0xff]  ;;  %v11764_v17 = vld [vmem:[%s14910_s5 + $0x4e8] sm:$0xff] }
 0x143   : > { %1128 = vmatprep.mubr.bf16.mxu1 %v629_v20  ;;  %1229 = vmatprep.mubr.bf16.mxu0 %v629_v20  ;;  %v11744_v13 = vld [vmem:[%s14910_s5 + $0x4e0] sm:$0xff]  ;;  %v11829_v43 = vld [vmem:[%s14910_s5 + $0x548] sm:$0xff] }
 0x144   : > { %2971 = vmatpush1.bf16.msra.mxu1 %v8779_v18  ;;  %3173 = vmatpush1.bf16.msra.mxu0 %v8781_v19  ;;  %v11769_v18 = vld [vmem:[%s14910_s5 + $0x500] sm:$0xff] }
 0x145   : > { %2972 = vmatprep.subr.bf16.mxu1 %v8788_v21  ;;  %3174 = vmatprep.subr.bf16.mxu0 %v8790_v22  ;;  %v11774_v19 = vld [vmem:[%s14910_s5 + $0x520] sm:$0xff] }
 0x146   : > { %1129 = vmatmul.mubr.bf16.gmra.mrb[24].mxu1 %v628_v23  ;;  %1230 = vmatmul.mubr.bf16.gmra.mrb[52].mxu0 %v628_v23  ;;  %v11845_v63 = vld [vmem:[%s14910_s5 + $0x580] sm:$0xff] }
 0x148   : > { %2973 = vmatpush1.bf16.msra.mxu1 %v8787_v24  ;;  %3175 = vmatpush1.bf16.msra.mxu0 %v8789_v25  ;;  %v11787_v24 = vld [vmem:[%s14910_s5 + $0x508] sm:$0xff] }
 0x149   : > { %2974 = vmatprep.subr.bf16.mxu1 %v8796_v28  ;;  %3176 = vmatprep.subr.bf16.mxu0 %v8798_v32  ;;  %v11792_v25 = vld [vmem:[%s14910_s5 + $0x528] sm:$0xff] }
 0x14c   : > { %2975 = vmatpush1.bf16.msra.mxu1 %v8795_v30  ;;  %3177 = vmatpush1.bf16.msra.mxu0 %v8797_v31  ;;  %v11810_v30 = vld [vmem:[%s14910_s5 + $0x560] sm:$0xff] }
 0x14d   : > { %2976 = vmatprep.subr.bf16.mxu1 %v8804_v36  ;;  %3178 = vmatprep.subr.bf16.mxu0 %v8806_v40 }
 0x150   : > { %2977 = vmatpush1.bf16.msra.mxu1 %v8803_v38  ;;  %3179 = vmatpush1.bf16.msra.mxu0 %v8805_v39 }
 0x151   : > { %2978 = vmatprep.subr.bf16.mxu1 %v8812_v44  ;;  %3180 = vmatprep.subr.bf16.mxu0 %v8814_v53 }
 0x154   : > { %2979 = vmatpush1.bf16.msra.mxu1 %v8811_v47  ;;  %3181 = vmatpush1.bf16.msra.mxu0 %v8813_v52 }
 0x155   : > { %3049 = vmatprep.subr.bf16.mxu1 %v8820_v57  ;;  %3251 = vmatprep.subr.bf16.mxu0 %v8822_v61  ;;  %v11840_v61 = vld [vmem:[%s14910_s5 + $0x568] sm:$0xff] }
 0x1e9   : > { %v1070_v31 = vpop.f32.mrb[0].mxu1  ;;  %v1171_v32 = vpop.f32.mrb[28].mxu0 }
 0x1ea   : > { %v1071_v37 = vadd.f32 %v1070_v31, %v11731_v10  ;;  %v1172_v38 = vadd.f32 %v1171_v32, %v11734_v11  ;;  %v1072_v39 = vpop.f32.mrb[1].mxu1  ;;  %v1173_v40 = vpop.f32.mrb[29].mxu0  ;;  %v11850_v31 = vld [vmem:[%s14910_s5 + $0x5a0] sm:$0xff] }
 0x1eb   : > { %v1073_v44 = vadd.f32 %v1072_v39, %v11752_v14  ;;  %v1174_v45 = vadd.f32 %v1173_v40, %v11755_v51  ;;  %v1074_v47 = vpop.f32.mrb[2].mxu1  ;;  %v1175_v52 = vpop.f32.mrb[30].mxu0 }
 0x1ec   : > { %v1238_v32 = vmul.f32 0.2, %v1071_v37  ;;  %v1240_v39 = vmul.f32 0.2, %v1172_v38  ;;  %v1075_v40 = vadd.f32 %v1074_v47, %v11731_v10  ;;  %v1176_v53 = vadd.f32 %v1175_v52, %v11734_v11  ;;  %v1076_v57 = vpop.f32.mrb[3].mxu1  ;;  %v1177_v41 = vpop.f32.mrb[31].mxu0 }
 0x1ed   : > { %v1239_v35 = vmul.f32 0.2, %v1073_v44  ;;  %v1241_v42 = vmul.f32 0.2, %v1174_v45  ;;  %v1077_v36 = vadd.f32 %v1076_v57, %v11752_v14  ;;  %v1178_v33 = vadd.f32 %v1177_v41, %v11755_v51 }
 0x1ee   : > { %v1242_v2 = vmul.f32 0.2, %v1075_v40  ;;  %v1244_v34 = vmul.f32 0.2, %v1176_v53  ;;  %v1290_v23 = vmax.f32 %v1071_v37, %v1238_v32  ;;  %v1292_v57 = vmax.f32 %v1172_v38, %v1240_v39 }
 0x1ef   : > { %v1243_v22 = vmul.f32 0.2, %v1077_v36  ;;  %v1245_v47 = vmul.f32 0.2, %v1178_v33  ;;  %v1291_v15 = vmax.f32 %v1073_v44, %v1239_v35  ;;  %v1293_v21 = vmax.f32 %v1174_v45, %v1241_v42 }
 0x1f0   : > { %v1294_v20 = vmax.f32 %v1075_v40, %v1242_v2  ;;  %v1296_v41 = vmax.f32 %v1176_v53, %v1244_v34  ;;  %v11873_v2 = vld [vmem:[%s14910_s5 + $0x588] sm:$0xff]  ;;  %v14975_v39 = vcombine.high %v11693_v1, %v11698_v3 }
 0x1f1   : > { %v1295_v16 = vmax.f32 %v1077_v36, %v1243_v22  ;;  %v1297_v60 = vmax.f32 %v1178_v33, %v1245_v47  ;;  %v1080_v28 = vpop.f32.mrb[4].mxu1  ;;  %v1181_v59 = vpop.f32.mrb[32].mxu0 }
 0x1f2   : > { %v11864_v46 = vpack.c.bf16 %v1294_v20, %v1290_v23  ;;  %v11866_v26 = vpack.c.bf16 %v1296_v41, %v1292_v57  ;;  %v1081_v0 = vadd.f32 %v1080_v28, %v11731_v10  ;;  %v1182_v52 = vadd.f32 %v1181_v59, %v11734_v11  ;;  %v1082_v49 = vpop.f32.mrb[5].mxu1  ;;  %v1183_v27 = vpop.f32.mrb[33].mxu0  ;;  %v11884_v59 = vld [vmem:[%s14910_s5 + $0x5a8] sm:$0xff]  ;;  %v11889_v28 = vld [vmem:[%s14910_s5 + $0x5c0] sm:$0xff] }
 0x1f3   : > { %v11875_v34 = vpack.c.bf16 %v1295_v16, %v1291_v15  ;;  %v11877_v22 = vpack.c.bf16 %v1297_v60, %v1293_v21  ;;  %v1083_v20 = vadd.f32 %v1082_v49, %v11752_v14  ;;  %v1184_v23 = vadd.f32 %v1183_v27, %v11755_v51  ;;  %v1084_v33 = vpop.f32.mrb[6].mxu1  ;;  %v1185_v35 = vpop.f32.mrb[34].mxu0  ;;  %v11894_v60 = vld [vmem:[%s14910_s5 + $0x5e0] sm:$0xff] }
 0x1f4   : > { %v1246_v49 = vmul.f32 0.2, %v1081_v0  ;;  %v1248_v15 = vmul.f32 0.2, %v1182_v52  ;;  %v1085_v16 = vadd.f32 %v1084_v33, %v11731_v10  ;;  %v1186_v21 = vadd.f32 %v1185_v35, %v11734_v11  ;;  %v1086_v27 = vpop.f32.mrb[7].mxu1  ;;  %v1187_v36 = vpop.f32.mrb[35].mxu0 }
 0x1f5   : > { %v1247_v37 = vmul.f32 0.2, %v1083_v20  ;;  %v1249_v38 = vmul.f32 0.2, %v1184_v23  ;;  %v1087_v42 = vadd.f32 %v1086_v27, %v11752_v14  ;;  %v1188_v44 = vadd.f32 %v1187_v36, %v11755_v51  ;;  %2980 = vmatprep.mubr.bf16.mxu1 %v11875_v34  ;;  %3182 = vmatprep.mubr.bf16.mxu0 %v11875_v34 }
 0x1f6   : > { %v1250_v45 = vmul.f32 0.2, %v1085_v16  ;;  %v1252_v53 = vmul.f32 0.2, %v1186_v21  ;;  %2981 = vmatmul.mubr.bf16.vlgmr.msra.gmra.mrb[28].mxu1 %v11864_v46  ;;  %3183 = vmatmul.mubr.bf16.vlgmr.msra.gmra.mrb[56].mxu0 %v11864_v46  ;;  %v1298_v40 = vmax.f32 %v1081_v0, %v1246_v49  ;;  %v14973_v41 = vcombine.low %v11656_v54, %v11661_v55 }
 0x1f7   : > { %v1251_v47 = vmul.f32 0.2, %v1087_v42  ;;  %v1253_v57 = vmul.f32 0.2, %v1188_v44  ;;  %v14974_v33 = vcombine.low %v11666_v56, %v11673_v58  ;;  %v1300_v27 = vmax.f32 %v1182_v52, %v1248_v15 }
 0x1f8   : > { %3050 = vmatpush1.bf16.msra.mxu1 %v14973_v41  ;;  %v1302_v36 = vmax.f32 %v1085_v16, %v1250_v45  ;;  %v1304_v32 = vmax.f32 %v1186_v21, %v1252_v53  ;;  %v14976_v0 = vcombine.high %v11703_v4, %v11708_v5  ;;  %v1299_v54 = vmax.f32 %v1083_v20, %v1247_v37 }
 0x1f9   : > { %3252 = vmatpush1.bf16.msra.mxu0 %v14974_v33  ;;  %3051 = vmatprep.subr.bf16.mxu1 %v14975_v39  ;;  %v1301_v55 = vmax.f32 %v1184_v23, %v1249_v38  ;;  %v1303_v49 = vmax.f32 %v1087_v42, %v1251_v47  ;;  %v1305_v41 = vmax.f32 %v1188_v44, %v1253_v57  ;;  %v1090_v56 = vpop.f32.mrb[8].mxu1  ;;  %v1191_v58 = vpop.f32.mrb[36].mxu0  ;;  %v11940_v44 = vld [vmem:[%s14910_s5 + $0x5c8] sm:$0xff] }
 0x1fa   : > { %3253 = vmatprep.subr.bf16.mxu0 %v14976_v0  ;;  %v11922_v33 = vpack.c.bf16 %v1302_v36, %v1298_v40  ;;  %v11924_v35 = vpack.c.bf16 %v1304_v32, %v1300_v27  ;;  %v1091_v52 = vadd.f32 %v1090_v56, %v11731_v10  ;;  %v1192_v15 = vadd.f32 %v1191_v58, %v11734_v11  ;;  %v1092_v16 = vpop.f32.mrb[9].mxu1  ;;  %v1193_v21 = vpop.f32.mrb[37].mxu0  ;;  %v11945_v32 = vld [vmem:[%s14910_s5 + $0x5e8] sm:$0xff] }
 0x1fb   : > { %v11928_v45 = vpack.c.bf16 %v1303_v49, %v1299_v54  ;;  %v11930_v53 = vpack.c.bf16 %v1305_v41, %v1301_v55  ;;  %v1093_v20 = vadd.f32 %v1092_v16, %v11752_v14  ;;  %v1194_v23 = vadd.f32 %v1193_v21, %v11755_v51  ;;  %v1094_v38 = vpop.f32.mrb[10].mxu1  ;;  %v1195_v42 = vpop.f32.mrb[38].mxu0 }
 0x1fc   : > { %v14977_v37 = vcombine.low %v11693_v1, %v11698_v3  ;;  %v1254_v39 = vmul.f32 0.2, %v1091_v52  ;;  %v1256_v40 = vmul.f32 0.2, %v1192_v15  ;;  %v14978_v47 = vcombine.low %v11703_v4, %v11708_v5  ;;  %v1096_v57 = vpop.f32.mrb[11].mxu1  ;;  %v1197_v27 = vpop.f32.mrb[39].mxu0 }
 0x1fd   : > { %v1095_v1 = vadd.f32 %v1094_v38, %v11731_v10  ;;  %v1196_v3 = vadd.f32 %v1195_v42, %v11734_v11  ;;  %v14979_v36 = vcombine.high %v11713_v6, %v11718_v7  ;;  %v1255_v0 = vmul.f32 0.2, %v1093_v20  ;;  %2990 = vmatprep.mubr.bf16.mxu1 %v11928_v45  ;;  %3192 = vmatprep.mubr.bf16.mxu0 %v11928_v45 }
 0x1fe   : > { %3052 = vmatpush1.bf16.msra.mxu1 %v14977_v37  ;;  %3254 = vmatpush1.bf16.msra.mxu0 %v14978_v47  ;;  %v1257_v54 = vmul.f32 0.2, %v1194_v23  ;;  %v1097_v55 = vadd.f32 %v1096_v57, %v11752_v14  ;;  %v1198_v49 = vadd.f32 %v1197_v27, %v11755_v51  ;;  %v14980_v41 = vcombine.high %v11723_v8, %v11728_v9 }
 0x1ff   : > { %3053 = vmatprep.subr.bf16.mxu1 %v14979_v36  ;;  %v1258_v4 = vmul.f32 0.2, %v1095_v1  ;;  %v1260_v5 = vmul.f32 0.2, %v1196_v3  ;;  %2991 = vmatmul.mubr.bf16.gmra.mrb[32].mxu1 %v11922_v33  ;;  %v1306_v16 = vmax.f32 %v1091_v52, %v1254_v39  ;;  %v14981_v38 = vcombine.low %v11713_v6, %v11718_v7 }
 0x200   : > { %3255 = vmatprep.subr.bf16.mxu0 %v14980_v41  ;;  %v1259_v21 = vmul.f32 0.2, %v1097_v55  ;;  %v1261_v37 = vmul.f32 0.2, %v1198_v49  ;;  %3193 = vmatmul.mubr.bf16.gmra.mrb[60].mxu0 %v11922_v33  ;;  %v1308_v47 = vmax.f32 %v1192_v15, %v1256_v40  ;;  %v14982_v36 = vcombine.low %v11723_v8, %v11728_v9 }
 0x201   : > { %v1310_v57 = vmax.f32 %v1095_v1, %v1258_v4  ;;  %v1312_v27 = vmax.f32 %v1196_v3, %v1260_v5  ;;  %v14983_v52 = vcombine.high %v11739_v12, %v11744_v13  ;;  %v1307_v39 = vmax.f32 %v1093_v20, %v1255_v0  ;;  %v1201_v58 = vpop.f32.mrb[40].mxu0  ;;  %v11991_v20 = vld [vmem:[%s14910_s5 + $0x600] sm:$0xff] }
 0x202   : > { %3054 = vmatpush1.bf16.msra.mxu1 %v14981_v38  ;;  %3256 = vmatpush1.bf16.msra.mxu0 %v14982_v36  ;;  %v1309_v41 = vmax.f32 %v1194_v23, %v1257_v54  ;;  %v1311_v6 = vmax.f32 %v1097_v55, %v1259_v21  ;;  %v1313_v7 = vmax.f32 %v1198_v49, %v1261_v37  ;;  %v1100_v38 = vpop.f32.mrb[12].mxu1  ;;  %v1203_v3 = vpop.f32.mrb[41].mxu0 }
 0x203   : > { %3055 = vmatprep.subr.bf16.mxu1 %v14983_v52  ;;  %v14984_v56 = vcombine.high %v11749_v50, %v11764_v17  ;;  %v11982_v15 = vpack.c.bf16 %v1310_v57, %v1306_v16  ;;  %v11984_v40 = vpack.c.bf16 %v1312_v27, %v1308_v47  ;;  %v1101_v8 = vadd.f32 %v1100_v38, %v11731_v10  ;;  %v1102_v1 = vpop.f32.mrb[13].mxu1  ;;  %v1205_v5 = vpop.f32.mrb[42].mxu0  ;;  %v12015_v16 = vld [vmem:[%s14910_s5 + $0x628] sm:$0xff] }
 0x204   : > { %v1202_v9 = vadd.f32 %v1201_v58, %v11734_v11  ;;  %v11993_v23 = vpack.c.bf16 %v1311_v6, %v1307_v39  ;;  %v11995_v0 = vpack.c.bf16 %v1313_v7, %v1309_v41  ;;  %v1103_v54 = vadd.f32 %v1102_v1, %v11752_v14  ;;  %v1104_v4 = vpop.f32.mrb[14].mxu1  ;;  %v12010_v58 = vld [vmem:[%s14910_s5 + $0x608] sm:$0xff]  ;;  %v1207_v27 = vpop.f32.mrb[43].mxu0 }
 0x205   : > { %3257 = vmatprep.subr.bf16.mxu0 %v14984_v56  ;;  %v1204_v55 = vadd.f32 %v1203_v3, %v11755_v51  ;;  %v14985_v49 = vcombine.low %v11739_v12, %v11744_v13  ;;  %v12005_v56 = vld [vmem:[%s14910_s5 + $0x620] sm:$0xff]  ;;  %v1262_v21 = vmul.f32 0.2, %v1101_v8  ;;  %v14986_v13 = vcombine.low %v11749_v50, %v11764_v17  ;;  %v1106_v57 = vpop.f32.mrb[15].mxu1 }
 0x206   : > { %v1264_v12 = vmul.f32 0.2, %v1202_v9  ;;  %v1105_v37 = vadd.f32 %v1104_v4, %v11731_v10  ;;  %v1206_v47 = vadd.f32 %v1205_v5, %v11734_v11  ;;  %v14987_v36 = vcombine.high %v11769_v18, %v11774_v19  ;;  %3000 = vmatprep.mubr.bf16.mxu1 %v11993_v23  ;;  %3202 = vmatprep.mubr.bf16.mxu0 %v11993_v23 }
 0x207   : > { %3056 = vmatpush1.bf16.msra.mxu1 %v14985_v49  ;;  %3258 = vmatpush1.bf16.msra.mxu0 %v14986_v13  ;;  %v1263_v52 = vmul.f32 0.2, %v1103_v54  ;;  %v1265_v39 = vmul.f32 0.2, %v1204_v55  ;;  %v1107_v41 = vadd.f32 %v1106_v57, %v11752_v14  ;;  %v1208_v6 = vadd.f32 %v1207_v27, %v11755_v51 }
 0x208   : > { %3057 = vmatprep.subr.bf16.mxu1 %v14987_v36  ;;  %v1266_v50 = vmul.f32 0.2, %v1105_v37  ;;  %v1268_v17 = vmul.f32 0.2, %v1206_v47  ;;  %v14988_v7 = vcombine.high %v11787_v24, %v11792_v25  ;;  %3001 = vmatmul.mubr.bf16.gmra.mrb[36].mxu1 %v11982_v15  ;;  %v1314_v3 = vmax.f32 %v1101_v8, %v1262_v21 }
 0x209   : > { %v1267_v49 = vmul.f32 0.2, %v1107_v41  ;;  %v1269_v4 = vmul.f32 0.2, %v1208_v6  ;;  %v14989_v5 = vcombine.low %v11769_v18, %v11774_v19  ;;  %3203 = vmatmul.mubr.bf16.gmra.mrb[64].mxu0 %v11982_v15  ;;  %v1316_v57 = vmax.f32 %v1202_v9, %v1264_v12  ;;  %v1211_v1 = vpop.f32.mrb[44].mxu0 }
 0x20a   : > { %3259 = vmatprep.subr.bf16.mxu0 %v14988_v7  ;;  %v1318_v27 = vmax.f32 %v1105_v37, %v1266_v50  ;;  %v1320_v36 = vmax.f32 %v1206_v47, %v1268_v17  ;;  %v14990_v7 = vcombine.low %v11787_v24, %v11792_v25  ;;  %v14991_v8 = vcombine.high %v11805_v29, %v11810_v30  ;;  %v1213_v47 = vpop.f32.mrb[45].mxu0 }
 0x20b   : > { %3058 = vmatpush1.bf16.msra.mxu1 %v14989_v5  ;;  %v1315_v21 = vmax.f32 %v1103_v54, %v1263_v52  ;;  %v1317_v38 = vmax.f32 %v1204_v55, %v1265_v39  ;;  %v1319_v18 = vmax.f32 %v1107_v41, %v1267_v49  ;;  %v1321_v19 = vmax.f32 %v1208_v6, %v1269_v4  ;;  %v1110_v5 = vpop.f32.mrb[16].mxu1  ;;  %v12061_v54 = vld [vmem:[%s14910_s5 + $0x640] sm:$0xff]  ;;  %v1215_v17 = vpop.f32.mrb[46].mxu0 }
 0x20c   : > { %3260 = vmatpush1.bf16.msra.mxu0 %v14990_v7  ;;  %3059 = vmatprep.subr.bf16.mxu1 %v14991_v8  ;;  %v14992_v13 = vcombine.high %v11829_v43, %v11840_v61  ;;  %v12052_v9 = vpack.c.bf16 %v1318_v27, %v1314_v3  ;;  %v12054_v12 = vpack.c.bf16 %v1320_v36, %v1316_v57  ;;  %v1112_v37 = vpop.f32.mrb[17].mxu1  ;;  %v12085_v3 = vld [vmem:[%s14910_s5 + $0x668] sm:$0xff]  ;;  %v1217_v27 = vpop.f32.mrb[47].mxu0 }
 0x20d   : > { %v1111_v24 = vadd.f32 %v1110_v5, %v11731_v10  ;;  %v1212_v25 = vadd.f32 %v1211_v1, %v11734_v11  ;;  %v12063_v55 = vpack.c.bf16 %v1319_v18, %v1315_v21  ;;  %v12065_v52 = vpack.c.bf16 %v1321_v19, %v1317_v38  ;;  %v1114_v50 = vpop.f32.mrb[18].mxu1  ;;  %v12075_v1 = vld [vmem:[%s14910_s5 + $0x660] sm:$0xff]  ;;  %v12080_v38 = vld [vmem:[%s14910_s5 + $0x648] sm:$0xff] }
 0x20e   : > { %3261 = vmatprep.subr.bf16.mxu0 %v14992_v13  ;;  %v1113_v39 = vadd.f32 %v1112_v37, %v11752_v14  ;;  %v1214_v41 = vadd.f32 %v1213_v47, %v11755_v51  ;;  %v14993_v6 = vcombine.low %v11805_v29, %v11810_v30  ;;  %v14994_v30 = vcombine.low %v11829_v43, %v11840_v61  ;;  %v1116_v57 = vpop.f32.mrb[19].mxu1 }
 0x20f   : > { %v1270_v49 = vmul.f32 0.2, %v1111_v24  ;;  %v1272_v29 = vmul.f32 0.2, %v1212_v25  ;;  %v1115_v4 = vadd.f32 %v1114_v50, %v11731_v10  ;;  %v1216_v13 = vadd.f32 %v1215_v17, %v11734_v11  ;;  %3010 = vmatprep.mubr.bf16.mxu1 %v12063_v55  ;;  %3212 = vmatprep.mubr.bf16.mxu0 %v12063_v55 }
 0x210   : > { %3060 = vmatpush1.bf16.msra.mxu1 %v14993_v6  ;;  %3262 = vmatpush1.bf16.msra.mxu0 %v14994_v30  ;;  %v14995_v36 = vcombine.high %v11845_v63, %v11850_v31  ;;  %v1271_v7 = vmul.f32 0.2, %v1113_v39  ;;  %v1273_v8 = vmul.f32 0.2, %v1214_v41  ;;  %v1117_v21 = vadd.f32 %v1116_v57, %v11752_v14 }
 0x211   : > { %v1218_v18 = vadd.f32 %v1217_v27, %v11755_v51  ;;  %v1274_v43 = vmul.f32 0.2, %v1115_v4  ;;  %v1276_v61 = vmul.f32 0.2, %v1216_v13  ;;  %v14996_v19 = vcombine.high %v11873_v2, %v11884_v59  ;;  %3011 = vmatmul.mubr.bf16.gmra.mrb[40].mxu1 %v12052_v9  ;;  %3213 = vmatmul.mubr.bf16.gmra.mrb[68].mxu0 %v12052_v9  ;;  %v1221_v42 = vpop.f32.mrb[48].mxu0 }
 0x212   : > { %3061 = vmatprep.subr.bf16.mxu1 %v14995_v36  ;;  %v8886_v5 = vcombine.high %v12010_v58, %v12015_v16  ;;  %v1322_v47 = vmax.f32 %v1111_v24, %v1270_v49  ;;  %v1275_v6 = vmul.f32 0.2, %v1117_v21  ;;  %v14997_v17 = vcombine.low %v11845_v63, %v11850_v31 }
 0x213   : > { %3263 = vmatprep.subr.bf16.mxu0 %v14996_v19  ;;  %v1277_v50 = vmul.f32 0.2, %v1218_v18  ;;  %v1324_v57 = vmax.f32 %v1212_v25, %v1272_v29  ;;  %v1326_v27 = vmax.f32 %v1115_v4, %v1274_v43  ;;  %v1328_v36 = vmax.f32 %v1216_v13, %v1276_v61  ;;  %v1223_v13 = vpop.f32.mrb[49].mxu0  ;;  %v12145_v61 = vld [vmem:[%s14910_s5 + $0x6a0] sm:$0xff] }
 0x214   : > { %3062 = vmatpush1.bf16.msra.mxu1 %v14997_v17  ;;  %v14998_v19 = vcombine.low %v11873_v2, %v11884_v59  ;;  %v14999_v24 = vcombine.high %v11889_v28, %v11894_v60  ;;  %v1323_v49 = vmax.f32 %v1113_v39, %v1271_v7  ;;  %v1325_v37 = vmax.f32 %v1214_v41, %v1273_v8  ;;  %v1120_v17 = vpop.f32.mrb[20].mxu1  ;;  %v1225_v43 = vpop.f32.mrb[50].mxu0 }
 0x215   : > { %v1327_v63 = vmax.f32 %v1117_v21, %v1275_v6  ;;  %v1329_v31 = vmax.f32 %v1218_v18, %v1277_v50  ;;  %v15000_v30 = vcombine.high %v11940_v44, %v11945_v32  ;;  %v12122_v25 = vpack.c.bf16 %v1326_v27, %v1322_v47  ;;  %v1122_v4 = vpop.f32.mrb[21].mxu1 }
 0x216   : > { %3264 = vmatpush1.bf16.msra.mxu0 %v14998_v19  ;;  %3063 = vmatprep.subr.bf16.mxu1 %v14999_v24  ;;  %v12124_v29 = vpack.c.bf16 %v1328_v36, %v1324_v57  ;;  %v1121_v2 = vadd.f32 %v1120_v17, %v11731_v10  ;;  %v1222_v59 = vadd.f32 %v1221_v42, %v11734_v11  ;;  %v1124_v18 = vpop.f32.mrb[22].mxu1  ;;  %v12140_v42 = vld [vmem:[%s14910_s5 + $0x680] sm:$0xff] }
 0x217   : > { %3265 = vmatprep.subr.bf16.mxu0 %v15000_v30  ;;  %v12128_v39 = vpack.c.bf16 %v1327_v63, %v1323_v49  ;;  %v12130_v41 = vpack.c.bf16 %v1329_v31, %v1325_v37  ;;  %v1123_v7 = vadd.f32 %v1122_v4, %v11752_v14  ;;  %v1224_v8 = vadd.f32 %v1223_v13, %v11755_v51  ;;  %v1126_v50 = vpop.f32.mrb[23].mxu1  ;;  %v1227_v30 = vpop.f32.mrb[51].mxu0 }
 0x218   : > { %v15001_v21 = vcombine.low %v11889_v28, %v11894_v60  ;;  %v1278_v37 = vmul.f32 0.2, %v1121_v2  ;;  %v1280_v47 = vmul.f32 0.2, %v1222_v59  ;;  %v15002_v6 = vcombine.low %v11940_v44, %v11945_v32 }
 0x219   : > { %v1125_v28 = vadd.f32 %v1124_v18, %v11731_v10  ;;  %v1226_v60 = vadd.f32 %v1225_v43, %v11734_v11  ;;  %v15003_v57 = vcombine.high %v11991_v20, %v12005_v56  ;;  %v1279_v27 = vmul.f32 0.2, %v1123_v7  ;;  %3020 = vmatprep.mubr.bf16.mxu1 %v12128_v39  ;;  %3222 = vmatprep.mubr.bf16.mxu0 %v12128_v39  ;;  %v1583_v18 = vld [vmem:[%s14910_s5 + $0x6a8] sm:$0xff]  ;;  %v1130_v62 = vpop.f32.mrb[24].mxu1 }
 0x21a   : > { %3064 = vmatpush1.bf16.msra.mxu1 %v15001_v21  ;;  %3266 = vmatpush1.bf16.msra.mxu0 %v15002_v6  ;;  %v1281_v36 = vmul.f32 0.2, %v1224_v8  ;;  %v1127_v19 = vadd.f32 %v1126_v50, %v11752_v14  ;;  %v1228_v24 = vadd.f32 %v1227_v30, %v11755_v51  ;;  %v8891_v49 = vcombine.low %v12061_v54, %v12075_v1  ;;  %v1579_v21 = vld [vmem:[%s14910_s5 + $0x688] sm:$0xff] }
 0x21b   : > { %3065 = vmatprep.subr.bf16.mxu1 %v15003_v57  ;;  %v1282_v44 = vmul.f32 0.2, %v1125_v28  ;;  %v1284_v32 = vmul.f32 0.2, %v1226_v60  ;;  %3267 = vmatprep.subr.bf16.mxu0 %v8886_v5  ;;  %v8893_v63 = vcombine.low %v12080_v38, %v12085_v3  ;;  %v1330_v31 = vmax.f32 %v1121_v2, %v1278_v37 }
 0x21c   : > { %3021 = vmatmul.mubr.bf16.gmra.mrb[44].mxu1 %v12122_v25  ;;  %v1283_v17 = vmul.f32 0.2, %v1127_v19  ;;  %v1285_v4 = vmul.f32 0.2, %v1228_v24  ;;  %v15004_v13 = vcombine.low %v11991_v20, %v12005_v56  ;;  %3223 = vmatmul.mubr.bf16.gmra.mrb[72].mxu0 %v12122_v25  ;;  %v8900_v5 = vcombine.high %v12140_v42, %v12145_v61 }
 0x21d   : > { %v1332_v2 = vmax.f32 %v1222_v59, %v1280_v47  ;;  %v1334_v43 = vmax.f32 %v1125_v28, %v1282_v44  ;;  %v1336_v37 = vmax.f32 %v1226_v60, %v1284_v32  ;;  %v15005_v20 = vcombine.low %v12010_v58, %v12015_v16  ;;  %v12185_v59 = vpop.f32.mrb[52].mxu0  ;;  %v1586_v58 = vld [vmem:[%s14910_s5 + $0x6c0] sm:$0xff]  ;;  %v1587_v47 = vld [vmem:[%s14910_s5 + $0x6c8] sm:$0xff] }
 0x21e   : > { %3066 = vmatpush1.bf16.msra.mxu1 %v15004_v13  ;;  %v15006_v56 = vcombine.high %v12061_v54, %v12075_v1  ;;  %v1331_v6 = vmax.f32 %v1123_v7, %v1279_v27  ;;  %v1333_v50 = vmax.f32 %v1224_v8, %v1281_v36  ;;  %v1335_v30 = vmax.f32 %v1127_v19, %v1283_v17  ;;  %v1590_v16 = vld [vmem:[%s14910_s5 + $0x6e0] sm:$0xff]  ;;  %v1132_v8 = vpop.f32.mrb[25].mxu1  ;;  %v1591_v28 = vld [vmem:[%s14910_s5 + $0x6e8] sm:$0xff] }
 0x21f   : > { %3268 = vmatpush1.bf16.msra.mxu0 %v15005_v20  ;;  %v1337_v57 = vmax.f32 %v1228_v24, %v1285_v4  ;;  %v15007_v13 = vcombine.high %v12080_v38, %v12085_v3  ;;  %v12193_v54 = vpack.c.bf16 %v1334_v43, %v1330_v31  ;;  %v12195_v1 = vpack.c.bf16 %v1336_v37, %v1332_v2  ;;  %v12198_v38 = vpop.f32.mrb[53].mxu0 }
 0x220   : > { %3067 = vmatprep.subr.bf16.mxu1 %v15006_v56  ;;  %v1131_v7 = vadd.f32 %v1130_v62, %v11731_v10  ;;  %v8902_v3 = vcombine.high %v1579_v21, %v1583_v18  ;;  %v12206_v60 = vpack.c.bf16 %v1335_v30, %v1331_v6  ;;  %v1133_v36 = vadd.f32 %v1132_v8, %v11752_v14  ;;  %v1134_v62 = vpop.f32.mrb[26].mxu1  ;;  %v1235_v10 = vpop.f32.mrb[54].mxu0  ;;  %v1594_v14 = vld [vmem:[%s14910_s5 + $0x700] sm:$0xff] }
 0x221   : > { %3269 = vmatprep.subr.bf16.mxu0 %v15007_v13  ;;  %v12208_v27 = vpack.c.bf16 %v1337_v57, %v1333_v50  ;;  %v8899_v19 = vcombine.low %v12140_v42, %v12145_v61  ;;  %v8901_v44 = vcombine.low %v1579_v21, %v1583_v18  ;;  %v1135_v32 = vpop.f32.mrb[27].mxu1  ;;  %v1236_v31 = vpop.f32.mrb[55].mxu0  ;;  %v8908_v17 = vcombine.high %v1586_v58, %v1590_v16  ;;  %v1598_v42 = vld [vmem:[%s14910_s5 + $0x720] sm:$0xff]  ;;  %v1603_v57 = vld [vmem:[%s14910_s5 + $0x748] sm:$0xff] }
 0x222   : > { %3068 = vmatpush1.bf16.msra.mxu1 %v8891_v49  ;;  %v1286_v24 = vmul.f32 0.2, %v1131_v7  ;;  %v1287_v4 = vmul.f32 0.2, %v1133_v36  ;;  %3030 = vmatprep.mubr.bf16.mxu1 %v12206_v60  ;;  %v8910_v49 = vcombine.high %v1587_v47, %v1591_v28  ;;  %v8907_v18 = vcombine.low %v1586_v58, %v1590_v16  ;;  %v1602_v6 = vld [vmem:[%s14910_s5 + $0x740] sm:$0xff]  ;;  %v1607_v13 = vld [vmem:[%s14910_s5 + $0x768] sm:$0xff] }
 0x223   : > { %3270 = vmatpush1.bf16.msra.mxu0 %v8893_v63  ;;  %3069 = vmatprep.subr.bf16.mxu1 %v8900_v5  ;;  %v1595_v63 = vld [vmem:[%s14910_s5 + $0x708] sm:$0xff]  ;;  %v8909_v2 = vcombine.low %v1587_v47, %v1591_v28  ;;  %v8916_v43 = vcombine.high %v1594_v14, %v1598_v42  ;;  %v1606_v50 = vld [vmem:[%s14910_s5 + $0x760] sm:$0xff]  ;;  %v8915_v30 = vcombine.low %v1594_v14, %v1598_v42  ;;  %v1372_v42 = vld [vmem:[%s14910_s5 + $0x10] sm:$0xff] }
 0x224   : > { %3232 = vmatprep.mubr.bf16.mxu0 %v12206_v60  ;;  %v1338_v61 = vmax.f32 %v1131_v7, %v1286_v24  ;;  %3271 = vmatprep.subr.bf16.mxu0 %v8902_v3  ;;  %v1599_v5 = vld [vmem:[%s14910_s5 + $0x728] sm:$0xff]  ;;  %v1339_v21 = vmax.f32 %v1133_v36, %v1287_v4  ;;  %v8924_v16 = vcombine.high %v1602_v6, %v1606_v50  ;;  %v1610_v7 = vld [vmem:[%s14910_s5 + $0x780] sm:$0xff] }
 0x225   : > { %3031 = vmatmul.mubr.bf16.gmra.mrb[48].mxu1 %v12193_v54  ;;  %3233 = vmatmul.mubr.bf16.gmra.mrb[76].mxu0 %v12193_v54  ;;  %v8918_v20 = vcombine.high %v1595_v63, %v1599_v5  ;;  %v8917_v58 = vcombine.low %v1595_v63, %v1599_v5  ;;  %v1614_v8 = vld [vmem:[%s14910_s5 + $0x7a0] sm:$0xff]  ;;  %v8926_v3 = vcombine.high %v1603_v57, %v1607_v13  ;;  %v1611_v47 = vld [vmem:[%s14910_s5 + $0x788] sm:$0xff]  ;;  %v1373_v63 = vld [vmem:[%s14910_s5 + $0x18] sm:$0xff] }
 0x226   : > { %3070 = vmatpush1.bf16.msra.mxu1 %v8899_v19  ;;  %v12229_v37 = vpack.c.bf16 %v1339_v21, %v1339_v21  ;;  %v12231_v56 = vpack.c.bf16 %v1338_v61, %v1338_v61  ;;  %v1615_v28 = vld [vmem:[%s14910_s5 + $0x7a8] sm:$0xff]  ;;  %v8923_v36 = vcombine.low %v1602_v6, %v1606_v50  ;;  %v8925_v62 = vcombine.low %v1603_v57, %v1607_v13  ;;  %v1618_v24 = vld [vmem:[%s14910_s5 + $0x7c0] sm:$0xff]  ;;  %v1376_v61 = vld [vmem:[%s14910_s5 + $0x30] sm:$0xff] }
 0x227   : > { %3272 = vmatpush1.bf16.msra.mxu0 %v8901_v44  ;;  %3071 = vmatprep.subr.bf16.mxu1 %v8908_v17  ;;  %v8932_v10 = vcombine.high %v1610_v7, %v1614_v8  ;;  %v8934_v19 = vcombine.high %v1611_v47, %v1615_v28  ;;  %v1622_v44 = vld [vmem:[%s14910_s5 + $0x7e0] sm:$0xff]  ;;  %v1619_v32 = vld [vmem:[%s14910_s5 + $0x7c8] sm:$0xff]  ;;  %v8931_v17 = vcombine.low %v1610_v7, %v1614_v8  ;;  %v1377_v5 = vld [vmem:[%s14910_s5 + $0x38] sm:$0xff] }
 0x228   : > { %3273 = vmatprep.subr.bf16.mxu0 %v8910_v49  ;;  %3040 = vmatprep.mubr.bf16.mxu1 %v12229_v37  ;;  %v1623_v31 = vld [vmem:[%s14910_s5 + $0x7e8] sm:$0xff]  ;;  %v8933_v4 = vcombine.low %v1611_v47, %v1615_v28  ;;  %v8940_v49 = vcombine.high %v1618_v24, %v1622_v44  ;;  %v8939_v21 = vcombine.low %v1618_v24, %v1622_v44  ;;  %v1384_v6 = vld [vmem:[%s14910_s5 + $0x70] sm:$0xff]  ;;  %v1381_v50 = vld [vmem:[%s14910_s5 + $0x58] sm:$0xff] }
 0x229   : > { %3242 = vmatprep.mubr.bf16.mxu0 %v12229_v37  ;;  %v8942_v14 = vcombine.high %v1619_v32, %v1623_v31  ;;  %v8695_v57 = vcombine.low %v1372_v42, %v1376_v61  ;;  %v8697_v13 = vcombine.low %v1373_v63, %v1377_v5  ;;  %v1388_v7 = vld [vmem:[%s14910_s5 + $0x90] sm:$0xff]  ;;  %v1393_v47 = vld [vmem:[%s14910_s5 + $0xb8] sm:$0xff] }
 0x22a   : > { %3072 = vmatpush1.bf16.msra.mxu1 %v8907_v18  ;;  %v8941_v18 = vcombine.low %v1619_v32, %v1623_v31  ;;  %v1392_v8 = vld [vmem:[%s14910_s5 + $0xb0] sm:$0xff]  ;;  %v1397_v44 = vld [vmem:[%s14910_s5 + $0xd8] sm:$0xff] }
 0x22b   : > { %3274 = vmatpush1.bf16.msra.mxu0 %v8909_v2  ;;  %3073 = vmatprep.subr.bf16.mxu1 %v8916_v43  ;;  %v8696_v2 = vcombine.high %v1372_v42, %v1376_v61  ;;  %v8698_v43 = vcombine.high %v1373_v63, %v1377_v5  ;;  %v1400_v24 = vld [vmem:[%s14910_s5 + $0xf0] sm:$0xff]  ;;  %v1401_v32 = vld [vmem:[%s14910_s5 + $0xf8] sm:$0xff]  ;;  %v8711_v31 = vcombine.low %v1388_v7, %v1392_v8 }
 0x22c   : > { %3275 = vmatprep.subr.bf16.mxu0 %v8918_v20  ;;  %v1380_v20 = vld [vmem:[%s14910_s5 + $0x50] sm:$0xff]  ;;  %v1405_v61 = vld [vmem:[%s14910_s5 + $0x118] sm:$0xff] }
 0x22d   : > { %3041 = vmatmul.mubr.bf16.gmra.mrb[52].mxu1 %v12231_v56  ;;  %3243 = vmatmul.mubr.bf16.gmra.mrb[80].mxu0 %v12231_v56  ;;  %v8703_v28 = vcombine.low %v1380_v20, %v1384_v6  ;;  %v1408_v42 = vld [vmem:[%s14910_s5 + $0x130] sm:$0xff]  ;;  %v1409_v63 = vld [vmem:[%s14910_s5 + $0x138] sm:$0xff] }
 0x22e   : > { %3074 = vmatpush1.bf16.msra.mxu1 %v8915_v30  ;;  %3081 = vmatprep.mubr.bf16.mxu1 %v11877_v22  ;;  %v1385_v30 = vld [vmem:[%s14910_s5 + $0x78] sm:$0xff] }
 0x22f   : > { %3276 = vmatpush1.bf16.msra.mxu0 %v8917_v58  ;;  %3283 = vmatprep.mubr.bf16.mxu0 %v11877_v22  ;;  %v8704_v58 = vcombine.high %v1380_v20, %v1384_v6  ;;  %v1416_v20 = vld [vmem:[%s14910_s5 + $0x170] sm:$0xff]  ;;  %v1413_v6 = vld [vmem:[%s14910_s5 + $0x158] sm:$0xff] }
 0x230   : > { %3075 = vmatprep.subr.bf16.mxu1 %v8924_v16  ;;  %3277 = vmatprep.subr.bf16.mxu0 %v8926_v3  ;;  %v8706_v16 = vcombine.high %v1381_v50, %v1385_v30  ;;  %v1389_v3 = vld [vmem:[%s14910_s5 + $0x98] sm:$0xff] }
 0x232   : > { %3076 = vmatpush1.bf16.msra.mxu1 %v8923_v36  ;;  %v8705_v36 = vcombine.low %v1381_v50, %v1385_v30  ;;  %v1417_v50 = vld [vmem:[%s14910_s5 + $0x178] sm:$0xff] }
 0x233   : > { %3278 = vmatpush1.bf16.msra.mxu0 %v8925_v62  ;;  %3077 = vmatprep.subr.bf16.mxu1 %v8932_v10  ;;  %v8712_v62 = vcombine.high %v1388_v7, %v1392_v8  ;;  %v8714_v10 = vcombine.high %v1389_v3, %v1393_v47  ;;  %v1424_v7 = vld [vmem:[%s14910_s5 + $0x1b0] sm:$0xff]  ;;  %v1421_v8 = vld [vmem:[%s14910_s5 + $0x198] sm:$0xff] }
 0x234   : > { %3279 = vmatprep.subr.bf16.mxu0 %v8934_v19  ;;  %v1396_v19 = vld [vmem:[%s14910_s5 + $0xd0] sm:$0xff] }
 0x235   : > { %v8719_v5 = vcombine.low %v1396_v19, %v1400_v24 }
 0x236   : > { %3078 = vmatpush1.bf16.msra.mxu1 %v8931_v17  ;;  %v8713_v17 = vcombine.low %v1389_v3, %v1393_v47  ;;  %v1425_v3 = vld [vmem:[%s14910_s5 + $0x1b8] sm:$0xff] }
 0x237   : > { %3280 = vmatpush1.bf16.msra.mxu0 %v8933_v4  ;;  %3079 = vmatprep.subr.bf16.mxu1 %v8940_v49  ;;  %v8720_v4 = vcombine.high %v1396_v19, %v1400_v24  ;;  %v8722_v49 = vcombine.high %v1397_v44, %v1401_v32  ;;  %v1432_v19 = vld [vmem:[%s14910_s5 + $0x1f0] sm:$0xff]  ;;  %v1429_v24 = vld [vmem:[%s14910_s5 + $0x1d8] sm:$0xff] }
 0x238   : > { %3281 = vmatprep.subr.bf16.mxu0 %v8942_v14  ;;  %v1404_v14 = vld [vmem:[%s14910_s5 + $0x110] sm:$0xff] }
 0x239   : > { %v8727_v30 = vcombine.low %v1404_v14, %v1408_v42 }
 0x23a   : > { %3080 = vmatpush1.bf16.msra.mxu1 %v8939_v21  ;;  %v8721_v21 = vcombine.low %v1397_v44, %v1401_v32  ;;  %v1433_v44 = vld [vmem:[%s14910_s5 + $0x1f8] sm:$0xff] }
 0x23b   : > { %3282 = vmatpush1.bf16.msra.mxu0 %v8941_v18  ;;  %3352 = vmatprep.subr.bf16.mxu1 %v8696_v2  ;;  %v8728_v18 = vcombine.high %v1404_v14, %v1408_v42  ;;  %v8730_v2 = vcombine.high %v1405_v61, %v1409_v63  ;;  %v1440_v14 = vld [vmem:[%s14910_s5 + $0x230] sm:$0xff]  ;;  %v1437_v42 = vld [vmem:[%s14910_s5 + $0x218] sm:$0xff] }
 0x23c   : > { %3554 = vmatprep.subr.bf16.mxu0 %v8698_v43  ;;  %v1412_v43 = vld [vmem:[%s14910_s5 + $0x150] sm:$0xff] }
 0x23d   : > { %3082 = vmatmul.mubr.bf16.vlgmr.msra.gmra.mrb[28].mxu1 %v11866_v26  ;;  %v8735_v47 = vcombine.low %v1412_v43, %v1416_v20 }
 0x23e   : > { %3284 = vmatmul.mubr.bf16.vlgmr.msra.gmra.mrb[56].mxu0 %v11866_v26  ;;  %3091 = vmatprep.mubr.bf16.mxu1 %v11930_v53 }
 0x23f   : > { %3293 = vmatprep.mubr.bf16.mxu0 %v11930_v53  ;;  %3353 = vmatpush1.bf16.msra.mxu1 %v8695_v57  ;;  %v8729_v57 = vcombine.low %v1405_v61, %v1409_v63  ;;  %v1441_v61 = vld [vmem:[%s14910_s5 + $0x238] sm:$0xff] }
 0x240   : > { %3555 = vmatpush1.bf16.msra.mxu0 %v8697_v13  ;;  %3354 = vmatprep.subr.bf16.mxu1 %v8704_v58  ;;  %v8736_v13 = vcombine.high %v1412_v43, %v1416_v20  ;;  %v8738_v58 = vcombine.high %v1413_v6, %v1417_v50  ;;  %v1444_v43 = vld [vmem:[%s14910_s5 + $0x250] sm:$0xff] }
 0x241   : > { %3556 = vmatprep.subr.bf16.mxu0 %v8706_v16  ;;  %v1420_v16 = vld [vmem:[%s14910_s5 + $0x190] sm:$0xff] }
 0x242   : > { %v8743_v32 = vcombine.low %v1420_v16, %v1424_v7  ;;  %v1448_v20 = vld [vmem:[%s14910_s5 + $0x270] sm:$0xff] }
 0x243   : > { %3355 = vmatpush1.bf16.msra.mxu1 %v8703_v28  ;;  %v8737_v28 = vcombine.low %v1413_v6, %v1417_v50  ;;  %v1445_v6 = vld [vmem:[%s14910_s5 + $0x258] sm:$0xff] }
 0x244   : > { %3557 = vmatpush1.bf16.msra.mxu0 %v8705_v36  ;;  %3356 = vmatprep.subr.bf16.mxu1 %v8712_v62  ;;  %v8744_v36 = vcombine.high %v1420_v16, %v1424_v7  ;;  %v8746_v62 = vcombine.high %v1421_v8, %v1425_v3  ;;  %v1456_v16 = vld [vmem:[%s14910_s5 + $0x2b0] sm:$0xff]  ;;  %v1453_v7 = vld [vmem:[%s14910_s5 + $0x298] sm:$0xff] }
 0x245   : > { %3092 = vmatmul.mubr.bf16.gmra.mrb[32].mxu1 %v11924_v35  ;;  %3558 = vmatprep.subr.bf16.mxu0 %v8714_v10  ;;  %v1428_v10 = vld [vmem:[%s14910_s5 + $0x1d0] sm:$0xff] }
 0x246   : > { %3294 = vmatmul.mubr.bf16.gmra.mrb[60].mxu0 %v11924_v35  ;;  %3101 = vmatprep.mubr.bf16.mxu1 %v11995_v0  ;;  %v8751_v63 = vcombine.low %v1428_v10, %v1432_v19 }
 0x247   : > { %3303 = vmatprep.mubr.bf16.mxu0 %v11995_v0  ;;  %3357 = vmatpush1.bf16.msra.mxu1 %v8711_v31  ;;  %v8745_v31 = vcombine.low %v1421_v8, %v1425_v3  ;;  %v1457_v8 = vld [vmem:[%s14910_s5 + $0x2b8] sm:$0xff]  ;;  %v1232_v3 = vadd.f32 %v12185_v59, %v11734_v11 }
 0x248   : > { %3559 = vmatpush1.bf16.msra.mxu0 %v8713_v17  ;;  %3358 = vmatprep.subr.bf16.mxu1 %v8720_v4  ;;  %v8752_v17 = vcombine.high %v1428_v10, %v1432_v19  ;;  %v8754_v4 = vcombine.high %v1429_v24, %v1433_v44  ;;  %v8778_v10 = vcombine.high %v1453_v7, %v1457_v8  ;;  %v1460_v19 = vld [vmem:[%s14910_s5 + $0x2d0] sm:$0xff]  ;;  %v1461_v11 = vld [vmem:[%s14910_s5 + $0x2d8] sm:$0xff] }
 0x249   : > { %3560 = vmatprep.subr.bf16.mxu0 %v8722_v49  ;;  %v1436_v49 = vld [vmem:[%s14910_s5 + $0x210] sm:$0xff]  ;;  %v1465_v59 = vld [vmem:[%s14910_s5 + $0x2f8] sm:$0xff] }
 0x24b   : > { %3359 = vmatpush1.bf16.msra.mxu1 %v8719_v5  ;;  %v1234_v5 = vadd.f32 %v12198_v38, %v11755_v51  ;;  %v1449_v51 = vld [vmem:[%s14910_s5 + $0x278] sm:$0xff]  ;;  %v8759_v38 = vcombine.low %v1436_v49, %v1440_v14 }
 0x24c   : > { %3561 = vmatpush1.bf16.msra.mxu0 %v8721_v21  ;;  %3360 = vmatprep.subr.bf16.mxu1 %v8728_v18  ;;  %v8753_v21 = vcombine.low %v1429_v24, %v1433_v44  ;;  %v8760_v18 = vcombine.high %v1436_v49, %v1440_v14  ;;  %v1464_v24 = vld [vmem:[%s14910_s5 + $0x2f0] sm:$0xff]  ;;  %v1288_v44 = vmul.f32 0.2, %v1232_v3  ;;  %v8786_v49 = vcombine.high %v1461_v11, %v1465_v59 }
 0x24d   : > { %3102 = vmatmul.mubr.bf16.gmra.mrb[36].mxu1 %v11984_v40  ;;  %3562 = vmatprep.subr.bf16.mxu0 %v8730_v2  ;;  %v8762_v2 = vcombine.high %v1437_v42, %v1441_v61  ;;  %v1289_v50 = vmul.f32 0.2, %v1234_v5  ;;  %v1468_v14 = vld [vmem:[%s14910_s5 + $0x310] sm:$0xff] }
 0x24e   : > { %3304 = vmatmul.mubr.bf16.gmra.mrb[64].mxu0 %v11984_v40  ;;  %3111 = vmatprep.mubr.bf16.mxu1 %v12065_v52 }
 0x24f   : > { %3313 = vmatprep.mubr.bf16.mxu0 %v12065_v52  ;;  %3361 = vmatpush1.bf16.msra.mxu1 %v8727_v30  ;;  %v8761_v30 = vcombine.low %v1437_v42, %v1441_v61  ;;  %v1472_v42 = vld [vmem:[%s14910_s5 + $0x330] sm:$0xff]  ;;  %v1469_v61 = vld [vmem:[%s14910_s5 + $0x318] sm:$0xff] }
 0x250   : > { %3563 = vmatpush1.bf16.msra.mxu0 %v8729_v57  ;;  %3362 = vmatprep.subr.bf16.mxu1 %v8736_v13  ;;  %v8768_v57 = vcombine.high %v1444_v43, %v1448_v20  ;;  %v8770_v13 = vcombine.high %v1445_v6, %v1449_v51 }
 0x251   : > { %3564 = vmatprep.subr.bf16.mxu0 %v8738_v58  ;;  %v1452_v58 = vld [vmem:[%s14910_s5 + $0x290] sm:$0xff] }
 0x253   : > { %3363 = vmatpush1.bf16.msra.mxu1 %v8735_v47  ;;  %v8767_v47 = vcombine.low %v1444_v43, %v1448_v20  ;;  %v1476_v20 = vld [vmem:[%s14910_s5 + $0x350] sm:$0xff] }
 0x254   : > { %3565 = vmatpush1.bf16.msra.mxu0 %v8737_v28  ;;  %3364 = vmatprep.subr.bf16.mxu1 %v8744_v36  ;;  %v1341_v28 = vmax.f32 %v1234_v5, %v1289_v50  ;;  %v8769_v36 = vcombine.low %v1445_v6, %v1449_v51  ;;  %v1340_v5 = vmax.f32 %v1232_v3, %v1288_v44  ;;  %v1480_v6 = vld [vmem:[%s14910_s5 + $0x370] sm:$0xff]  ;;  %v1477_v51 = vld [vmem:[%s14910_s5 + $0x358] sm:$0xff] }
 0x255   : > { %3112 = vmatmul.mubr.bf16.gmra.mrb[40].mxu1 %v12054_v12  ;;  %3566 = vmatprep.subr.bf16.mxu0 %v8746_v62  ;;  %v8776_v62 = vcombine.high %v1452_v58, %v1456_v16  ;;  %v1489_v3 = vld [vmem:[%s14910_s5 + $0x3b8] sm:$0xff] }
 0x256   : > { %3314 = vmatmul.mubr.bf16.gmra.mrb[68].mxu0 %v12054_v12  ;;  %3121 = vmatprep.mubr.bf16.mxu1 %v12130_v41  ;;  %v12473_v50 = vpack.c.bf16 %v1340_v5, %v1340_v5 }
 0x257   : > { %3323 = vmatprep.mubr.bf16.mxu0 %v12130_v41  ;;  %3365 = vmatpush1.bf16.msra.mxu1 %v8743_v32  ;;  %v8775_v32 = vcombine.low %v1452_v58, %v1456_v16  ;;  %v1484_v16 = vld [vmem:[%s14910_s5 + $0x390] sm:$0xff] }
 0x258   : > { %3567 = vmatpush1.bf16.msra.mxu0 %v8745_v31  ;;  %3366 = vmatprep.subr.bf16.mxu1 %v8752_v17  ;;  %v12443_v31 = vpack.c.bf16 %v1341_v28, %v1341_v28  ;;  %v8777_v17 = vcombine.low %v1453_v7, %v1457_v8  ;;  %v1488_v7 = vld [vmem:[%s14910_s5 + $0x3b0] sm:$0xff]  ;;  %v1485_v8 = vld [vmem:[%s14910_s5 + $0x398] sm:$0xff] }
 0x259   : > { %3568 = vmatprep.subr.bf16.mxu0 %v8754_v4  ;;  %v8784_v4 = vcombine.high %v1460_v19, %v1464_v24 }
 0x25b   : > { %3367 = vmatpush1.bf16.msra.mxu1 %v8751_v63  ;;  %v1473_v63 = vld [vmem:[%s14910_s5 + $0x338] sm:$0xff] }
 0x25c   : > { %3569 = vmatpush1.bf16.msra.mxu0 %v8753_v21  ;;  %3368 = vmatprep.subr.bf16.mxu1 %v8760_v18  ;;  %v8783_v21 = vcombine.low %v1460_v19, %v1464_v24  ;;  %v8785_v18 = vcombine.low %v1461_v11, %v1465_v59  ;;  %v8794_v43 = vcombine.high %v1469_v61, %v1473_v63  ;;  %v1496_v19 = vld [vmem:[%s14910_s5 + $0x3f0] sm:$0xff]  ;;  %v1493_v24 = vld [vmem:[%s14910_s5 + $0x3d8] sm:$0xff] }
 0x25d   : > { %3122 = vmatmul.mubr.bf16.gmra.mrb[44].mxu1 %v12124_v29  ;;  %3570 = vmatprep.subr.bf16.mxu0 %v8762_v2  ;;  %v8792_v2 = vcombine.high %v1468_v14, %v1472_v42  ;;  %v8807_v11 = vcombine.low %v1484_v16, %v1488_v7  ;;  %v8809_v59 = vcombine.low %v1485_v8, %v1489_v3 }
 0x25e   : > { %3324 = vmatmul.mubr.bf16.gmra.mrb[72].mxu0 %v12124_v29  ;;  %3131 = vmatprep.mubr.bf16.mxu1 %v12208_v27 }
 0x25f   : > { %3333 = vmatprep.mubr.bf16.mxu0 %v12208_v27  ;;  %3369 = vmatpush1.bf16.msra.mxu1 %v8759_v38  ;;  %v1481_v38 = vld [vmem:[%s14910_s5 + $0x378] sm:$0xff] }
 0x260   : > { %3571 = vmatpush1.bf16.msra.mxu0 %v8761_v30  ;;  %3370 = vmatprep.subr.bf16.mxu1 %v8768_v57  ;;  %v8791_v30 = vcombine.low %v1468_v14, %v1472_v42  ;;  %v8793_v57 = vcombine.low %v1469_v61, %v1473_v63  ;;  %v8802_v58 = vcombine.high %v1477_v51, %v1481_v38  ;;  %v1505_v14 = vld [vmem:[%s14910_s5 + $0x438] sm:$0xff] }
 0x261   : > { %3572 = vmatprep.subr.bf16.mxu0 %v8770_v13  ;;  %v8800_v13 = vcombine.high %v1476_v20, %v1480_v6  ;;  %v8801_v28 = vcombine.low %v1477_v51, %v1481_v38 }
 0x263   : > { %3371 = vmatpush1.bf16.msra.mxu1 %v8767_v47  ;;  %v8799_v47 = vcombine.low %v1476_v20, %v1480_v6 }
 0x264   : > { %3573 = vmatpush1.bf16.msra.mxu0 %v8769_v36  ;;  %3372 = vmatprep.subr.bf16.mxu1 %v8776_v62  ;;  %v8808_v36 = vcombine.high %v1484_v16, %v1488_v7  ;;  %v8810_v62 = vcombine.high %v1485_v8, %v1489_v3  ;;  %v1524_v3 = vld [vmem:[%s14910_s5 + $0x4d0] sm:$0xff] }
 0x265   : > { %3132 = vmatmul.mubr.bf16.gmra.mrb[48].mxu1 %v12195_v1  ;;  %3574 = vmatprep.subr.bf16.mxu0 %v8778_v10  ;;  %v1492_v10 = vld [vmem:[%s14910_s5 + $0x3d0] sm:$0xff] }
 0x266   : > { %3334 = vmatmul.mubr.bf16.gmra.mrb[76].mxu0 %v12195_v1  ;;  %3141 = vmatprep.mubr.bf16.mxu1 %v12443_v31  ;;  %v8816_v44 = vcombine.high %v1492_v10, %v1496_v19  ;;  %v8815_v42 = vcombine.low %v1492_v10, %v1496_v19 }
 0x267   : > { %3343 = vmatprep.mubr.bf16.mxu0 %v12443_v31  ;;  %3373 = vmatpush1.bf16.msra.mxu1 %v8775_v32 }
 0x268   : > { %3575 = vmatpush1.bf16.msra.mxu0 %v8777_v17  ;;  %3374 = vmatprep.subr.bf16.mxu1 %v8784_v4  ;;  %v1500_v17 = vld [vmem:[%s14910_s5 + $0x410] sm:$0xff] }
 0x269   : > { %3576 = vmatprep.subr.bf16.mxu0 %v8786_v49  ;;  %v1504_v4 = vld [vmem:[%s14910_s5 + $0x430] sm:$0xff]  ;;  %v1501_v49 = vld [vmem:[%s14910_s5 + $0x418] sm:$0xff] }
 0x26a   : > { %v8824_v63 = vcombine.high %v1500_v17, %v1504_v4  ;;  %v8826_v5 = vcombine.high %v1501_v49, %v1505_v14  ;;  %v8823_v20 = vcombine.low %v1500_v17, %v1504_v4  ;;  %v8825_v6 = vcombine.low %v1501_v49, %v1505_v14  ;;  %v1540_v4 = vld [vmem:[%s14910_s5 + $0x550] sm:$0xff]  ;;  %v1541_v14 = vld [vmem:[%s14910_s5 + $0x558] sm:$0xff] }
 0x26b   : > { %3375 = vmatpush1.bf16.msra.mxu1 %v8783_v21  ;;  %v1508_v21 = vld [vmem:[%s14910_s5 + $0x450] sm:$0xff] }
 0x26c   : > { %3577 = vmatpush1.bf16.msra.mxu0 %v8785_v18  ;;  %3376 = vmatprep.subr.bf16.mxu1 %v8792_v2  ;;  %v1512_v18 = vld [vmem:[%s14910_s5 + $0x470] sm:$0xff]  ;;  %v1509_v2 = vld [vmem:[%s14910_s5 + $0x458] sm:$0xff] }
 0x26d   : > { %3142 = vmatmul.mubr.bf16.gmra.mrb[52].mxu1 %v12473_v50  ;;  %3578 = vmatprep.subr.bf16.mxu0 %v8794_v43  ;;  %v1513_v43 = vld [vmem:[%s14910_s5 + $0x478] sm:$0xff]  ;;  %v8832_v51 = vcombine.high %v1508_v21, %v1512_v18  ;;  %v8831_v16 = vcombine.low %v1508_v21, %v1512_v18  ;;  %v1544_v49 = vld [vmem:[%s14910_s5 + $0x570] sm:$0xff] }
 0x26e   : > { %3344 = vmatmul.mubr.bf16.gmra.mrb[80].mxu0 %v12473_v50  ;;  %3384 = vmatprep.mubr.bf16.mxu1 %v11875_v34  ;;  %v8834_v38 = vcombine.high %v1509_v2, %v1513_v43  ;;  %v8833_v7 = vcombine.low %v1509_v2, %v1513_v43  ;;  %v1548_v21 = vld [vmem:[%s14910_s5 + $0x590] sm:$0xff]  ;;  %v1549_v2 = vld [vmem:[%s14910_s5 + $0x598] sm:$0xff] }
 0x26f   : > { %3377 = vmatpush1.bf16.msra.mxu1 %v8791_v30  ;;  %3586 = vmatprep.mubr.bf16.mxu0 %v11875_v34  ;;  %v1497_v34 = vld [vmem:[%s14910_s5 + $0x3f8] sm:$0xff]  ;;  %v1516_v30 = vld [vmem:[%s14910_s5 + $0x490] sm:$0xff] }
 0x270   : > { %3579 = vmatpush1.bf16.msra.mxu0 %v8793_v57  ;;  %3378 = vmatprep.subr.bf16.mxu1 %v8800_v13  ;;  %v8818_v32 = vcombine.high %v1493_v24, %v1497_v34  ;;  %v8817_v61 = vcombine.low %v1493_v24, %v1497_v34  ;;  %v1520_v57 = vld [vmem:[%s14910_s5 + $0x4b0] sm:$0xff]  ;;  %v1517_v13 = vld [vmem:[%s14910_s5 + $0x498] sm:$0xff] }
 0x271   : > { %3580 = vmatprep.subr.bf16.mxu0 %v8802_v58  ;;  %v1521_v58 = vld [vmem:[%s14910_s5 + $0x4b8] sm:$0xff]  ;;  %v8840_v8 = vcombine.high %v1516_v30, %v1520_v57  ;;  %v1532_v24 = vld [vmem:[%s14910_s5 + $0x510] sm:$0xff] }
 0x272   : > { %v1536_v34 = vld [vmem:[%s14910_s5 + $0x530] sm:$0xff]  ;;  %v1553_v43 = vld [vmem:[%s14910_s5 + $0x5b8] sm:$0xff] }
 0x273   : > { %3379 = vmatpush1.bf16.msra.mxu1 %v8799_v47  ;;  %v1528_v47 = vld [vmem:[%s14910_s5 + $0x4f0] sm:$0xff]  ;;  %v8856_v17 = vcombine.high %v1532_v24, %v1536_v34 }
 0x274   : > { %3581 = vmatpush1.bf16.msra.mxu0 %v8801_v28  ;;  %3380 = vmatprep.subr.bf16.mxu1 %v8808_v36  ;;  %v1525_v28 = vld [vmem:[%s14910_s5 + $0x4d8] sm:$0xff]  ;;  %v8839_v36 = vcombine.low %v1516_v30, %v1520_v57  ;;  %v8848_v10 = vcombine.high %v1524_v3, %v1528_v47  ;;  %v1552_v18 = vld [vmem:[%s14910_s5 + $0x5b0] sm:$0xff] }
 0x275   : > { %3582 = vmatprep.subr.bf16.mxu0 %v8810_v62  ;;  %v8841_v62 = vcombine.low %v1517_v13, %v1521_v58  ;;  %v1560_v30 = vld [vmem:[%s14910_s5 + $0x5f0] sm:$0xff]  ;;  %v1557_v57 = vld [vmem:[%s14910_s5 + $0x5d8] sm:$0xff] }
 0x277   : > { %3381 = vmatpush1.bf16.msra.mxu1 %v8807_v11  ;;  %v1533_v11 = vld [vmem:[%s14910_s5 + $0x518] sm:$0xff] }
 0x278   : > { %3583 = vmatpush1.bf16.msra.mxu0 %v8809_v59  ;;  %3382 = vmatprep.subr.bf16.mxu1 %v8816_v44  ;;  %v1537_v59 = vld [vmem:[%s14910_s5 + $0x538] sm:$0xff]  ;;  %v8847_v44 = vcombine.low %v1524_v3, %v1528_v47 }
 0x279   : > { %3584 = vmatprep.subr.bf16.mxu0 %v8818_v32  ;;  %v1565_v3 = vld [vmem:[%s14910_s5 + $0x618] sm:$0xff] }
 0x27a   : > { %v1569_v47 = vld [vmem:[%s14910_s5 + $0x638] sm:$0xff] }
 0x27b   : > { %3383 = vmatpush1.bf16.msra.mxu1 %v8815_v42  ;;  %v8855_v42 = vcombine.low %v1532_v24, %v1536_v34  ;;  %v8889_v34 = vcombine.low %v1565_v3, %v1569_v47 }
 0x27c   : > { %3585 = vmatpush1.bf16.msra.mxu0 %v8817_v61  ;;  %3453 = vmatprep.subr.bf16.mxu1 %v8824_v63  ;;  %v8857_v61 = vcombine.low %v1533_v11, %v1537_v59  ;;  %v8864_v63 = vcombine.high %v1540_v4, %v1544_v49 }
 0x27d   : > { %3655 = vmatprep.subr.bf16.mxu0 %v8826_v5 }
 0x27e   : > { %3385 = vmatmul.mubr.bf16.vlgmr.msra.gmra.mrb[56].mxu1 %v11864_v46 }
 0x27f   : > { %3587 = vmatmul.mubr.bf16.vlgmr.msra.gmra.mrb[84].mxu0 %v11864_v46  ;;  %3394 = vmatprep.mubr.bf16.mxu1 %v11928_v45  ;;  %v8842_v46 = vcombine.high %v1517_v13, %v1521_v58  ;;  %v8871_v13 = vcombine.low %v1548_v21, %v1552_v18  ;;  %v8873_v58 = vcombine.low %v1549_v2, %v1553_v43 }
 0x280   : > { %3454 = vmatpush1.bf16.msra.mxu1 %v8823_v20  ;;  %3596 = vmatprep.mubr.bf16.mxu0 %v11928_v45  ;;  %v1529_v45 = vld [vmem:[%s14910_s5 + $0x4f8] sm:$0xff]  ;;  %v8863_v20 = vcombine.low %v1540_v4, %v1544_v49 }
 0x281   : > { %3656 = vmatpush1.bf16.msra.mxu0 %v8825_v6  ;;  %3455 = vmatprep.subr.bf16.mxu1 %v8832_v51  ;;  %v8850_v19 = vcombine.high %v1525_v28, %v1529_v45  ;;  %v8849_v32 = vcombine.low %v1525_v28, %v1529_v45  ;;  %v8872_v51 = vcombine.high %v1548_v21, %v1552_v18 }
 0x282   : > { %3657 = vmatprep.subr.bf16.mxu0 %v8834_v38  ;;  %v1556_v38 = vld [vmem:[%s14910_s5 + $0x5d0] sm:$0xff] }
 0x283   : > { %v8879_v28 = vcombine.low %v1556_v38, %v1560_v30 }
 0x284   : > { %3456 = vmatpush1.bf16.msra.mxu1 %v8831_v16  ;;  %v8880_v16 = vcombine.high %v1556_v38, %v1560_v30  ;;  %v1604_v30 = vld [vmem:[%s14910_s5 + $0x750] sm:$0xff] }
 0x285   : > { %3658 = vmatpush1.bf16.msra.mxu0 %v8833_v7  ;;  %3457 = vmatprep.subr.bf16.mxu1 %v8840_v8  ;;  %v1564_v8 = vld [vmem:[%s14910_s5 + $0x610] sm:$0xff] }
 0x286   : > { %3395 = vmatmul.mubr.bf16.gmra.mrb[60].mxu1 %v11922_v33  ;;  %3659 = vmatprep.subr.bf16.mxu0 %v8842_v46  ;;  %v1568_v46 = vld [vmem:[%s14910_s5 + $0x630] sm:$0xff] }
 0x287   : > { %3597 = vmatmul.mubr.bf16.gmra.mrb[88].mxu0 %v11922_v33  ;;  %3404 = vmatprep.mubr.bf16.mxu1 %v11993_v23  ;;  %v8858_v33 = vcombine.high %v1533_v11, %v1537_v59  ;;  %v8887_v24 = vcombine.low %v1564_v8, %v1568_v46 }
 0x288   : > { %3458 = vmatpush1.bf16.msra.mxu1 %v8839_v36  ;;  %3606 = vmatprep.mubr.bf16.mxu0 %v11993_v23  ;;  %v1545_v23 = vld [vmem:[%s14910_s5 + $0x578] sm:$0xff]  ;;  %v8888_v36 = vcombine.high %v1564_v8, %v1568_v46  ;;  %v1612_v8 = vld [vmem:[%s14910_s5 + $0x790] sm:$0xff] }
 0x289   : > { %3660 = vmatpush1.bf16.msra.mxu0 %v8841_v62  ;;  %3459 = vmatprep.subr.bf16.mxu1 %v8848_v10  ;;  %v8866_v5 = vcombine.high %v1541_v14, %v1545_v23  ;;  %v8865_v6 = vcombine.low %v1541_v14, %v1545_v23  ;;  %v1572_v62 = vld [vmem:[%s14910_s5 + $0x650] sm:$0xff] }
 0x28a   : > { %3661 = vmatprep.subr.bf16.mxu0 %v8850_v19  ;;  %v1576_v10 = vld [vmem:[%s14910_s5 + $0x670] sm:$0xff]  ;;  %v1573_v19 = vld [vmem:[%s14910_s5 + $0x658] sm:$0xff] }
 0x28b   : > { %v8896_v11 = vcombine.high %v1572_v62, %v1576_v10  ;;  %v8895_v4 = vcombine.low %v1572_v62, %v1576_v10  ;;  %v1588_v23 = vld [vmem:[%s14910_s5 + $0x6d0] sm:$0xff]  ;;  %v1621_v10 = vld [vmem:[%s14910_s5 + $0x7d8] sm:$0xff] }
 0x28c   : > { %3460 = vmatpush1.bf16.msra.mxu1 %v8847_v44  ;;  %v1580_v44 = vld [vmem:[%s14910_s5 + $0x690] sm:$0xff] }
 0x28d   : > { %3662 = vmatpush1.bf16.msra.mxu0 %v8849_v32  ;;  %3461 = vmatprep.subr.bf16.mxu1 %v8856_v17  ;;  %v1584_v32 = vld [vmem:[%s14910_s5 + $0x6b0] sm:$0xff]  ;;  %v1581_v17 = vld [vmem:[%s14910_s5 + $0x698] sm:$0xff] }
 0x28e   : > { %3405 = vmatmul.mubr.bf16.gmra.mrb[64].mxu1 %v11982_v15  ;;  %3663 = vmatprep.subr.bf16.mxu0 %v8858_v33  ;;  %v1585_v33 = vld [vmem:[%s14910_s5 + $0x6b8] sm:$0xff]  ;;  %v8904_v14 = vcombine.high %v1580_v44, %v1584_v32  ;;  %v1616_v46 = vld [vmem:[%s14910_s5 + $0x7b0] sm:$0xff] }
 0x28f   : > { %3607 = vmatmul.mubr.bf16.gmra.mrb[92].mxu0 %v11982_v15  ;;  %3414 = vmatprep.mubr.bf16.mxu1 %v12063_v55  ;;  %v8874_v15 = vcombine.high %v1549_v2, %v1553_v43  ;;  %v1596_v2 = vld [vmem:[%s14910_s5 + $0x710] sm:$0xff] }
 0x290   : > { %3462 = vmatpush1.bf16.msra.mxu1 %v8855_v42  ;;  %3616 = vmatprep.mubr.bf16.mxu0 %v12063_v55  ;;  %v1561_v55 = vld [vmem:[%s14910_s5 + $0x5f8] sm:$0xff]  ;;  %v1592_v42 = vld [vmem:[%s14910_s5 + $0x6f0] sm:$0xff] }
 0x291   : > { %3664 = vmatpush1.bf16.msra.mxu0 %v8857_v61  ;;  %3463 = vmatprep.subr.bf16.mxu1 %v8864_v63  ;;  %v8882_v7 = vcombine.high %v1557_v57, %v1561_v55  ;;  %v8881_v45 = vcombine.low %v1557_v57, %v1561_v55  ;;  %v1589_v61 = vld [vmem:[%s14910_s5 + $0x6d8] sm:$0xff]  ;;  %v8903_v63 = vcombine.low %v1580_v44, %v1584_v32  ;;  %v1600_v43 = vld [vmem:[%s14910_s5 + $0x730] sm:$0xff]  ;;  %v10343_v44 = vld [vmem:[%s14912_s7 + $0x4] ss:$28 sps:$4 sm:$0xff]  }
 0x292   : > { %3665 = vmatprep.subr.bf16.mxu0 %v8866_v5  ;;  %v8905_v5 = vcombine.low %v1581_v17, %v1585_v33  ;;  %v8912_v21 = vcombine.high %v1588_v23, %v1592_v42  ;;  %v8920_v38 = vcombine.high %v1596_v2, %v1600_v43  ;;  %v1608_v57 = vld [vmem:[%s14910_s5 + $0x770] sm:$0xff]  ;;  %v1605_v55 = vld [vmem:[%s14910_s5 + $0x758] sm:$0xff]  ;;  %v10346_v32 = vld [vmem:[%s14912_s7 + $0xc] ss:$28 sps:$4 sm:$0xff]  }
 0x293   : > { %v1624_v62 = vld [vmem:[%s14910_s5 + $0x7f0] sm:$0xff] }
 0x294   : > { %3464 = vmatpush1.bf16.msra.mxu1 %v8863_v20  ;;  %v1597_v20 = vld [vmem:[%s14910_s5 + $0x718] sm:$0xff] }
 0x295   : > { %3666 = vmatpush1.bf16.msra.mxu0 %v8865_v6  ;;  %3465 = vmatprep.subr.bf16.mxu1 %v8872_v51  ;;  %v1601_v6 = vld [vmem:[%s14910_s5 + $0x738] sm:$0xff]  ;;  %v8911_v51 = vcombine.low %v1588_v23, %v1592_v42  ;;  %v10355_v23 = vld [vmem:[%s14912_s7 + $0x74] ss:$28 sps:$4 sm:$0xff]  }
 0x296   : > { %3415 = vmatmul.mubr.bf16.gmra.mrb[68].mxu1 %v12052_v9  ;;  %3667 = vmatprep.subr.bf16.mxu0 %v8874_v15  ;;  %v10356_v42 = vld [vmem:[%s14912_s7 + $0x78] ss:$28 sps:$4 sm:$0xff]  }
 0x297   : > { %3617 = vmatmul.mubr.bf16.gmra.mrb[96].mxu0 %v12052_v9  ;;  %3424 = vmatprep.mubr.bf16.mxu1 %v12128_v39  ;;  %v8890_v9 = vcombine.high %v1565_v3, %v1569_v47  ;;  %v1613_v3 = vld [vmem:[%s14910_s5 + $0x798] sm:$0xff] }
 0x298   : > { %3466 = vmatpush1.bf16.msra.mxu1 %v8871_v13  ;;  %3626 = vmatprep.mubr.bf16.mxu0 %v12128_v39  ;;  %v1577_v39 = vld [vmem:[%s14910_s5 + $0x678] sm:$0xff]  ;;  %v8919_v13 = vcombine.low %v1596_v2, %v1600_v43  ;;  %v10376_v43 = vld [vmem:[%s14912_s7 + $0x124] ss:$28 sps:$4 sm:$0xff]  }
 0x299   : > { %3668 = vmatpush1.bf16.msra.mxu0 %v8873_v58  ;;  %3467 = vmatprep.subr.bf16.mxu1 %v8880_v16  ;;  %v8898_v59 = vcombine.high %v1573_v19, %v1577_v39  ;;  %v8897_v49 = vcombine.low %v1573_v19, %v1577_v39  ;;  %v8921_v58 = vcombine.low %v1597_v20, %v1601_v6  ;;  %v1617_v47 = vld [vmem:[%s14910_s5 + $0x7b8] sm:$0xff] }
 0x29a   : > { %3669 = vmatprep.subr.bf16.mxu0 %v8882_v7  ;;  %v8928_v16 = vcombine.high %v1604_v30, %v1608_v57  ;;  %v8935_v19 = vcombine.low %v1612_v8, %v1616_v46  ;;  %v8937_v39 = vcombine.low %v1613_v3, %v1617_v47  ;;  %v10373_v2 = vld [vmem:[%s14912_s7 + $0x11c] ss:$28 sps:$4 sm:$0xff]  }
 0x29c   : > { %3468 = vmatpush1.bf16.msra.mxu1 %v8879_v28  ;;  %v8927_v28 = vcombine.low %v1604_v30, %v1608_v57  ;;  %v10383_v30 = vld [vmem:[%s14912_s7 + $0x188] ss:$28 sps:$4 sm:$0xff]   ;;  %v10386_v57 = vld [vmem:[%s14912_s7 + $0x190] ss:$28 sps:$4 sm:$0xff]  }
 0x29d   : > { %3670 = vmatpush1.bf16.msra.mxu0 %v8881_v45  ;;  %3469 = vmatprep.subr.bf16.mxu1 %v8888_v36  ;;  %v8936_v36 = vcombine.high %v1612_v8, %v1616_v46  ;;  %v10403_v8 = vld [vmem:[%s14912_s7 + $0x234] ss:$28 sps:$4 sm:$0xff]  }
 0x29e   : > { %3425 = vmatmul.mubr.bf16.gmra.mrb[72].mxu1 %v12122_v25  ;;  %3671 = vmatprep.subr.bf16.mxu0 %v8890_v9  ;;  %v1620_v9 = vld [vmem:[%s14910_s5 + $0x7d0] sm:$0xff] }
 0x29f   : > { %3627 = vmatmul.mubr.bf16.gmra.mrb[100].mxu0 %v12122_v25  ;;  %3434 = vmatprep.mubr.bf16.mxu1 %v12206_v60  ;;  %v8906_v25 = vcombine.high %v1581_v17, %v1585_v33  ;;  %v10341_v17 = vld [vmem:[%s14912_s7] ss:$28 sps:$4 sm:$0xff]   ;;  %v10344_v33 = vld [vmem:[%s14912_s7 + $0x8] ss:$28 sps:$4 sm:$0xff]   ;;  %v10404_v46 = vld [vmem:[%s14912_s7 + $0x238] ss:$28 sps:$4 sm:$0xff]  }
 0x2a0   : > { %3470 = vmatpush1.bf16.msra.mxu1 %v8887_v24  ;;  %3636 = vmatprep.mubr.bf16.mxu0 %v12206_v60  ;;  %v1593_v60 = vld [vmem:[%s14910_s5 + $0x6f8] sm:$0xff]  ;;  %v8944_v24 = vcombine.high %v1620_v9, %v1624_v62 }
 0x2a1   : > { %3672 = vmatpush1.bf16.msra.mxu0 %v8889_v34  ;;  %3471 = vmatprep.subr.bf16.mxu1 %v8896_v11  ;;  %v8914_v18 = vcombine.high %v1589_v61, %v1593_v60  ;;  %v8913_v15 = vcombine.low %v1589_v61, %v1593_v60  ;;  %v8943_v11 = vcombine.low %v1620_v9, %v1624_v62  ;;  %v10361_v61 = vld [vmem:[%s14912_s7 + $0xac] ss:$28 sps:$4 sm:$0xff]   ;;  %v10364_v60 = vld [vmem:[%s14912_s7 + $0xb4] ss:$28 sps:$4 sm:$0xff]   ;;  %v10421_v9 = vld [vmem:[%s14912_s7 + $0x2dc] ss:$28 sps:$4 sm:$0xff]  }
 0x2a2   : > { %3673 = vmatprep.subr.bf16.mxu0 %v8898_v59  ;;  %v10424_v62 = vld [vmem:[%s14912_s7 + $0x2e4] ss:$28 sps:$4 sm:$0xff]  }
 0x2a4   : > { %3472 = vmatpush1.bf16.msra.mxu1 %v8895_v4  ;;  %v10349_v4 = vld [vmem:[%s14912_s7 + $0x3c] ss:$28 sps:$4 sm:$0xff]  }
 0x2a5   : > { %3674 = vmatpush1.bf16.msra.mxu0 %v8897_v49  ;;  %3473 = vmatprep.subr.bf16.mxu1 %v8904_v14  ;;  %v10352_v49 = vld [vmem:[%s14912_s7 + $0x44] ss:$28 sps:$4 sm:$0xff]   ;;  %v10347_v14 = vld [vmem:[%s14912_s7 + $0x38] ss:$28 sps:$4 sm:$0xff]  }
 0x2a6   : > { %3435 = vmatmul.mubr.bf16.gmra.mrb[76].mxu1 %v12193_v54  ;;  %3675 = vmatprep.subr.bf16.mxu0 %v8906_v25  ;;  %v10350_v25 = vld [vmem:[%s14912_s7 + $0x40] ss:$28 sps:$4 sm:$0xff]  }
 0x2a7   : > { %3637 = vmatmul.mubr.bf16.gmra.mrb[104].mxu0 %v12193_v54  ;;  %3444 = vmatprep.mubr.bf16.mxu1 %v12229_v37  ;;  %v8922_v54 = vcombine.high %v1597_v20, %v1601_v6  ;;  %v10371_v20 = vld [vmem:[%s14912_s7 + $0x118] ss:$28 sps:$4 sm:$0xff]   ;;  %v10374_v6 = vld [vmem:[%s14912_s7 + $0x120] ss:$28 sps:$4 sm:$0xff]  }
 0x2a8   : > { %3474 = vmatpush1.bf16.msra.mxu1 %v8903_v63  ;;  %3646 = vmatprep.mubr.bf16.mxu0 %v12229_v37  ;;  %v1609_v37 = vld [vmem:[%s14910_s5 + $0x778] sm:$0xff]  ;;  %v10359_v63 = vld [vmem:[%s14912_s7 + $0xa8] ss:$28 sps:$4 sm:$0xff]  }
 0x2a9   : > { %3676 = vmatpush1.bf16.msra.mxu0 %v8905_v5  ;;  %3475 = vmatprep.subr.bf16.mxu1 %v8912_v21  ;;  %v8930_v7 = vcombine.high %v1605_v55, %v1609_v37  ;;  %v8929_v45 = vcombine.low %v1605_v55, %v1609_v37  ;;  %v10362_v5 = vld [vmem:[%s14912_s7 + $0xb0] ss:$28 sps:$4 sm:$0xff]   ;;  %v10367_v21 = vld [vmem:[%s14912_s7 + $0xe4] ss:$28 sps:$4 sm:$0xff]  }
 0x2aa   : > { %3677 = vmatprep.subr.bf16.mxu0 %v8914_v18  ;;  %v10368_v18 = vld [vmem:[%s14912_s7 + $0xe8] ss:$28 sps:$4 sm:$0xff]  }
 0x2ab   : > { %v10391_v55 = vld [vmem:[%s14912_s7 + $0x1c4] ss:$28 sps:$4 sm:$0xff]  }
 0x2ac   : > { %3476 = vmatpush1.bf16.msra.mxu1 %v8911_v51  ;;  %v10379_v51 = vld [vmem:[%s14912_s7 + $0x154] ss:$28 sps:$4 sm:$0xff]   ;;  %v10392_v37 = vld [vmem:[%s14912_s7 + $0x1c8] ss:$28 sps:$4 sm:$0xff]  }
 0x2ad   : > { %3678 = vmatpush1.bf16.msra.mxu0 %v8913_v15  ;;  %3477 = vmatprep.subr.bf16.mxu1 %v8920_v38  ;;  %v10380_v15 = vld [vmem:[%s14912_s7 + $0x158] ss:$28 sps:$4 sm:$0xff]   ;;  %v10385_v38 = vld [vmem:[%s14912_s7 + $0x18c] ss:$28 sps:$4 sm:$0xff]  }
 0x2ae   : > { %3445 = vmatmul.mubr.bf16.gmra.mrb[80].mxu1 %v12231_v56  ;;  %3679 = vmatprep.subr.bf16.mxu0 %v8922_v54  ;;  %v10388_v54 = vld [vmem:[%s14912_s7 + $0x194] ss:$28 sps:$4 sm:$0xff]  }
 0x2af   : > { %3647 = vmatmul.mubr.bf16.gmra.mrb[108].mxu0 %v12231_v56  ;;  %3485 = vmatprep.mubr.bf16.mxu1 %v11877_v22  ;;  %v8938_v56 = vcombine.high %v1613_v3, %v1617_v47  ;;  %v10409_v3 = vld [vmem:[%s14912_s7 + $0x26c] ss:$28 sps:$4 sm:$0xff]   ;;  %v10412_v47 = vld [vmem:[%s14912_s7 + $0x274] ss:$28 sps:$4 sm:$0xff]  }
 0x2b0   : > { %3478 = vmatpush1.bf16.msra.mxu1 %v8919_v13  ;;  %3687 = vmatprep.mubr.bf16.mxu0 %v11877_v22  ;;  %v1625_v22 = vld [vmem:[%s14910_s5 + $0x7f8] sm:$0xff] }
 0x2b1   : > { %3680 = vmatpush1.bf16.msra.mxu0 %v8921_v58  ;;  %3479 = vmatprep.subr.bf16.mxu1 %v8928_v16  ;;  %v8946_v34 = vcombine.high %v1621_v10, %v1625_v22  ;;  %v8945_v59 = vcombine.low %v1621_v10, %v1625_v22  ;;  %v10397_v13 = vld [vmem:[%s14912_s7 + $0x1fc] ss:$28 sps:$4 sm:$0xff]   ;;  %v10400_v58 = vld [vmem:[%s14912_s7 + $0x204] ss:$28 sps:$4 sm:$0xff]  }
 0x2b2   : > { %3681 = vmatprep.subr.bf16.mxu0 %v8930_v7  ;;  %v10395_v16 = vld [vmem:[%s14912_s7 + $0x1f8] ss:$28 sps:$4 sm:$0xff]   ;;  %v10398_v7 = vld [vmem:[%s14912_s7 + $0x200] ss:$28 sps:$4 sm:$0xff]  }
 0x2b3   : > { %v10419_v10 = vld [vmem:[%s14912_s7 + $0x2d8] ss:$28 sps:$4 sm:$0xff]   ;;  %v10422_v22 = vld [vmem:[%s14912_s7 + $0x2e0] ss:$28 sps:$4 sm:$0xff]  }
 0x2b4   : > { %3480 = vmatpush1.bf16.msra.mxu1 %v8927_v28  ;;  %v10407_v28 = vld [vmem:[%s14912_s7 + $0x268] ss:$28 sps:$4 sm:$0xff]  }
 0x2b5   : > { %3682 = vmatpush1.bf16.msra.mxu0 %v8929_v45  ;;  %3481 = vmatprep.subr.bf16.mxu1 %v8936_v36  ;;  %v10410_v45 = vld [vmem:[%s14912_s7 + $0x270] ss:$28 sps:$4 sm:$0xff]   ;;  %v10415_v36 = vld [vmem:[%s14912_s7 + $0x2a4] ss:$28 sps:$4 sm:$0xff]  }
 0x2b6   : > { %3683 = vmatprep.subr.bf16.mxu0 %v8938_v56  ;;  %v10416_v56 = vld [vmem:[%s14912_s7 + $0x2a8] ss:$28 sps:$4 sm:$0xff]  }
 0x2b8   : > { %3482 = vmatpush1.bf16.msra.mxu1 %v8935_v19  ;;  %v10427_v19 = vld [vmem:[%s14912_s7 + $0x314] ss:$28 sps:$4 sm:$0xff]  }
 0x2b9   : > { %3684 = vmatpush1.bf16.msra.mxu0 %v8937_v39  ;;  %3483 = vmatprep.subr.bf16.mxu1 %v8944_v24  ;;  %v10425_v39 = vld [vmem:[%s14912_s7 + $0x310] ss:$28 sps:$4 sm:$0xff]   ;;  %v10428_v24 = vld [vmem:[%s14912_s7 + $0x318] ss:$28 sps:$4 sm:$0xff]  }
 0x2ba   : > { %3685 = vmatprep.subr.bf16.mxu0 %v8946_v34  ;;  %v10433_v34 = vld [vmem:[%s14912_s7 + $0x34c] ss:$28 sps:$4 sm:$0xff]  }
 0x2bc   : > { %3484 = vmatpush1.bf16.msra.mxu1 %v8943_v11  ;;  %v10436_v11 = vld [vmem:[%s14912_s7 + $0x354] ss:$28 sps:$4 sm:$0xff]  }
 0x2bd   : > { %3686 = vmatpush1.bf16.msra.mxu0 %v8945_v59  ;;  %6873 = vmatprep.subr.bf16.mxu1 %v10343_v44  ;;  %v10431_v59 = vld [vmem:[%s14912_s7 + $0x348] ss:$28 sps:$4 sm:$0xff]   ;;  %v10434_v44 = vld [vmem:[%s14912_s7 + $0x350] ss:$28 sps:$4 sm:$0xff]  }
 0x2be   : > { %7277 = vmatprep.subr.bf16.mxu0 %v10346_v32  ;;  %v10439_v32 = vld [vmem:[%s14912_s7 + $0x384] ss:$28 sps:$4 sm:$0xff]  }
 0x2bf   : > { %3486 = vmatmul.mubr.bf16.vlgmr.msra.gmra.mrb[56].mxu1 %v11866_v26 }
 0x2c0   : > { %3688 = vmatmul.mubr.bf16.vlgmr.msra.gmra.mrb[84].mxu0 %v11866_v26  ;;  %3495 = vmatprep.mubr.bf16.mxu1 %v11930_v53  ;;  %v10358_v26 = vld [vmem:[%s14912_s7 + $0x7c] ss:$28 sps:$4 sm:$0xff]  }
 0x2c1   : > { %3697 = vmatprep.mubr.bf16.mxu0 %v11930_v53  ;;  %6874 = vmatpush1.bf16.msra.mxu1 %v10341_v17  ;;  %v10353_v53 = vld [vmem:[%s14912_s7 + $0x70] ss:$28 sps:$4 sm:$0xff]  }
 0x2c2   : > { %7278 = vmatpush1.bf16.msra.mxu0 %v10344_v33  ;;  %6875 = vmatprep.subr.bf16.mxu1 %v10349_v4  ;;  %v10442_v17 = vld [vmem:[%s14912_s7 + $0x38c] ss:$28 sps:$4 sm:$0xff]   ;;  %v1626_v33 = vld [vmem:[%s14911_s6] sm:$0xff] }
 0x2c3   : > { %7279 = vmatprep.subr.bf16.mxu0 %v10352_v49  ;;  %v12951_v4 = vrot.slane %v1626_v33, %v11436_v48  ;;  %v15008_v49 = vld [vmem:[#allocation8_spill] sm:$0xff] }
 0x2c5   : > { %6876 = vmatpush1.bf16.msra.mxu1 %v10347_v14  ;;  %v12954_v14 = vrot.slane %v1626_v33, %v15008_v49 }
 0x2c6   : > { %7280 = vmatpush1.bf16.msra.mxu0 %v10350_v25  ;;  %6877 = vmatprep.subr.bf16.mxu1 %v10355_v23  ;;  %v15009_v25 = vld [vmem:[#allocation7_spill] sm:$0xff] }
 0x2c7   : > { %3496 = vmatmul.mubr.bf16.gmra.mrb[60].mxu1 %v11924_v35  ;;  %7281 = vmatprep.subr.bf16.mxu0 %v10358_v26  ;;  %v12957_v23 = vrot.slane %v1626_v33, %v15009_v25  ;;  %v15010_v26 = vld [vmem:[#allocation9_spill] sm:$0xff] }
 0x2c8   : > { %3698 = vmatmul.mubr.bf16.gmra.mrb[88].mxu0 %v11924_v35  ;;  %3505 = vmatprep.mubr.bf16.mxu1 %v11995_v0  ;;  %v10370_v35 = vld [vmem:[%s14912_s7 + $0xec] ss:$28 sps:$4 sm:$0xff]  }
 0x2c9   : > { %3707 = vmatprep.mubr.bf16.mxu0 %v11995_v0  ;;  %6878 = vmatpush1.bf16.msra.mxu1 %v10353_v53  ;;  %v10365_v0 = vld [vmem:[%s14912_s7 + $0xe0] ss:$28 sps:$4 sm:$0xff]   ;;  %v12960_v53 = vrot.slane %v1626_v33, %v15010_v26 }
 0x2ca   : > { %7282 = vmatpush1.bf16.msra.mxu0 %v10356_v42  ;;  %6879 = vmatprep.subr.bf16.mxu1 %v10361_v61 }
 0x2cb   : > { %7283 = vmatprep.subr.bf16.mxu0 %v10364_v60 }
 0x2cd   : > { %6880 = vmatpush1.bf16.msra.mxu1 %v10359_v63 }
 0x2ce   : > { %7284 = vmatpush1.bf16.msra.mxu0 %v10362_v5  ;;  %6881 = vmatprep.subr.bf16.mxu1 %v10367_v21 }
 0x2cf   : > { %3506 = vmatmul.mubr.bf16.gmra.mrb[64].mxu1 %v11984_v40  ;;  %7285 = vmatprep.subr.bf16.mxu0 %v10370_v35 }
 0x2d0   : > { %3708 = vmatmul.mubr.bf16.gmra.mrb[92].mxu0 %v11984_v40  ;;  %3515 = vmatprep.mubr.bf16.mxu1 %v12065_v52  ;;  %v10382_v40 = vld [vmem:[%s14912_s7 + $0x15c] ss:$28 sps:$4 sm:$0xff]  }
 0x2d1   : > { %3717 = vmatprep.mubr.bf16.mxu0 %v12065_v52  ;;  %6882 = vmatpush1.bf16.msra.mxu1 %v10365_v0  ;;  %v10377_v52 = vld [vmem:[%s14912_s7 + $0x150] ss:$28 sps:$4 sm:$0xff]  }
 0x2d2   : > { %7286 = vmatpush1.bf16.msra.mxu0 %v10368_v18  ;;  %6883 = vmatprep.subr.bf16.mxu1 %v10373_v2 }
 0x2d3   : > { %7287 = vmatprep.subr.bf16.mxu0 %v10376_v43 }
 0x2d5   : > { %6884 = vmatpush1.bf16.msra.mxu1 %v10371_v20 }
 0x2d6   : > { %7288 = vmatpush1.bf16.msra.mxu0 %v10374_v6  ;;  %6885 = vmatprep.subr.bf16.mxu1 %v10379_v51 }
 0x2d7   : > { %3516 = vmatmul.mubr.bf16.gmra.mrb[68].mxu1 %v12054_v12  ;;  %7289 = vmatprep.subr.bf16.mxu0 %v10382_v40 }
 0x2d8   : > { %3718 = vmatmul.mubr.bf16.gmra.mrb[96].mxu0 %v12054_v12  ;;  %3525 = vmatprep.mubr.bf16.mxu1 %v12130_v41  ;;  %v10394_v12 = vld [vmem:[%s14912_s7 + $0x1cc] ss:$28 sps:$4 sm:$0xff]  }
 0x2d9   : > { %3727 = vmatprep.mubr.bf16.mxu0 %v12130_v41  ;;  %6886 = vmatpush1.bf16.msra.mxu1 %v10377_v52  ;;  %v10389_v41 = vld [vmem:[%s14912_s7 + $0x1c0] ss:$28 sps:$4 sm:$0xff]  }
 0x2da   : > { %7290 = vmatpush1.bf16.msra.mxu0 %v10380_v15  ;;  %6887 = vmatprep.subr.bf16.mxu1 %v10385_v38 }
 0x2db   : > { %7291 = vmatprep.subr.bf16.mxu0 %v10388_v54 }
 0x2dd   : > { %6888 = vmatpush1.bf16.msra.mxu1 %v10383_v30 }
 0x2de   : > { %7292 = vmatpush1.bf16.msra.mxu0 %v10386_v57  ;;  %6889 = vmatprep.subr.bf16.mxu1 %v10391_v55 }
 0x2df   : > { %3526 = vmatmul.mubr.bf16.gmra.mrb[72].mxu1 %v12124_v29  ;;  %7293 = vmatprep.subr.bf16.mxu0 %v10394_v12 }
 0x2e0   : > { %3728 = vmatmul.mubr.bf16.gmra.mrb[100].mxu0 %v12124_v29  ;;  %3535 = vmatprep.mubr.bf16.mxu1 %v12208_v27  ;;  %v10406_v29 = vld [vmem:[%s14912_s7 + $0x23c] ss:$28 sps:$4 sm:$0xff]  }
 0x2e1   : > { %3737 = vmatprep.mubr.bf16.mxu0 %v12208_v27  ;;  %6890 = vmatpush1.bf16.msra.mxu1 %v10389_v41  ;;  %v10401_v27 = vld [vmem:[%s14912_s7 + $0x230] ss:$28 sps:$4 sm:$0xff]  }
 0x2e2   : > { %7294 = vmatpush1.bf16.msra.mxu0 %v10392_v37  ;;  %6891 = vmatprep.subr.bf16.mxu1 %v10397_v13 }
 0x2e3   : > { %7295 = vmatprep.subr.bf16.mxu0 %v10400_v58 }
 0x2e5   : > { %6892 = vmatpush1.bf16.msra.mxu1 %v10395_v16 }
 0x2e6   : > { %7296 = vmatpush1.bf16.msra.mxu0 %v10398_v7  ;;  %6893 = vmatprep.subr.bf16.mxu1 %v10403_v8 }
 0x2e7   : > { %3536 = vmatmul.mubr.bf16.gmra.mrb[76].mxu1 %v12195_v1  ;;  %7297 = vmatprep.subr.bf16.mxu0 %v10406_v29 }
 0x2e8   : > { %3738 = vmatmul.mubr.bf16.gmra.mrb[104].mxu0 %v12195_v1  ;;  %3545 = vmatprep.mubr.bf16.mxu1 %v12443_v31  ;;  %v10418_v1 = vld [vmem:[%s14912_s7 + $0x2ac] ss:$28 sps:$4 sm:$0xff]  }
 0x2e9   : > { %3747 = vmatprep.mubr.bf16.mxu0 %v12443_v31  ;;  %6894 = vmatpush1.bf16.msra.mxu1 %v10401_v27  ;;  %v10413_v31 = vld [vmem:[%s14912_s7 + $0x2a0] ss:$28 sps:$4 sm:$0xff]  }
 0x2ea   : > { %7298 = vmatpush1.bf16.msra.mxu0 %v10404_v46  ;;  %6895 = vmatprep.subr.bf16.mxu1 %v10409_v3 }
 0x2eb   : > { %7299 = vmatprep.subr.bf16.mxu0 %v10412_v47 }
 0x2ed   : > { %6896 = vmatpush1.bf16.msra.mxu1 %v10407_v28 }
 0x2ee   : > { %7300 = vmatpush1.bf16.msra.mxu0 %v10410_v45  ;;  %6897 = vmatprep.subr.bf16.mxu1 %v10415_v36  ;;  %v10437_v36 = vld [vmem:[%s14912_s7 + $0x380] ss:$28 sps:$4 sm:$0xff]  }
 0x2ef   : > { %3546 = vmatmul.mubr.bf16.gmra.mrb[80].mxu1 %v12473_v50  ;;  %7301 = vmatprep.subr.bf16.mxu0 %v10418_v1 }
 0x2f0   : > { %3748 = vmatmul.mubr.bf16.gmra.mrb[108].mxu0 %v12473_v50  ;;  %v10430_v50 = vld [vmem:[%s14912_s7 + $0x31c] ss:$28 sps:$4 sm:$0xff]  }
 0x2f1   : > { %6898 = vmatpush1.bf16.msra.mxu1 %v10413_v31 }
 0x2f2   : > { %7302 = vmatpush1.bf16.msra.mxu0 %v10416_v56  ;;  %6899 = vmatprep.subr.bf16.mxu1 %v10421_v9 }
 0x2f3   : > { %7303 = vmatprep.subr.bf16.mxu0 %v10424_v62 }
 0x2f5   : > { %6900 = vmatpush1.bf16.msra.mxu1 %v10419_v10 }
 0x2f6   : > { %7304 = vmatpush1.bf16.msra.mxu0 %v10422_v22  ;;  %6901 = vmatprep.subr.bf16.mxu1 %v10427_v19  ;;  %v10440_v22 = vld [vmem:[%s14912_s7 + $0x388] ss:$28 sps:$4 sm:$0xff]   ;;  %v10445_v19 = vld [vmem:[%s14912_s7 + $0x3bc] ss:$28 sps:$4 sm:$0xff]  }
 0x2f7   : > { %7305 = vmatprep.subr.bf16.mxu0 %v10430_v50 }
 0x2f9   : > { %6902 = vmatpush1.bf16.msra.mxu1 %v10425_v39 }
 0x2fa   : > { %7306 = vmatpush1.bf16.msra.mxu0 %v10428_v24  ;;  %6903 = vmatprep.subr.bf16.mxu1 %v10433_v34 }
 0x2fb   : > { %7307 = vmatprep.subr.bf16.mxu0 %v10436_v11 }
 0x2fd   : > { %6904 = vmatpush1.bf16.msra.mxu1 %v10431_v59 }
 0x2fe   : > { %7308 = vmatpush1.bf16.msra.mxu0 %v10434_v44  ;;  %6974 = vmatprep.subr.bf16.mxu1 %v10439_v32  ;;  %v10448_v44 = vld [vmem:[%s14912_s7 + $0x3c4] ss:$28 sps:$4 sm:$0xff]  }
 0x2ff   : > { %7378 = vmatprep.subr.bf16.mxu0 %v10442_v17 }
 0x310   : > { %v3083_v42 = vpop.f32.mrb[28].mxu1 }
 0x311   : > { %v9630_v61 = vadd.f32 %v3083_v42, %v12951_v4  ;;  %v3285_v60 = vpop.f32.mrb[56].mxu0  ;;  %v3085_v63 = vpop.f32.mrb[29].mxu1 }
 0x312   : > { %v9656_v5 = vadd.f32 %v3285_v60, %v12954_v14  ;;  %v9631_v21 = vadd.f32 %v3085_v63, %v12957_v23  ;;  %v3287_v35 = vpop.f32.mrb[57].mxu0  ;;  %v3087_v0 = vpop.f32.mrb[30].mxu1 }
 0x313   : > { %v3756_v18 = vmul.f32 0.2, %v9630_v61  ;;  %v9657_v2 = vadd.f32 %v3287_v35, %v12960_v53  ;;  %v9632_v43 = vadd.f32 %v3087_v0, %v12951_v4  ;;  %v3289_v20 = vpop.f32.mrb[58].mxu0  ;;  %v3089_v6 = vpop.f32.mrb[31].mxu1  ;;  %v10443_v0 = vld [vmem:[%s14912_s7 + $0x3b8] ss:$28 sps:$4 sm:$0xff]  }
 0x314   : > { %v3758_v51 = vmul.f32 0.2, %v9656_v5  ;;  %v3757_v40 = vmul.f32 0.2, %v9631_v21  ;;  %v9658_v52 = vadd.f32 %v3289_v20, %v12954_v14  ;;  %v9633_v15 = vadd.f32 %v3089_v6, %v12957_v23  ;;  %v3291_v38 = vpop.f32.mrb[59].mxu0 }
 0x315   : > { %v3759_v54 = vmul.f32 0.2, %v9657_v2  ;;  %v3764_v30 = vmul.f32 0.2, %v9632_v43  ;;  %v9659_v57 = vadd.f32 %v3291_v38, %v12960_v53  ;;  %v3860_v41 = vmax.f32 %v9630_v61, %v3756_v18  ;;  %v10446_v20 = vld [vmem:[%s14912_s7 + $0x3c0] ss:$28 sps:$4 sm:$0xff]  }
 0x316   : > { %v3766_v55 = vmul.f32 0.2, %v9658_v52  ;;  %v3765_v12 = vmul.f32 0.2, %v9633_v15  ;;  %v3862_v58 = vmax.f32 %v9656_v5, %v3758_v51  ;;  %v3861_v16 = vmax.f32 %v9631_v21, %v3757_v40  ;;  %v10451_v6 = vld [vmem:[%s14912_s7 + $0x3f4] ss:$28 sps:$4 sm:$0xff]  }
 0x317   : > { %v3868_v37 = vmax.f32 %v9632_v43, %v3764_v30  ;;  %v3767_v13 = vmul.f32 0.2, %v9659_v57  ;;  %v3863_v27 = vmax.f32 %v9657_v2, %v3759_v54 }
 0x318   : > { %v3870_v7 = vmax.f32 %v9658_v52, %v3766_v55  ;;  %v3869_v8 = vmax.f32 %v9633_v15, %v3765_v12  ;;  %v3093_v29 = vpop.f32.mrb[32].mxu1 }
 0x319   : > { %v12970_v46 = vpack.c.bf16 %v3868_v37, %v3860_v41  ;;  %v3871_v3 = vmax.f32 %v9659_v57, %v3767_v13  ;;  %v9634_v47 = vadd.f32 %v3093_v29, %v12951_v4  ;;  %v3295_v28 = vpop.f32.mrb[60].mxu0  ;;  %v3095_v45 = vpop.f32.mrb[33].mxu1  ;;  %v10449_v37 = vld [vmem:[%s14912_s7 + $0x3f0] ss:$28 sps:$4 sm:$0xff]   ;;  %v10454_v13 = vld [vmem:[%s14912_s7 + $0x3fc] ss:$28 sps:$4 sm:$0xff]  }
 0x31a   : > { %v12976_v1 = vpack.c.bf16 %v3870_v7, %v3862_v58  ;;  %v12978_v31 = vpack.c.bf16 %v3869_v8, %v3861_v16  ;;  %v9660_v56 = vadd.f32 %v3295_v28, %v12954_v14  ;;  %v9635_v9 = vadd.f32 %v3095_v45, %v12957_v23  ;;  %v3297_v62 = vpop.f32.mrb[61].mxu0  ;;  %v3097_v10 = vpop.f32.mrb[34].mxu1 }
 0x31b   : > { %v12988_v50 = vpack.c.bf16 %v3871_v3, %v3863_v27  ;;  %v3772_v39 = vmul.f32 0.2, %v9634_v47  ;;  %v9661_v24 = vadd.f32 %v3297_v62, %v12960_v53  ;;  %v9636_v34 = vadd.f32 %v3097_v10, %v12951_v4  ;;  %v3299_v11 = vpop.f32.mrb[62].mxu0  ;;  %v3099_v59 = vpop.f32.mrb[35].mxu1  ;;  %v10452_v3 = vld [vmem:[%s14912_s7 + $0x3f8] ss:$28 sps:$4 sm:$0xff]  }
 0x31c   : > { %v3774_v32 = vmul.f32 0.2, %v9660_v56  ;;  %v3773_v17 = vmul.f32 0.2, %v9635_v9  ;;  %v9662_v33 = vadd.f32 %v3299_v11, %v12954_v14  ;;  %v9637_v42 = vadd.f32 %v3099_v59, %v12957_v23  ;;  %v3301_v61 = vpop.f32.mrb[63].mxu0  ;;  %6905 = vmatprep.mubr.bf16.mxu1 %v12978_v31  ;;  %7309 = vmatprep.mubr.bf16.mxu0 %v12978_v31 }
 0x31d   : > { %v3775_v60 = vmul.f32 0.2, %v9661_v24  ;;  %v3780_v63 = vmul.f32 0.2, %v9636_v34  ;;  %v9663_v5 = vadd.f32 %v3301_v61, %v12960_v53  ;;  %6906 = vmatmul.mubr.bf16.vlgmr.msra.gmra.mrb[84].mxu1 %v12970_v46  ;;  %7310 = vmatmul.mubr.bf16.vlgmr.msra.gmra.mrb[112].mxu0 %v12970_v46  ;;  %v3876_v18 = vmax.f32 %v9634_v47, %v3772_v39  ;;  %v10457_v47 = vld [vmem:[%s14912_s7 + $0x42c] ss:$28 sps:$4 sm:$0xff]  }
 0x31e   : > { %v3782_v21 = vmul.f32 0.2, %v9662_v33  ;;  %v3781_v35 = vmul.f32 0.2, %v9637_v42  ;;  %6975 = vmatpush1.bf16.msra.mxu1 %v10437_v36  ;;  %7379 = vmatpush1.bf16.msra.mxu0 %v10440_v22  ;;  %v3878_v51 = vmax.f32 %v9660_v56, %v3774_v32  ;;  %v3877_v40 = vmax.f32 %v9635_v9, %v3773_v17  ;;  %v10460_v10 = vld [vmem:[%s14912_s7 + $0x434] ss:$28 sps:$4 sm:$0xff]  }
 0x31f   : > { %v3884_v2 = vmax.f32 %v9636_v34, %v3780_v63  ;;  %v3783_v43 = vmul.f32 0.2, %v9663_v5  ;;  %6976 = vmatprep.subr.bf16.mxu1 %v10445_v19  ;;  %7380 = vmatprep.subr.bf16.mxu0 %v10448_v44  ;;  %v3879_v54 = vmax.f32 %v9661_v24, %v3775_v60  ;;  %v10458_v63 = vld [vmem:[%s14912_s7 + $0x430] ss:$28 sps:$4 sm:$0xff]  }
 0x320   : > { %v3886_v52 = vmax.f32 %v9662_v33, %v3782_v21  ;;  %v3885_v15 = vmax.f32 %v9637_v42, %v3781_v35  ;;  %v3103_v38 = vpop.f32.mrb[36].mxu1  ;;  %v10455_v33 = vld [vmem:[%s14912_s7 + $0x428] ss:$28 sps:$4 sm:$0xff]  }
 0x321   : > { %v13011_v30 = vpack.c.bf16 %v3884_v2, %v3876_v18  ;;  %v3887_v57 = vmax.f32 %v9663_v5, %v3783_v43  ;;  %v9638_v55 = vadd.f32 %v3103_v38, %v12951_v4  ;;  %v3305_v12 = vpop.f32.mrb[64].mxu0  ;;  %v3105_v41 = vpop.f32.mrb[37].mxu1  ;;  %v10463_v5 = vld [vmem:[%s14912_s7 + $0x464] ss:$28 sps:$4 sm:$0xff]   ;;  %v10466_v38 = vld [vmem:[%s14912_s7 + $0x46c] ss:$28 sps:$4 sm:$0xff]  }
 0x322   : > { %v13020_v58 = vpack.c.bf16 %v3886_v52, %v3878_v51  ;;  %v13022_v16 = vpack.c.bf16 %v3885_v15, %v3877_v40  ;;  %v9664_v7 = vadd.f32 %v3305_v12, %v12954_v14  ;;  %v9639_v8 = vadd.f32 %v3105_v41, %v12957_v23  ;;  %v3307_v29 = vpop.f32.mrb[65].mxu0  ;;  %6977 = vmatpush1.bf16.msra.mxu1 %v10443_v0  ;;  %v3107_v27 = vpop.f32.mrb[38].mxu1  ;;  %v10461_v15 = vld [vmem:[%s14912_s7 + $0x460] ss:$28 sps:$4 sm:$0xff]  }
 0x323   : > { %v13032_v28 = vpack.c.bf16 %v3887_v57, %v3879_v54  ;;  %v3788_v45 = vmul.f32 0.2, %v9638_v55  ;;  %v9665_v36 = vadd.f32 %v3307_v29, %v12960_v53  ;;  %7381 = vmatpush1.bf16.msra.mxu0 %v10446_v20  ;;  %v9640_v56 = vadd.f32 %v3107_v27, %v12951_v4  ;;  %v3309_v9 = vpop.f32.mrb[66].mxu0  ;;  %v3109_v62 = vpop.f32.mrb[39].mxu1  ;;  %6978 = vmatprep.subr.bf16.mxu1 %v10451_v6 }
 0x324   : > { %v3790_v22 = vmul.f32 0.2, %v9664_v7  ;;  %v3789_v19 = vmul.f32 0.2, %v9639_v8  ;;  %v9666_v39 = vadd.f32 %v3309_v9, %v12954_v14  ;;  %v9641_v24 = vadd.f32 %v3109_v62, %v12957_v23  ;;  %v3311_v34 = vpop.f32.mrb[67].mxu0  ;;  %6915 = vmatprep.mubr.bf16.mxu1 %v13022_v16  ;;  %7319 = vmatprep.mubr.bf16.mxu0 %v13022_v16 }
 0x325   : > { %v3791_v11 = vmul.f32 0.2, %v9665_v36  ;;  %v3796_v59 = vmul.f32 0.2, %v9640_v56  ;;  %v9667_v44 = vadd.f32 %v3311_v34, %v12960_v53  ;;  %7382 = vmatprep.subr.bf16.mxu0 %v10454_v13  ;;  %6916 = vmatmul.mubr.bf16.gmra.mrb[88].mxu1 %v13011_v30  ;;  %v3892_v42 = vmax.f32 %v9638_v55, %v3788_v45  ;;  %v10464_v13 = vld [vmem:[%s14912_s7 + $0x468] ss:$28 sps:$4 sm:$0xff]  }
 0x326   : > { %v3798_v32 = vmul.f32 0.2, %v9666_v39  ;;  %v3797_v17 = vmul.f32 0.2, %v9641_v24  ;;  %6979 = vmatpush1.bf16.msra.mxu1 %v10449_v37  ;;  %7320 = vmatmul.mubr.bf16.gmra.mrb[116].mxu0 %v13011_v30  ;;  %v3894_v21 = vmax.f32 %v9664_v7, %v3790_v22  ;;  %v3893_v35 = vmax.f32 %v9639_v8, %v3789_v19  ;;  %v10469_v7 = vld [vmem:[%s14912_s7 + $0x49c] ss:$28 sps:$4 sm:$0xff]  }
 0x327   : > { %v3900_v61 = vmax.f32 %v9640_v56, %v3796_v59  ;;  %v3799_v60 = vmul.f32 0.2, %v9667_v44  ;;  %7383 = vmatpush1.bf16.msra.mxu0 %v10452_v3  ;;  %6980 = vmatprep.subr.bf16.mxu1 %v10457_v47  ;;  %v3895_v43 = vmax.f32 %v9665_v36, %v3791_v11  ;;  %v10472_v36 = vld [vmem:[%s14912_s7 + $0x4a4] ss:$28 sps:$4 sm:$0xff]   ;;  %v10467_v59 = vld [vmem:[%s14912_s7 + $0x498] ss:$28 sps:$4 sm:$0xff]  }
 0x328   : > { %v3902_v0 = vmax.f32 %v9666_v39, %v3798_v32  ;;  %v3901_v18 = vmax.f32 %v9641_v24, %v3797_v17  ;;  %v3113_v2 = vpop.f32.mrb[40].mxu1  ;;  %7384 = vmatprep.subr.bf16.mxu0 %v10460_v10 }
 0x329   : > { %v13055_v20 = vpack.c.bf16 %v3900_v61, %v3892_v42  ;;  %v3903_v6 = vmax.f32 %v9667_v44, %v3799_v60  ;;  %v9642_v51 = vadd.f32 %v3113_v2, %v12951_v4  ;;  %v3315_v40 = vpop.f32.mrb[68].mxu0  ;;  %v3115_v52 = vpop.f32.mrb[41].mxu1  ;;  %v10475_v42 = vld [vmem:[%s14912_s7 + $0x4d4] ss:$28 sps:$4 sm:$0xff]  }
 0x32a   : > { %v13064_v54 = vpack.c.bf16 %v3902_v0, %v3894_v21  ;;  %v13066_v57 = vpack.c.bf16 %v3901_v18, %v3893_v35  ;;  %v9668_v55 = vadd.f32 %v3315_v40, %v12954_v14  ;;  %v9643_v12 = vadd.f32 %v3115_v52, %v12957_v23  ;;  %v3317_v41 = vpop.f32.mrb[69].mxu0  ;;  %6981 = vmatpush1.bf16.msra.mxu1 %v10455_v33  ;;  %v3117_v37 = vpop.f32.mrb[42].mxu1  ;;  %v10470_v33 = vld [vmem:[%s14912_s7 + $0x4a0] ss:$28 sps:$4 sm:$0xff]  }
 0x32b   : > { %v13076_v8 = vpack.c.bf16 %v3903_v6, %v3895_v43  ;;  %v3804_v29 = vmul.f32 0.2, %v9642_v51  ;;  %v9669_v27 = vadd.f32 %v3317_v41, %v12960_v53  ;;  %7385 = vmatpush1.bf16.msra.mxu0 %v10458_v63  ;;  %v9644_v3 = vadd.f32 %v3117_v37, %v12951_v4  ;;  %v3319_v47 = vpop.f32.mrb[70].mxu0  ;;  %v3119_v45 = vpop.f32.mrb[43].mxu1  ;;  %6982 = vmatprep.subr.bf16.mxu1 %v10463_v5  ;;  %v10478_v40 = vld [vmem:[%s14912_s7 + $0x4dc] ss:$28 sps:$4 sm:$0xff]  }
 0x32c   : > { %15011 = vst [vmem:[#allocation10_spill] sm:$0xff] %v13064_v54  ;;  %v3806_v56 = vmul.f32 0.2, %v9668_v55  ;;  %v3805_v9 = vmul.f32 0.2, %v9643_v12  ;;  %v9670_v62 = vadd.f32 %v3319_v47, %v12954_v14  ;;  %v9645_v10 = vadd.f32 %v3119_v45, %v12957_v23  ;;  %v3321_v22 = vpop.f32.mrb[71].mxu0  ;;  %6925 = vmatprep.mubr.bf16.mxu1 %v13066_v57  ;;  %7329 = vmatprep.mubr.bf16.mxu0 %v13066_v57 }
 0x32d   : > { %v3807_v19 = vmul.f32 0.2, %v9669_v27  ;;  %v3812_v39 = vmul.f32 0.2, %v9644_v3  ;;  %v9671_v24 = vadd.f32 %v3321_v22, %v12960_v53  ;;  %7386 = vmatprep.subr.bf16.mxu0 %v10466_v38  ;;  %6926 = vmatmul.mubr.bf16.gmra.mrb[92].mxu1 %v13055_v20  ;;  %v3908_v44 = vmax.f32 %v9642_v51, %v3804_v29  ;;  %v10473_v51 = vld [vmem:[%s14912_s7 + $0x4d0] ss:$28 sps:$4 sm:$0xff]  }
 0x32e   : > { %v3814_v34 = vmul.f32 0.2, %v9670_v62  ;;  %v3813_v11 = vmul.f32 0.2, %v9645_v10  ;;  %6983 = vmatpush1.bf16.msra.mxu1 %v10461_v15  ;;  %7330 = vmatmul.mubr.bf16.gmra.mrb[120].mxu0 %v13055_v20  ;;  %v3910_v61 = vmax.f32 %v9668_v55, %v3806_v56  ;;  %v3909_v60 = vmax.f32 %v9643_v12, %v3805_v9  ;;  %v10476_v37 = vld [vmem:[%s14912_s7 + $0x4d8] ss:$28 sps:$4 sm:$0xff]  }
 0x32f   : > { %v3916_v32 = vmax.f32 %v9644_v3, %v3812_v39  ;;  %v3815_v17 = vmul.f32 0.2, %v9671_v24  ;;  %7387 = vmatpush1.bf16.msra.mxu0 %v10464_v13  ;;  %6984 = vmatprep.subr.bf16.mxu1 %v10469_v7  ;;  %v3911_v35 = vmax.f32 %v9669_v27, %v3807_v19  ;;  %v10481_v13 = vld [vmem:[%s14912_s7 + $0x50c] ss:$28 sps:$4 sm:$0xff]  }
 0x330   : > { %v3918_v63 = vmax.f32 %v9670_v62, %v3814_v34  ;;  %v3917_v5 = vmax.f32 %v9645_v10, %v3813_v11  ;;  %v3123_v21 = vpop.f32.mrb[44].mxu1  ;;  %7388 = vmatprep.subr.bf16.mxu0 %v10472_v36  ;;  %v10484_v36 = vld [vmem:[%s14912_s7 + $0x514] ss:$28 sps:$4 sm:$0xff]  }
 0x331   : > { %v13099_v0 = vpack.c.bf16 %v3916_v32, %v3908_v44  ;;  %v3919_v18 = vmax.f32 %v9671_v24, %v3815_v17  ;;  %v9646_v2 = vadd.f32 %v3123_v21, %v12951_v4  ;;  %v3325_v43 = vpop.f32.mrb[72].mxu0  ;;  %v3125_v6 = vpop.f32.mrb[45].mxu1 }
 0x332   : > { %v13108_v52 = vpack.c.bf16 %v3918_v63, %v3910_v61  ;;  %v13110_v15 = vpack.c.bf16 %v3917_v5, %v3909_v60  ;;  %v9672_v38 = vadd.f32 %v3325_v43, %v12954_v14  ;;  %v9647_v55 = vadd.f32 %v3125_v6, %v12957_v23  ;;  %v3327_v12 = vpop.f32.mrb[73].mxu0  ;;  %6985 = vmatpush1.bf16.msra.mxu1 %v10467_v59  ;;  %v3127_v41 = vpop.f32.mrb[46].mxu1  ;;  %v10479_v59 = vld [vmem:[%s14912_s7 + $0x508] ss:$28 sps:$4 sm:$0xff]  }
 0x333   : > { %v13120_v7 = vpack.c.bf16 %v3919_v18, %v3911_v35  ;;  %v3820_v29 = vmul.f32 0.2, %v9646_v2  ;;  %v9673_v27 = vadd.f32 %v3327_v12, %v12960_v53  ;;  %7389 = vmatpush1.bf16.msra.mxu0 %v10470_v33  ;;  %v9648_v3 = vadd.f32 %v3127_v41, %v12951_v4  ;;  %v3329_v47 = vpop.f32.mrb[74].mxu0  ;;  %v3129_v45 = vpop.f32.mrb[47].mxu1  ;;  %6986 = vmatprep.subr.bf16.mxu1 %v10475_v42  ;;  %v10482_v33 = vld [vmem:[%s14912_s7 + $0x510] ss:$28 sps:$4 sm:$0xff]  }
 0x334   : > { %15012 = vst [vmem:[#allocation11_spill] sm:$0xff] %v13108_v52  ;;  %v3822_v56 = vmul.f32 0.2, %v9672_v38  ;;  %v3821_v9 = vmul.f32 0.2, %v9647_v55  ;;  %v9674_v62 = vadd.f32 %v3329_v47, %v12954_v14  ;;  %v9649_v10 = vadd.f32 %v3129_v45, %v12957_v23  ;;  %v3331_v22 = vpop.f32.mrb[75].mxu0  ;;  %6935 = vmatprep.mubr.bf16.mxu1 %v13110_v15  ;;  %7339 = vmatprep.mubr.bf16.mxu0 %v13110_v15 }
 0x335   : > { %15013 = vst [vmem:[#allocation12_spill] sm:$0xff] %v13120_v7  ;;  %v3823_v19 = vmul.f32 0.2, %v9673_v27  ;;  %v3828_v39 = vmul.f32 0.2, %v9648_v3  ;;  %v9675_v24 = vadd.f32 %v3331_v22, %v12960_v53  ;;  %7390 = vmatprep.subr.bf16.mxu0 %v10478_v40  ;;  %6936 = vmatmul.mubr.bf16.gmra.mrb[96].mxu1 %v13099_v0  ;;  %v3924_v44 = vmax.f32 %v9646_v2, %v3820_v29 }
 0x336   : > { %v3830_v34 = vmul.f32 0.2, %v9674_v62  ;;  %v3829_v11 = vmul.f32 0.2, %v9649_v10  ;;  %6987 = vmatpush1.bf16.msra.mxu1 %v10473_v51  ;;  %7340 = vmatmul.mubr.bf16.gmra.mrb[124].mxu0 %v13099_v0  ;;  %v10487_v42 = vld [vmem:[%s14912_s7 + $0x544] ss:$28 sps:$4 sm:$0xff]   ;;  %v3926_v61 = vmax.f32 %v9672_v38, %v3822_v56  ;;  %v3925_v60 = vmax.f32 %v9647_v55, %v3821_v9 }
 0x337   : > { %v3932_v32 = vmax.f32 %v9648_v3, %v3828_v39  ;;  %v3831_v17 = vmul.f32 0.2, %v9675_v24  ;;  %7391 = vmatpush1.bf16.msra.mxu0 %v10476_v37  ;;  %6988 = vmatprep.subr.bf16.mxu1 %v10481_v13  ;;  %v3927_v35 = vmax.f32 %v9673_v27, %v3823_v19  ;;  %v10485_v40 = vld [vmem:[%s14912_s7 + $0x540] ss:$28 sps:$4 sm:$0xff]   ;;  %v10490_v38 = vld [vmem:[%s14912_s7 + $0x54c] ss:$28 sps:$4 sm:$0xff]  }
 0x338   : > { %v3934_v63 = vmax.f32 %v9674_v62, %v3830_v34  ;;  %v3933_v5 = vmax.f32 %v9649_v10, %v3829_v11  ;;  %v3133_v21 = vpop.f32.mrb[48].mxu1  ;;  %7392 = vmatprep.subr.bf16.mxu0 %v10484_v36  ;;  %v10488_v27 = vld [vmem:[%s14912_s7 + $0x548] ss:$28 sps:$4 sm:$0xff]   ;;  %v10493_v3 = vld [vmem:[%s14912_s7 + $0x57c] ss:$28 sps:$4 sm:$0xff]  }
 0x339   : > { %v13143_v18 = vpack.c.bf16 %v3932_v32, %v3924_v44  ;;  %v3935_v2 = vmax.f32 %v9675_v24, %v3831_v17  ;;  %v9650_v43 = vadd.f32 %v3133_v21, %v12951_v4  ;;  %v3335_v6 = vpop.f32.mrb[76].mxu0  ;;  %v3135_v51 = vpop.f32.mrb[49].mxu1  ;;  %v10496_v10 = vld [vmem:[%s14912_s7 + $0x584] ss:$28 sps:$4 sm:$0xff]  }
 0x33a   : > { %v13152_v55 = vpack.c.bf16 %v3934_v63, %v3926_v61  ;;  %v13154_v12 = vpack.c.bf16 %v3933_v5, %v3925_v60  ;;  %v9676_v41 = vadd.f32 %v3335_v6, %v12954_v14  ;;  %v9651_v37 = vadd.f32 %v3135_v51, %v12957_v23  ;;  %v3337_v13 = vpop.f32.mrb[77].mxu0  ;;  %6989 = vmatpush1.bf16.msra.mxu1 %v10479_v59  ;;  %v3137_v29 = vpop.f32.mrb[50].mxu1  ;;  %v10494_v63 = vld [vmem:[%s14912_s7 + $0x580] ss:$28 sps:$4 sm:$0xff]   ;;  %v10499_v5 = vld [vmem:[%s14912_s7 + $0x5b4] ss:$28 sps:$4 sm:$0xff]  }
 0x33b   : > { %v13164_v47 = vpack.c.bf16 %v3935_v2, %v3927_v35  ;;  %v3836_v45 = vmul.f32 0.2, %v9650_v43  ;;  %v9677_v36 = vadd.f32 %v3337_v13, %v12960_v53  ;;  %7393 = vmatpush1.bf16.msra.mxu0 %v10482_v33  ;;  %v9652_v56 = vadd.f32 %v3137_v29, %v12951_v4  ;;  %v3339_v9 = vpop.f32.mrb[78].mxu0  ;;  %v3139_v62 = vpop.f32.mrb[51].mxu1  ;;  %6990 = vmatprep.subr.bf16.mxu1 %v10487_v42  ;;  %v10491_v33 = vld [vmem:[%s14912_s7 + $0x578] ss:$28 sps:$4 sm:$0xff]  }
 0x33c   : > { %15014 = vst [vmem:[#allocation13_spill] sm:$0xff] %v13152_v55  ;;  %v3838_v22 = vmul.f32 0.2, %v9676_v41  ;;  %v3837_v19 = vmul.f32 0.2, %v9651_v37  ;;  %v9678_v39 = vadd.f32 %v3339_v9, %v12954_v14  ;;  %v9653_v24 = vadd.f32 %v3139_v62, %v12957_v23  ;;  %v3341_v34 = vpop.f32.mrb[79].mxu0  ;;  %6945 = vmatprep.mubr.bf16.mxu1 %v13154_v12  ;;  %7349 = vmatprep.mubr.bf16.mxu0 %v13154_v12 }
 0x33d   : > { %15015 = vst [vmem:[#allocation14_spill] sm:$0xff] %v13164_v47  ;;  %v3839_v11 = vmul.f32 0.2, %v9677_v36  ;;  %v3844_v59 = vmul.f32 0.2, %v9652_v56  ;;  %v9679_v44 = vadd.f32 %v3341_v34, %v12960_v53  ;;  %7394 = vmatprep.subr.bf16.mxu0 %v10490_v38  ;;  %6946 = vmatmul.mubr.bf16.gmra.mrb[100].mxu1 %v13143_v18  ;;  %v3940_v42 = vmax.f32 %v9650_v43, %v3836_v45 }
 0x33e   : > { %v3846_v32 = vmul.f32 0.2, %v9678_v39  ;;  %v3845_v17 = vmul.f32 0.2, %v9653_v24  ;;  %6991 = vmatpush1.bf16.msra.mxu1 %v10485_v40  ;;  %7350 = vmatmul.mubr.bf16.gmra.mrb[128].mxu0 %v13143_v18  ;;  %v3942_v21 = vmax.f32 %v9676_v41, %v3838_v22  ;;  %v3941_v35 = vmax.f32 %v9651_v37, %v3837_v19  ;;  %v10500_v9 = vld [vmem:[%s14912_s7 + $0x5b8] ss:$28 sps:$4 sm:$0xff]  }
 0x33f   : > { %v3948_v61 = vmax.f32 %v9652_v56, %v3844_v59  ;;  %v3847_v60 = vmul.f32 0.2, %v9679_v44  ;;  %7395 = vmatpush1.bf16.msra.mxu0 %v10488_v27  ;;  %6992 = vmatprep.subr.bf16.mxu1 %v10493_v3  ;;  %v3943_v40 = vmax.f32 %v9677_v36, %v3839_v11  ;;  %v10502_v3 = vld [vmem:[%s14912_s7 + $0x5bc] ss:$28 sps:$4 sm:$0xff]   ;;  %v10508_v34 = vld [vmem:[%s14912_s7 + $0x5f4] ss:$28 sps:$4 sm:$0xff]  }
 0x340   : > { %v3950_v2 = vmax.f32 %v9678_v39, %v3846_v32  ;;  %v3949_v6 = vmax.f32 %v9653_v24, %v3845_v17  ;;  %v3143_v51 = vpop.f32.mrb[52].mxu1  ;;  %7396 = vmatprep.subr.bf16.mxu0 %v10496_v10  ;;  %v10503_v59 = vld [vmem:[%s14912_s7 + $0x5e8] ss:$28 sps:$4 sm:$0xff]   ;;  %v10506_v32 = vld [vmem:[%s14912_s7 + $0x5f0] ss:$28 sps:$4 sm:$0xff]  }
 0x341   : > { %v13187_v43 = vpack.c.bf16 %v3948_v61, %v3940_v42  ;;  %v3951_v38 = vmax.f32 %v9679_v44, %v3847_v60  ;;  %v9654_v13 = vadd.f32 %v3143_v51, %v12951_v4  ;;  %v13190_v29 = vpop.f32.mrb[80].mxu0  ;;  %v3145_v27 = vpop.f32.mrb[53].mxu1  ;;  %v10497_v4 = vld [vmem:[%s14912_s7 + $0x5b0] ss:$28 sps:$4 sm:$0xff]   ;;  %v10509_v61 = vld [vmem:[%s14912_s7 + $0x620] ss:$28 sps:$4 sm:$0xff]  }
 0x342   : > { %v13195_v45 = vpack.c.bf16 %v3950_v2, %v3942_v21  ;;  %v13197_v41 = vpack.c.bf16 %v3949_v6, %v3941_v35  ;;  %v9655_v37 = vadd.f32 %v3145_v27, %v12957_v23  ;;  %v13200_v56 = vpop.f32.mrb[81].mxu0  ;;  %6993 = vmatpush1.bf16.msra.mxu1 %v10491_v33  ;;  %v3147_v36 = vpop.f32.mrb[54].mxu1  ;;  %v10505_v23 = vld [vmem:[%s14912_s7 + $0x5ec] ss:$28 sps:$4 sm:$0xff]   ;;  %v10511_v33 = vld [vmem:[%s14912_s7 + $0x624] ss:$28 sps:$4 sm:$0xff]  }
 0x343   : > { %v13208_v62 = vpack.c.bf16 %v3951_v38, %v3943_v40  ;;  %v3852_v10 = vmul.f32 0.2, %v9654_v13  ;;  %7397 = vmatpush1.bf16.msra.mxu0 %v10494_v63  ;;  %v3349_v22 = vpop.f32.mrb[82].mxu0  ;;  %v3148_v19 = vpop.f32.mrb[55].mxu1  ;;  %6994 = vmatprep.subr.bf16.mxu1 %v10499_v5  ;;  %v10514_v42 = vld [vmem:[%s14912_s7 + $0x62c] ss:$28 sps:$4 sm:$0xff]  }
 0x344   : > { %15016 = vst [vmem:[#allocation15_spill] sm:$0xff] %v13195_v45  ;;  %v3853_v39 = vmul.f32 0.2, %v9655_v37  ;;  %v3350_v24 = vpop.f32.mrb[83].mxu0  ;;  %6955 = vmatprep.mubr.bf16.mxu1 %v13197_v41  ;;  %7359 = vmatprep.mubr.bf16.mxu0 %v13197_v41  ;;  %v10512_v63 = vld [vmem:[%s14912_s7 + $0x628] ss:$28 sps:$4 sm:$0xff]  }
 0x345   : > { %15017 = vst [vmem:[#allocation16_spill] sm:$0xff] %v13208_v62  ;;  %7398 = vmatprep.subr.bf16.mxu0 %v10502_v3  ;;  %6956 = vmatmul.mubr.bf16.gmra.mrb[104].mxu1 %v13187_v43  ;;  %v3956_v44 = vmax.f32 %v9654_v13, %v3852_v10  ;;  %v10517_v5 = vld [vmem:[%s14912_s7 + $0x65c] ss:$28 sps:$4 sm:$0xff]   ;;  %v10520_v21 = vld [vmem:[%s14912_s7 + $0x664] ss:$28 sps:$4 sm:$0xff]  }
 0x346   : > { %v3957_v11 = vmax.f32 %v9655_v37, %v3853_v39  ;;  %6995 = vmatpush1.bf16.msra.mxu1 %v10497_v4  ;;  %7360 = vmatmul.mubr.bf16.gmra.mrb[132].mxu0 %v13187_v43  ;;  %v10515_v35 = vld [vmem:[%s14912_s7 + $0x658] ss:$28 sps:$4 sm:$0xff]   ;;  %v10518_v2 = vld [vmem:[%s14912_s7 + $0x660] ss:$28 sps:$4 sm:$0xff]   ;;  %v10521_v40 = vld [vmem:[%s14912_s7 + $0x690] ss:$28 sps:$4 sm:$0xff]  }
 0x347   : > { %7399 = vmatpush1.bf16.msra.mxu0 %v10500_v9  ;;  %6996 = vmatprep.subr.bf16.mxu1 %v10505_v23  ;;  %v13238_v60 = vpack.c.bf16 %v3956_v44, %v3956_v44  ;;  %v10523_v6 = vld [vmem:[%s14912_s7 + $0x694] ss:$28 sps:$4 sm:$0xff]   ;;  %v10526_v51 = vld [vmem:[%s14912_s7 + $0x69c] ss:$28 sps:$4 sm:$0xff]   ;;  %v10529_v13 = vld [vmem:[%s14912_s7 + $0x6cc] ss:$28 sps:$4 sm:$0xff]  }
 0x348   : > { %v13226_v17 = vpack.c.bf16 %v3957_v11, %v3957_v11  ;;  %7400 = vmatprep.subr.bf16.mxu0 %v10508_v34  ;;  %v10524_v38 = vld [vmem:[%s14912_s7 + $0x698] ss:$28 sps:$4 sm:$0xff]   ;;  %v10527_v3 = vld [vmem:[%s14912_s7 + $0x6c8] ss:$28 sps:$4 sm:$0xff]   ;;  %v10530_v37 = vld [vmem:[%s14912_s7 + $0x6d0] ss:$28 sps:$4 sm:$0xff]  }
 0x349   : > { %v10532_v27 = vld [vmem:[%s14912_s7 + $0x6d4] ss:$28 sps:$4 sm:$0xff]   ;;  %v10535_v36 = vld [vmem:[%s14912_s7 + $0x704] ss:$28 sps:$4 sm:$0xff]   ;;  %v10538_v4 = vld [vmem:[%s14912_s7 + $0x70c] ss:$28 sps:$4 sm:$0xff]  }
 0x34a   : > { %6997 = vmatpush1.bf16.msra.mxu1 %v10503_v59  ;;  %6965 = vmatprep.mubr.bf16.mxu1 %v13226_v17  ;;  %v10533_v9 = vld [vmem:[%s14912_s7 + $0x700] ss:$28 sps:$4 sm:$0xff]   ;;  %v10536_v10 = vld [vmem:[%s14912_s7 + $0x708] ss:$28 sps:$4 sm:$0xff]   ;;  %v10539_v23 = vld [vmem:[%s14912_s7 + $0x738] ss:$28 sps:$4 sm:$0xff]  }
 0x34b   : > { %7401 = vmatpush1.bf16.msra.mxu0 %v10506_v32  ;;  %7369 = vmatprep.mubr.bf16.mxu0 %v13226_v17  ;;  %v10541_v22 = vld [vmem:[%s14912_s7 + $0x73c] ss:$28 sps:$4 sm:$0xff]   ;;  %v10544_v19 = vld [vmem:[%s14912_s7 + $0x744] ss:$28 sps:$4 sm:$0xff]   ;;  %v10547_v24 = vld [vmem:[%s14912_s7 + $0x774] ss:$28 sps:$4 sm:$0xff]  }
 0x34c   : > { %6998 = vmatprep.subr.bf16.mxu1 %v10511_v33  ;;  %7402 = vmatprep.subr.bf16.mxu0 %v10514_v42  ;;  %v10542_v39 = vld [vmem:[%s14912_s7 + $0x740] ss:$28 sps:$4 sm:$0xff]   ;;  %v10545_v11 = vld [vmem:[%s14912_s7 + $0x770] ss:$28 sps:$4 sm:$0xff]   ;;  %v10548_v59 = vld [vmem:[%s14912_s7 + $0x778] ss:$28 sps:$4 sm:$0xff]  }
 0x34d   : > { %6966 = vmatmul.mubr.bf16.gmra.mrb[108].mxu1 %v13238_v60  ;;  %v10550_v34 = vld [vmem:[%s14912_s7 + $0x77c] ss:$28 sps:$4 sm:$0xff]   ;;  %v10553_v44 = vld [vmem:[%s14912_s7 + $0x7ac] ss:$28 sps:$4 sm:$0xff]   ;;  %v10556_v32 = vld [vmem:[%s14912_s7 + $0x7b4] ss:$28 sps:$4 sm:$0xff]  }
 0x34e   : > { %6999 = vmatpush1.bf16.msra.mxu1 %v10509_v61  ;;  %7370 = vmatmul.mubr.bf16.gmra.mrb[136].mxu0 %v13238_v60  ;;  %v10551_v33 = vld [vmem:[%s14912_s7 + $0x7a8] ss:$28 sps:$4 sm:$0xff]   ;;  %v10554_v42 = vld [vmem:[%s14912_s7 + $0x7b0] ss:$28 sps:$4 sm:$0xff]  }
 0x34f   : > { %7403 = vmatpush1.bf16.msra.mxu0 %v10512_v63  ;;  %7006 = vmatprep.mubr.bf16.mxu1 %v12988_v50  ;;  %v10559_v61 = vld [vmem:[%s14912_s7 + $0x7e4] ss:$28 sps:$4 sm:$0xff]   ;;  %v10562_v63 = vld [vmem:[%s14912_s7 + $0x7ec] ss:$28 sps:$4 sm:$0xff]  }
 0x350   : > { %7410 = vmatprep.mubr.bf16.mxu0 %v12988_v50  ;;  %7000 = vmatprep.subr.bf16.mxu1 %v10517_v5  ;;  %v10557_v5 = vld [vmem:[%s14912_s7 + $0x7e0] ss:$28 sps:$4 sm:$0xff]  }
 0x351   : > { %7404 = vmatprep.subr.bf16.mxu0 %v10520_v21  ;;  %v10560_v21 = vld [vmem:[%s14912_s7 + $0x7e8] ss:$28 sps:$4 sm:$0xff]  }
 0x352   : > { %7001 = vmatpush1.bf16.msra.mxu1 %v10515_v35  ;;  %v10565_v35 = vld [vmem:[%s14912_s7 + $0x81c] ss:$28 sps:$4 sm:$0xff]  }
 0x353   : > { %7405 = vmatpush1.bf16.msra.mxu0 %v10518_v2  ;;  %7002 = vmatprep.subr.bf16.mxu1 %v10523_v6  ;;  %v10568_v2 = vld [vmem:[%s14912_s7 + $0x824] ss:$28 sps:$4 sm:$0xff]   ;;  %v10563_v6 = vld [vmem:[%s14912_s7 + $0x818] ss:$28 sps:$4 sm:$0xff]  }
 0x354   : > { %7406 = vmatprep.subr.bf16.mxu0 %v10526_v51  ;;  %v10566_v51 = vld [vmem:[%s14912_s7 + $0x820] ss:$28 sps:$4 sm:$0xff]  }
 0x356   : > { %7003 = vmatpush1.bf16.msra.mxu1 %v10521_v40  ;;  %v10571_v40 = vld [vmem:[%s14912_s7 + $0x854] ss:$28 sps:$4 sm:$0xff]  }
 0x357   : > { %7407 = vmatpush1.bf16.msra.mxu0 %v10524_v38  ;;  %7004 = vmatprep.subr.bf16.mxu1 %v10529_v13  ;;  %v10574_v38 = vld [vmem:[%s14912_s7 + $0x85c] ss:$28 sps:$4 sm:$0xff]   ;;  %v10569_v13 = vld [vmem:[%s14912_s7 + $0x850] ss:$28 sps:$4 sm:$0xff]  }
 0x358   : > { %7408 = vmatprep.subr.bf16.mxu0 %v10532_v27  ;;  %v10572_v27 = vld [vmem:[%s14912_s7 + $0x858] ss:$28 sps:$4 sm:$0xff]  }
 0x35a   : > { %7005 = vmatpush1.bf16.msra.mxu1 %v10527_v3  ;;  %v10577_v3 = vld [vmem:[%s14912_s7 + $0x88c] ss:$28 sps:$4 sm:$0xff]  }
 0x35b   : > { %7409 = vmatpush1.bf16.msra.mxu0 %v10530_v37  ;;  %7075 = vmatprep.subr.bf16.mxu1 %v10535_v36  ;;  %v10580_v37 = vld [vmem:[%s14912_s7 + $0x894] ss:$28 sps:$4 sm:$0xff]   ;;  %v10575_v36 = vld [vmem:[%s14912_s7 + $0x888] ss:$28 sps:$4 sm:$0xff]  }
 0x35c   : > { %7479 = vmatprep.subr.bf16.mxu0 %v10538_v4  ;;  %v9681_v4 = vadd.f32 %v13200_v56, %v12960_v53  ;;  %v10581_v53 = vld [vmem:[%s14912_s7 + $0x8c0] ss:$28 sps:$4 sm:$0xff]  }
 0x35d   : > { %7007 = vmatmul.mubr.bf16.vlgmr.msra.gmra.mrb[84].mxu1 %v12976_v1 }
 0x35e   : > { %7411 = vmatmul.mubr.bf16.vlgmr.msra.gmra.mrb[112].mxu0 %v12976_v1  ;;  %7016 = vmatprep.mubr.bf16.mxu1 %v13032_v28  ;;  %v3855_v56 = vmul.f32 0.2, %v9681_v4 }
 0x35f   : > { %7076 = vmatpush1.bf16.msra.mxu1 %v10533_v9  ;;  %7420 = vmatprep.mubr.bf16.mxu0 %v13032_v28  ;;  %v10578_v9 = vld [vmem:[%s14912_s7 + $0x890] ss:$28 sps:$4 sm:$0xff]  }
 0x360   : > { %7480 = vmatpush1.bf16.msra.mxu0 %v10536_v10  ;;  %7077 = vmatprep.subr.bf16.mxu1 %v10541_v22  ;;  %v10583_v10 = vld [vmem:[%s14912_s7 + $0x8c4] ss:$28 sps:$4 sm:$0xff]   ;;  %v10586_v22 = vld [vmem:[%s14912_s7 + $0x8cc] ss:$28 sps:$4 sm:$0xff]  }
 0x361   : > { %7481 = vmatprep.subr.bf16.mxu0 %v10544_v19  ;;  %v10584_v19 = vld [vmem:[%s14912_s7 + $0x8c8] ss:$28 sps:$4 sm:$0xff]  }
 0x363   : > { %7078 = vmatpush1.bf16.msra.mxu1 %v10539_v23  ;;  %v10589_v23 = vld [vmem:[%s14912_s7 + $0x8fc] ss:$28 sps:$4 sm:$0xff]  }
 0x364   : > { %7482 = vmatpush1.bf16.msra.mxu0 %v10542_v39  ;;  %7079 = vmatprep.subr.bf16.mxu1 %v10547_v24  ;;  %v10592_v39 = vld [vmem:[%s14912_s7 + $0x904] ss:$28 sps:$4 sm:$0xff]   ;;  %v9680_v24 = vadd.f32 %v13190_v29, %v12954_v14  ;;  %v10598_v14 = vld [vmem:[%s14912_s7 + $0x93c] ss:$28 sps:$4 sm:$0xff]  }
 0x365   : > { %7017 = vmatmul.mubr.bf16.gmra.mrb[88].mxu1 %v13020_v58  ;;  %7483 = vmatprep.subr.bf16.mxu0 %v10550_v34  ;;  %v10587_v34 = vld [vmem:[%s14912_s7 + $0x8f8] ss:$28 sps:$4 sm:$0xff]  }
 0x366   : > { %7421 = vmatmul.mubr.bf16.gmra.mrb[116].mxu0 %v13020_v58  ;;  %7026 = vmatprep.mubr.bf16.mxu1 %v13076_v8  ;;  %v3854_v29 = vmul.f32 0.2, %v9680_v24 }
 0x367   : > { %7080 = vmatpush1.bf16.msra.mxu1 %v10545_v11  ;;  %7430 = vmatprep.mubr.bf16.mxu0 %v13076_v8  ;;  %v3959_v11 = vmax.f32 %v9681_v4, %v3855_v56  ;;  %v10616_v4 = vld [vmem:[%s14912_s7 + $0x9e4] ss:$28 sps:$4 sm:$0xff]  }
 0x368   : > { %7484 = vmatpush1.bf16.msra.mxu0 %v10548_v59  ;;  %7081 = vmatprep.subr.bf16.mxu1 %v10553_v44  ;;  %v10590_v59 = vld [vmem:[%s14912_s7 + $0x900] ss:$28 sps:$4 sm:$0xff]   ;;  %v10595_v44 = vld [vmem:[%s14912_s7 + $0x934] ss:$28 sps:$4 sm:$0xff]  }
 0x369   : > { %7485 = vmatprep.subr.bf16.mxu0 %v10556_v32  ;;  %v10593_v32 = vld [vmem:[%s14912_s7 + $0x930] ss:$28 sps:$4 sm:$0xff]  }
 0x36b   : > { %7082 = vmatpush1.bf16.msra.mxu1 %v10551_v33  ;;  %v13437_v33 = vpack.c.bf16 %v3959_v11, %v3959_v11 }
 0x36c   : > { %7486 = vmatpush1.bf16.msra.mxu0 %v10554_v42  ;;  %7083 = vmatprep.subr.bf16.mxu1 %v10559_v61  ;;  %v10596_v42 = vld [vmem:[%s14912_s7 + $0x938] ss:$28 sps:$4 sm:$0xff]   ;;  %v10601_v61 = vld [vmem:[%s14912_s7 + $0x96c] ss:$28 sps:$4 sm:$0xff]  }
 0x36d   : > { %7027 = vmatmul.mubr.bf16.gmra.mrb[92].mxu1 %v13064_v54  ;;  %7487 = vmatprep.subr.bf16.mxu0 %v10562_v63  ;;  %15018 = vst [vmem:[#allocation17_spill] sm:$0xff] %v13437_v33  ;;  %v10604_v63 = vld [vmem:[%s14912_s7 + $0x974] ss:$28 sps:$4 sm:$0xff]  }
 0x36e   : > { %7431 = vmatmul.mubr.bf16.gmra.mrb[120].mxu0 %v13064_v54  ;;  %7036 = vmatprep.mubr.bf16.mxu1 %v13120_v7 }
 0x36f   : > { %7084 = vmatpush1.bf16.msra.mxu1 %v10557_v5  ;;  %7440 = vmatprep.mubr.bf16.mxu0 %v13120_v7  ;;  %v3958_v5 = vmax.f32 %v9680_v24, %v3854_v29  ;;  %v10617_v29 = vld [vmem:[%s14912_s7 + $0xa10] ss:$28 sps:$4 sm:$0xff]  }
 0x370   : > { %7488 = vmatpush1.bf16.msra.mxu0 %v10560_v21  ;;  %7085 = vmatprep.subr.bf16.mxu1 %v10565_v35  ;;  %v10599_v21 = vld [vmem:[%s14912_s7 + $0x968] ss:$28 sps:$4 sm:$0xff]   ;;  %v10602_v35 = vld [vmem:[%s14912_s7 + $0x970] ss:$28 sps:$4 sm:$0xff]  }
 0x371   : > { %7489 = vmatprep.subr.bf16.mxu0 %v10568_v2  ;;  %v10607_v2 = vld [vmem:[%s14912_s7 + $0x9a4] ss:$28 sps:$4 sm:$0xff]  }
 0x373   : > { %7086 = vmatpush1.bf16.msra.mxu1 %v10563_v6  ;;  %v10610_v6 = vld [vmem:[%s14912_s7 + $0x9ac] ss:$28 sps:$4 sm:$0xff]  }
 0x374   : > { %7490 = vmatpush1.bf16.msra.mxu0 %v10566_v51  ;;  %7087 = vmatprep.subr.bf16.mxu1 %v10571_v40  ;;  %v13464_v51 = vpack.c.bf16 %v3958_v5, %v3958_v5  ;;  %v10605_v40 = vld [vmem:[%s14912_s7 + $0x9a0] ss:$28 sps:$4 sm:$0xff]   ;;  %v10620_v5 = vld [vmem:[%s14912_s7 + $0xa18] ss:$28 sps:$4 sm:$0xff]  }
 0x375   : > { %7037 = vmatmul.mubr.bf16.gmra.mrb[96].mxu1 %v13108_v52  ;;  %7491 = vmatprep.subr.bf16.mxu0 %v10574_v38  ;;  %v15020_v38 = vld [vmem:[#allocation5_spill] sm:$0xff] }
 0x376   : > { %7441 = vmatmul.mubr.bf16.gmra.mrb[124].mxu0 %v13108_v52  ;;  %7046 = vmatprep.mubr.bf16.mxu1 %v13164_v47  ;;  %15019 = vst [vmem:[#allocation18_spill] sm:$0xff] %v13464_v51 }
 0x377   : > { %7088 = vmatpush1.bf16.msra.mxu1 %v10569_v13  ;;  %7450 = vmatprep.mubr.bf16.mxu0 %v13164_v47  ;;  %v14924_v13 = vsub.s32 4, %v15020_v38 }
 0x378   : > { %7492 = vmatpush1.bf16.msra.mxu0 %v10572_v27  ;;  %7089 = vmatprep.subr.bf16.mxu1 %v10577_v3  ;;  %v10608_v27 = vld [vmem:[%s14912_s7 + $0x9a8] ss:$28 sps:$4 sm:$0xff]   ;;  %v14925_v3 = vsub.s32 6, %v15020_v38 }
 0x379   : > { %7493 = vmatprep.subr.bf16.mxu0 %v10580_v37  ;;  %v10613_v37 = vld [vmem:[%s14912_s7 + $0x9dc] ss:$28 sps:$4 sm:$0xff]  }
 0x37b   : > { %7090 = vmatpush1.bf16.msra.mxu1 %v10575_v36  ;;  %v14923_v36 = vsub.s32 5, %v15020_v38 }
 0x37c   : > { %7494 = vmatpush1.bf16.msra.mxu0 %v10578_v9  ;;  %7091 = vmatprep.subr.bf16.mxu1 %v10583_v10  ;;  %v1658_v9 = vsub.s32 7, %v15020_v38  ;;  %v10981_v10 = vld [vmem:[%s14911_s6] sm:$0xff] }
 0x37d   : > { %7047 = vmatmul.mubr.bf16.gmra.mrb[100].mxu1 %v13152_v55  ;;  %7495 = vmatprep.subr.bf16.mxu0 %v10586_v22  ;;  %v13489_v22 = vrot.slane %v10981_v10, %v14924_v13  ;;  %v13496_v56 = vrot.slane %v10981_v10, %v14925_v3 }
 0x37e   : > { %7451 = vmatmul.mubr.bf16.gmra.mrb[128].mxu0 %v13152_v55  ;;  %7056 = vmatprep.mubr.bf16.mxu1 %v13208_v62  ;;  %v13508_v24 = vrot.slane %v10981_v10, %v1658_v9 }
 0x37f   : > { %7092 = vmatpush1.bf16.msra.mxu1 %v10581_v53  ;;  %7460 = vmatprep.mubr.bf16.mxu0 %v13208_v62  ;;  %v10611_v53 = vld [vmem:[%s14912_s7 + $0x9d8] ss:$28 sps:$4 sm:$0xff]  }
 0x380   : > { %7496 = vmatpush1.bf16.msra.mxu0 %v10584_v19  ;;  %7093 = vmatprep.subr.bf16.mxu1 %v10589_v23  ;;  %v10614_v19 = vld [vmem:[%s14912_s7 + $0x9e0] ss:$28 sps:$4 sm:$0xff]   ;;  %v13503_v23 = vrot.slane %v10981_v10, %v14923_v36 }
 0x381   : > { %7497 = vmatprep.subr.bf16.mxu0 %v10592_v39  ;;  %v10619_v39 = vld [vmem:[%s14912_s7 + $0xa14] ss:$28 sps:$4 sm:$0xff]  }
 0x383   : > { %7094 = vmatpush1.bf16.msra.mxu1 %v10587_v34  ;;  %v10622_v34 = vld [vmem:[%s14912_s7 + $0xa1c] ss:$28 sps:$4 sm:$0xff]  }
 0x384   : > { %7498 = vmatpush1.bf16.msra.mxu0 %v10590_v59  ;;  %7095 = vmatprep.subr.bf16.mxu1 %v10595_v44 }
 0x385   : > { %7057 = vmatmul.mubr.bf16.gmra.mrb[104].mxu1 %v13195_v45  ;;  %7499 = vmatprep.subr.bf16.mxu0 %v10598_v14 }
 0x386   : > { %7461 = vmatmul.mubr.bf16.gmra.mrb[132].mxu0 %v13195_v45  ;;  %7066 = vmatprep.mubr.bf16.mxu1 %v13437_v33 }
 0x387   : > { %7096 = vmatpush1.bf16.msra.mxu1 %v10593_v32  ;;  %7470 = vmatprep.mubr.bf16.mxu0 %v13437_v33 }
 0x388   : > { %7500 = vmatpush1.bf16.msra.mxu0 %v10596_v42  ;;  %7097 = vmatprep.subr.bf16.mxu1 %v10601_v61 }
 0x389   : > { %7501 = vmatprep.subr.bf16.mxu0 %v10604_v63 }
 0x38b   : > { %7098 = vmatpush1.bf16.msra.mxu1 %v10599_v21  ;;  %v10625_v21 = vld [vmem:[%s14912_s7 + $0xa4c] ss:$28 sps:$4 sm:$0xff]  }
 0x38c   : > { %7502 = vmatpush1.bf16.msra.mxu0 %v10602_v35  ;;  %7099 = vmatprep.subr.bf16.mxu1 %v10607_v2 }
 0x38d   : > { %7067 = vmatmul.mubr.bf16.gmra.mrb[108].mxu1 %v13464_v51  ;;  %7503 = vmatprep.subr.bf16.mxu0 %v10610_v6 }
 0x38e   : > { %7471 = vmatmul.mubr.bf16.gmra.mrb[136].mxu0 %v13464_v51 }
 0x38f   : > { %7100 = vmatpush1.bf16.msra.mxu1 %v10605_v40 }
 0x390   : > { %7504 = vmatpush1.bf16.msra.mxu0 %v10608_v27  ;;  %7101 = vmatprep.subr.bf16.mxu1 %v10613_v37  ;;  %v10628_v37 = vld [vmem:[%s14912_s7 + $0xa54] ss:$28 sps:$4 sm:$0xff]  }
 0x391   : > { %7505 = vmatprep.subr.bf16.mxu0 %v10616_v4 }
 0x392   : > { %v3487_v11 = vpop.f32.mrb[56].mxu1 }
 0x393   : > { %v9682_v59 = vadd.f32 %v3487_v11, %v13489_v22  ;;  %v3689_v44 = vpop.f32.mrb[84].mxu0  ;;  %v3489_v14 = vpop.f32.mrb[57].mxu1  ;;  %7102 = vmatpush1.bf16.msra.mxu1 %v10611_v53 }
 0x394   : > { %v9708_v32 = vadd.f32 %v3689_v44, %v13496_v56  ;;  %v9683_v42 = vadd.f32 %v3489_v14, %v13503_v23  ;;  %v3691_v61 = vpop.f32.mrb[85].mxu0  ;;  %7506 = vmatpush1.bf16.msra.mxu0 %v10614_v19  ;;  %v3491_v63 = vpop.f32.mrb[58].mxu1  ;;  %7103 = vmatprep.subr.bf16.mxu1 %v10619_v39 }
 0x395   : > { %v3760_v35 = vmul.f32 0.2, %v9682_v59  ;;  %v9709_v2 = vadd.f32 %v3691_v61, %v13508_v24  ;;  %v9684_v6 = vadd.f32 %v3491_v63, %v13489_v22  ;;  %v3693_v40 = vpop.f32.mrb[86].mxu0  ;;  %v3493_v27 = vpop.f32.mrb[59].mxu1  ;;  %7507 = vmatprep.subr.bf16.mxu0 %v10622_v34  ;;  %v10623_v34 = vld [vmem:[%s14912_s7 + $0xa48] ss:$28 sps:$4 sm:$0xff]  }
 0x396   : > { %v3762_v4 = vmul.f32 0.2, %v9708_v32  ;;  %v3761_v9 = vmul.f32 0.2, %v9683_v42  ;;  %v9710_v10 = vadd.f32 %v3693_v40, %v13496_v56  ;;  %v9685_v53 = vadd.f32 %v3493_v27, %v13503_v23  ;;  %v3695_v19 = vpop.f32.mrb[87].mxu0 }
 0x397   : > { %v3763_v39 = vmul.f32 0.2, %v9709_v2  ;;  %v3768_v11 = vmul.f32 0.2, %v9684_v6  ;;  %v9711_v44 = vadd.f32 %v3695_v19, %v13508_v24  ;;  %7104 = vmatpush1.bf16.msra.mxu1 %v10617_v29  ;;  %v10626_v63 = vld [vmem:[%s14912_s7 + $0xa50] ss:$28 sps:$4 sm:$0xff]   ;;  %v3864_v40 = vmax.f32 %v9682_v59, %v3760_v35 }
 0x398   : > { %v3770_v14 = vmul.f32 0.2, %v9710_v10  ;;  %v3769_v61 = vmul.f32 0.2, %v9685_v53  ;;  %7508 = vmatpush1.bf16.msra.mxu0 %v10620_v5  ;;  %7105 = vmatprep.subr.bf16.mxu1 %v10625_v21  ;;  %v10631_v29 = vld [vmem:[%s14912_s7 + $0xa84] ss:$28 sps:$4 sm:$0xff]   ;;  %v3866_v13 = vmax.f32 %v9708_v32, %v3762_v4  ;;  %v3865_v3 = vmax.f32 %v9683_v42, %v3761_v9 }
 0x399   : > { %v3872_v27 = vmax.f32 %v9684_v6, %v3768_v11  ;;  %v3771_v36 = vmul.f32 0.2, %v9711_v44  ;;  %7509 = vmatprep.subr.bf16.mxu0 %v10628_v37  ;;  %v10634_v19 = vld [vmem:[%s14912_s7 + $0xa8c] ss:$28 sps:$4 sm:$0xff]   ;;  %v3867_v26 = vmax.f32 %v9709_v2, %v3763_v39  ;;  %v10629_v11 = vld [vmem:[%s14912_s7 + $0xa80] ss:$28 sps:$4 sm:$0xff]  }
 0x39a   : > { %v3874_v5 = vmax.f32 %v9710_v10, %v3770_v14  ;;  %v3873_v21 = vmax.f32 %v9685_v53, %v3769_v61  ;;  %v3497_v38 = vpop.f32.mrb[60].mxu1  ;;  %v10637_v9 = vld [vmem:[%s14912_s7 + $0xabc] ss:$28 sps:$4 sm:$0xff]  }
 0x39b   : > { %v13545_v25 = vpack.c.bf16 %v3872_v27, %v3864_v40  ;;  %v3875_v59 = vmax.f32 %v9711_v44, %v3771_v36  ;;  %v9686_v35 = vadd.f32 %v3497_v38, %v13489_v22  ;;  %v3699_v6 = vpop.f32.mrb[88].mxu0  ;;  %v3499_v37 = vpop.f32.mrb[61].mxu1  ;;  %7106 = vmatpush1.bf16.msra.mxu1 %v10623_v34  ;;  %v10632_v38 = vld [vmem:[%s14912_s7 + $0xa88] ss:$28 sps:$4 sm:$0xff]  }
 0x39c   : > { %v13551_v49 = vpack.c.bf16 %v3874_v5, %v3866_v13  ;;  %v13553_v32 = vpack.c.bf16 %v3873_v21, %v3865_v3  ;;  %v9712_v42 = vadd.f32 %v3699_v6, %v13496_v56  ;;  %v9687_v2 = vadd.f32 %v3499_v37, %v13503_v23  ;;  %v3701_v4 = vpop.f32.mrb[89].mxu0  ;;  %7510 = vmatpush1.bf16.msra.mxu0 %v10626_v63  ;;  %v3501_v36 = vpop.f32.mrb[62].mxu1  ;;  %v10640_v34 = vld [vmem:[%s14912_s7 + $0xac4] ss:$28 sps:$4 sm:$0xff]  }
 0x39d   : > { %15021 = vst [vmem:[#allocation19_spill] sm:$0xff] %v13545_v25  ;;  %v13563_v10 = vpack.c.bf16 %v3875_v59, %v3867_v26  ;;  %v3776_v13 = vmul.f32 0.2, %v9686_v35  ;;  %v9713_v3 = vadd.f32 %v3701_v4, %v13508_v24  ;;  %v9688_v53 = vadd.f32 %v3501_v36, %v13489_v22  ;;  %v3703_v39 = vpop.f32.mrb[90].mxu0  ;;  %v3503_v44 = vpop.f32.mrb[63].mxu1  ;;  %7176 = vmatprep.subr.bf16.mxu1 %v10631_v29 }
 0x39e   : > { %15022 = vst [vmem:[#allocation20_spill] sm:$0xff] %v13553_v32  ;;  %7580 = vmatprep.subr.bf16.mxu0 %v10634_v19  ;;  %v3778_v14 = vmul.f32 0.2, %v9712_v42  ;;  %v3777_v61 = vmul.f32 0.2, %v9687_v2  ;;  %v9714_v63 = vadd.f32 %v3703_v39, %v13496_v56  ;;  %v9689_v26 = vadd.f32 %v3503_v44, %v13503_v23  ;;  %v3705_v40 = vpop.f32.mrb[91].mxu0  ;;  %7107 = vmatprep.mubr.bf16.mxu1 %v13553_v32 }
 0x39f   : > { %7511 = vmatprep.mubr.bf16.mxu0 %v13553_v32  ;;  %v3779_v27 = vmul.f32 0.2, %v9713_v3  ;;  %v3784_v5 = vmul.f32 0.2, %v9688_v53  ;;  %v9715_v29 = vadd.f32 %v3705_v40, %v13508_v24  ;;  %7108 = vmatmul.mubr.bf16.vlgmr.msra.gmra.mrb[84].mxu1 %v13545_v25  ;;  %v10635_v59 = vld [vmem:[%s14912_s7 + $0xab8] ss:$28 sps:$4 sm:$0xff]   ;;  %v3880_v6 = vmax.f32 %v9686_v35, %v3776_v13 }
 0x3a0   : > { %7512 = vmatmul.mubr.bf16.vlgmr.msra.gmra.mrb[112].mxu0 %v13545_v25  ;;  %v3786_v19 = vmul.f32 0.2, %v9714_v63  ;;  %v3785_v21 = vmul.f32 0.2, %v9689_v26  ;;  %7177 = vmatpush1.bf16.msra.mxu1 %v10629_v11  ;;  %v10638_v36 = vld [vmem:[%s14912_s7 + $0xac0] ss:$28 sps:$4 sm:$0xff]   ;;  %v3882_v44 = vmax.f32 %v9712_v42, %v3778_v14  ;;  %v3881_v11 = vmax.f32 %v9687_v2, %v3777_v61 }
 0x3a1   : > { %7581 = vmatpush1.bf16.msra.mxu0 %v10632_v38  ;;  %v3888_v37 = vmax.f32 %v9688_v53, %v3784_v5  ;;  %v3787_v4 = vmul.f32 0.2, %v9715_v29  ;;  %7178 = vmatprep.subr.bf16.mxu1 %v10637_v9  ;;  %v10643_v39 = vld [vmem:[%s14912_s7 + $0xaf4] ss:$28 sps:$4 sm:$0xff]   ;;  %v3883_v25 = vmax.f32 %v9713_v3, %v3779_v27  ;;  %v10646_v42 = vld [vmem:[%s14912_s7 + $0xafc] ss:$28 sps:$4 sm:$0xff]  }
 0x3a2   : > { %7582 = vmatprep.subr.bf16.mxu0 %v10640_v34  ;;  %v3890_v38 = vmax.f32 %v9714_v63, %v3786_v19  ;;  %v3889_v40 = vmax.f32 %v9689_v26, %v3785_v21  ;;  %v3507_v48 = vpop.f32.mrb[64].mxu1  ;;  %v10641_v34 = vld [vmem:[%s14912_s7 + $0xaf0] ss:$28 sps:$4 sm:$0xff]   ;;  %v10644_v26 = vld [vmem:[%s14912_s7 + $0xaf8] ss:$28 sps:$4 sm:$0xff]  }
 0x3a3   : > { %v13586_v32 = vpack.c.bf16 %v3888_v37, %v3880_v6  ;;  %v3891_v35 = vmax.f32 %v9715_v29, %v3787_v4  ;;  %v9690_v9 = vadd.f32 %v3507_v48, %v13489_v22  ;;  %v3709_v13 = vpop.f32.mrb[92].mxu0  ;;  %v3509_v53 = vpop.f32.mrb[65].mxu1  ;;  %v10649_v27 = vld [vmem:[%s14912_s7 + $0xb2c] ss:$28 sps:$4 sm:$0xff]  }
 0x3a4   : > { %v13595_v2 = vpack.c.bf16 %v3890_v38, %v3882_v44  ;;  %v13597_v14 = vpack.c.bf16 %v3889_v40, %v3881_v11  ;;  %v9716_v3 = vadd.f32 %v3709_v13, %v13496_v56  ;;  %v9691_v61 = vadd.f32 %v3509_v53, %v13503_v23  ;;  %v3711_v63 = vpop.f32.mrb[93].mxu0  ;;  %7179 = vmatpush1.bf16.msra.mxu1 %v10635_v59  ;;  %v3511_v48 = vpop.f32.mrb[66].mxu1  ;;  %v10652_v59 = vld [vmem:[%s14912_s7 + $0xb34] ss:$28 sps:$4 sm:$0xff]   ;;  %v10647_v53 = vld [vmem:[%s14912_s7 + $0xb28] ss:$28 sps:$4 sm:$0xff]  }
 0x3a5   : > { %15023 = vst [vmem:[#allocation21_spill] sm:$0xff] %v13586_v32  ;;  %v13607_v5 = vpack.c.bf16 %v3891_v35, %v3883_v25  ;;  %v3792_v29 = vmul.f32 0.2, %v9690_v9  ;;  %v9717_v19 = vadd.f32 %v3711_v63, %v13508_v24  ;;  %7583 = vmatpush1.bf16.msra.mxu0 %v10638_v36  ;;  %v9692_v21 = vadd.f32 %v3511_v48, %v13489_v22  ;;  %v3713_v6 = vpop.f32.mrb[94].mxu0  ;;  %v3513_v37 = vpop.f32.mrb[67].mxu1 }
 0x3a6   : > { %15024 = vst [vmem:[#allocation22_spill] sm:$0xff] %v13597_v14  ;;  %7180 = vmatprep.subr.bf16.mxu1 %v10643_v39  ;;  %v3794_v4 = vmul.f32 0.2, %v9716_v3  ;;  %v3793_v44 = vmul.f32 0.2, %v9691_v61  ;;  %v9718_v11 = vadd.f32 %v3713_v6, %v13496_v56  ;;  %v9693_v25 = vadd.f32 %v3513_v37, %v13503_v23  ;;  %v3715_v38 = vpop.f32.mrb[95].mxu0  ;;  %7117 = vmatprep.mubr.bf16.mxu1 %v13597_v14 }
 0x3a7   : > { %7521 = vmatprep.mubr.bf16.mxu0 %v13597_v14  ;;  %v3795_v36 = vmul.f32 0.2, %v9717_v19  ;;  %v3800_v40 = vmul.f32 0.2, %v9692_v21  ;;  %v9719_v35 = vadd.f32 %v3715_v38, %v13508_v24  ;;  %7584 = vmatprep.subr.bf16.mxu0 %v10646_v42  ;;  %v3896_v63 = vmax.f32 %v9690_v9, %v3792_v29  ;;  %v10650_v42 = vld [vmem:[%s14912_s7 + $0xb30] ss:$28 sps:$4 sm:$0xff]  }
 0x3a8   : > { %7118 = vmatmul.mubr.bf16.gmra.mrb[88].mxu1 %v13586_v32  ;;  %v3802_v39 = vmul.f32 0.2, %v9718_v11  ;;  %v3801_v13 = vmul.f32 0.2, %v9693_v25  ;;  %7522 = vmatmul.mubr.bf16.gmra.mrb[116].mxu0 %v13586_v32  ;;  %v10655_v37 = vld [vmem:[%s14912_s7 + $0xb64] ss:$28 sps:$4 sm:$0xff]   ;;  %v3897_v38 = vmax.f32 %v9691_v61, %v3793_v44 }
 0x3a9   : > { %7181 = vmatpush1.bf16.msra.mxu1 %v10641_v34  ;;  %v3904_v48 = vmax.f32 %v9692_v21, %v3800_v40  ;;  %v3803_v6 = vmul.f32 0.2, %v9719_v35  ;;  %7585 = vmatpush1.bf16.msra.mxu0 %v10644_v26  ;;  %v3898_v34 = vmax.f32 %v9716_v3, %v3794_v4  ;;  %v3899_v33 = vmax.f32 %v9717_v19, %v3795_v36  ;;  %v10653_v40 = vld [vmem:[%s14912_s7 + $0xb60] ss:$28 sps:$4 sm:$0xff]   ;;  %v10658_v3 = vld [vmem:[%s14912_s7 + $0xb6c] ss:$28 sps:$4 sm:$0xff]  }
 0x3aa   : > { %7182 = vmatprep.subr.bf16.mxu1 %v10649_v27  ;;  %v3906_v32 = vmax.f32 %v9718_v11, %v3802_v39  ;;  %v3905_v14 = vmax.f32 %v9693_v25, %v3801_v13  ;;  %v3517_v51 = vpop.f32.mrb[68].mxu1  ;;  %7586 = vmatprep.subr.bf16.mxu0 %v10652_v59  ;;  %v10656_v11 = vld [vmem:[%s14912_s7 + $0xb68] ss:$28 sps:$4 sm:$0xff]   ;;  %v10661_v25 = vld [vmem:[%s14912_s7 + $0xb9c] ss:$28 sps:$4 sm:$0xff]  }
 0x3ab   : > { %v13630_v9 = vpack.c.bf16 %v3904_v48, %v3896_v63  ;;  %v3907_v29 = vmax.f32 %v9719_v35, %v3803_v6  ;;  %v9694_v26 = vadd.f32 %v3517_v51, %v13489_v22  ;;  %v3719_v27 = vpop.f32.mrb[96].mxu0  ;;  %v3519_v21 = vpop.f32.mrb[69].mxu1 }
 0x3ac   : > { %v13639_v61 = vpack.c.bf16 %v3906_v32, %v3898_v34  ;;  %v13641_v4 = vpack.c.bf16 %v3905_v14, %v3897_v38  ;;  %v9720_v19 = vadd.f32 %v3719_v27, %v13496_v56  ;;  %v9695_v59 = vadd.f32 %v3519_v21, %v13503_v23  ;;  %v3721_v44 = vpop.f32.mrb[97].mxu0  ;;  %v3521_v51 = vpop.f32.mrb[70].mxu1  ;;  %v10659_v21 = vld [vmem:[%s14912_s7 + $0xb98] ss:$28 sps:$4 sm:$0xff]  }
 0x3ad   : > { %15025 = vst [vmem:[#allocation23_spill] sm:$0xff] %v13630_v9  ;;  %7183 = vmatpush1.bf16.msra.mxu1 %v10647_v53  ;;  %v13651_v36 = vpack.c.bf16 %v3907_v29, %v3899_v33  ;;  %v3808_v32 = vmul.f32 0.2, %v9694_v26  ;;  %v9721_v14 = vadd.f32 %v3721_v44, %v13508_v24  ;;  %7587 = vmatpush1.bf16.msra.mxu0 %v10650_v42  ;;  %v3723_v39 = vpop.f32.mrb[98].mxu0  ;;  %v3523_v13 = vpop.f32.mrb[71].mxu1 }
 0x3ae   : > { %15026 = vst [vmem:[#allocation24_spill] sm:$0xff] %v13641_v4  ;;  %v9696_v35 = vadd.f32 %v3521_v51, %v13489_v22  ;;  %7184 = vmatprep.subr.bf16.mxu1 %v10655_v37  ;;  %v10664_v53 = vld [vmem:[%s14912_s7 + $0xba4] ss:$28 sps:$4 sm:$0xff]   ;;  %v3810_v63 = vmul.f32 0.2, %v9720_v19  ;;  %v9722_v6 = vadd.f32 %v3723_v39, %v13496_v56  ;;  %v9697_v33 = vadd.f32 %v3523_v13, %v13503_v23  ;;  %v3725_v34 = vpop.f32.mrb[99].mxu0 }
 0x3af   : > { %v3809_v48 = vmul.f32 0.2, %v9695_v59  ;;  %7127 = vmatprep.mubr.bf16.mxu1 %v13641_v4  ;;  %7531 = vmatprep.mubr.bf16.mxu0 %v13641_v4  ;;  %v3811_v42 = vmul.f32 0.2, %v9721_v14  ;;  %v9723_v29 = vadd.f32 %v3725_v34, %v13508_v24  ;;  %v3912_v44 = vmax.f32 %v9694_v26, %v3808_v32  ;;  %v10667_v13 = vld [vmem:[%s14912_s7 + $0xbd4] ss:$28 sps:$4 sm:$0xff]  }
 0x3b0   : > { %v3816_v38 = vmul.f32 0.2, %v9696_v35  ;;  %7588 = vmatprep.subr.bf16.mxu0 %v10658_v3  ;;  %7128 = vmatmul.mubr.bf16.gmra.mrb[92].mxu1 %v13630_v9  ;;  %v3818_v37 = vmul.f32 0.2, %v9722_v6  ;;  %v3817_v27 = vmul.f32 0.2, %v9697_v33 }
 0x3b1   : > { %7185 = vmatpush1.bf16.msra.mxu1 %v10653_v40  ;;  %7532 = vmatmul.mubr.bf16.gmra.mrb[120].mxu0 %v13630_v9  ;;  %v3819_v39 = vmul.f32 0.2, %v9723_v29  ;;  %v10662_v3 = vld [vmem:[%s14912_s7 + $0xba0] ss:$28 sps:$4 sm:$0xff]   ;;  %v3914_v40 = vmax.f32 %v9720_v19, %v3810_v63  ;;  %v3913_v34 = vmax.f32 %v9695_v59, %v3809_v48  ;;  %v3915_v62 = vmax.f32 %v9721_v14, %v3811_v42 }
 0x3b2   : > { %v3920_v51 = vmax.f32 %v9696_v35, %v3816_v38  ;;  %7589 = vmatpush1.bf16.msra.mxu0 %v10656_v11  ;;  %7186 = vmatprep.subr.bf16.mxu1 %v10661_v25  ;;  %v3922_v9 = vmax.f32 %v9722_v6, %v3818_v37  ;;  %v3921_v4 = vmax.f32 %v9697_v33, %v3817_v27  ;;  %v3527_v45 = vpop.f32.mrb[72].mxu1  ;;  %v10665_v38 = vld [vmem:[%s14912_s7 + $0xbd0] ss:$28 sps:$4 sm:$0xff]   ;;  %v10670_v19 = vld [vmem:[%s14912_s7 + $0xbdc] ss:$28 sps:$4 sm:$0xff]  }
 0x3b3   : > { %7590 = vmatprep.subr.bf16.mxu0 %v10664_v53  ;;  %v3923_v32 = vmax.f32 %v9723_v29, %v3819_v39  ;;  %v9698_v11 = vadd.f32 %v3527_v45, %v13489_v22  ;;  %v3729_v25 = vpop.f32.mrb[100].mxu0  ;;  %v3529_v35 = vpop.f32.mrb[73].mxu1  ;;  %v10668_v6 = vld [vmem:[%s14912_s7 + $0xbd8] ss:$28 sps:$4 sm:$0xff]   ;;  %v10673_v33 = vld [vmem:[%s14912_s7 + $0xc0c] ss:$28 sps:$4 sm:$0xff]  }
 0x3b4   : > { %v13674_v26 = vpack.c.bf16 %v3920_v51, %v3912_v44  ;;  %v13683_v59 = vpack.c.bf16 %v3922_v9, %v3914_v40  ;;  %v13685_v63 = vpack.c.bf16 %v3921_v4, %v3913_v34  ;;  %v9724_v14 = vadd.f32 %v3729_v25, %v13496_v56  ;;  %v3731_v48 = vpop.f32.mrb[101].mxu0  ;;  %v3531_v45 = vpop.f32.mrb[74].mxu1 }
 0x3b5   : > { %v9699_v53 = vadd.f32 %v3529_v35, %v13503_v23  ;;  %7187 = vmatpush1.bf16.msra.mxu1 %v10659_v21  ;;  %v13695_v42 = vpack.c.bf16 %v3923_v32, %v3915_v62  ;;  %v3824_v9 = vmul.f32 0.2, %v9698_v11  ;;  %v9725_v4 = vadd.f32 %v3731_v48, %v13508_v24  ;;  %v3733_v37 = vpop.f32.mrb[102].mxu0  ;;  %v3533_v27 = vpop.f32.mrb[75].mxu1  ;;  %v10676_v21 = vld [vmem:[%s14912_s7 + $0xc14] ss:$28 sps:$4 sm:$0xff]  }
 0x3b6   : > { %15027 = vst [vmem:[#allocation25_spill] sm:$0xff] %v13674_v26  ;;  %15028 = vst [vmem:[#allocation26_spill] sm:$0xff] %v13685_v63  ;;  %7591 = vmatpush1.bf16.msra.mxu0 %v10662_v3  ;;  %v9700_v29 = vadd.f32 %v3531_v45, %v13489_v22  ;;  %7188 = vmatprep.subr.bf16.mxu1 %v10667_v13  ;;  %v3826_v44 = vmul.f32 0.2, %v9724_v14  ;;  %v9726_v39 = vadd.f32 %v3733_v37, %v13496_v56  ;;  %v3735_v40 = vpop.f32.mrb[103].mxu0 }
 0x3b7   : > { %v3825_v51 = vmul.f32 0.2, %v9699_v53  ;;  %v9701_v62 = vadd.f32 %v3533_v27, %v13503_v23  ;;  %7137 = vmatprep.mubr.bf16.mxu1 %v13685_v63  ;;  %7541 = vmatprep.mubr.bf16.mxu0 %v13685_v63  ;;  %v3827_v3 = vmul.f32 0.2, %v9725_v4  ;;  %v9727_v32 = vadd.f32 %v3735_v40, %v13508_v24  ;;  %v10671_v35 = vld [vmem:[%s14912_s7 + $0xc08] ss:$28 sps:$4 sm:$0xff]  }
 0x3b8   : > { %v3832_v34 = vmul.f32 0.2, %v9700_v29  ;;  %7592 = vmatprep.subr.bf16.mxu0 %v10670_v19  ;;  %7138 = vmatmul.mubr.bf16.gmra.mrb[96].mxu1 %v13674_v26  ;;  %v3834_v13 = vmul.f32 0.2, %v9726_v39  ;;  %v3928_v48 = vmax.f32 %v9698_v11, %v3824_v9  ;;  %v10674_v19 = vld [vmem:[%s14912_s7 + $0xc10] ss:$28 sps:$4 sm:$0xff]  }
 0x3b9   : > { %v3833_v25 = vmul.f32 0.2, %v9701_v62  ;;  %7189 = vmatpush1.bf16.msra.mxu1 %v10665_v38  ;;  %7542 = vmatmul.mubr.bf16.gmra.mrb[124].mxu0 %v13674_v26  ;;  %v3835_v37 = vmul.f32 0.2, %v9727_v32  ;;  %v10679_v27 = vld [vmem:[%s14912_s7 + $0xc44] ss:$28 sps:$4 sm:$0xff]   ;;  %v3930_v38 = vmax.f32 %v9724_v14, %v3826_v44  ;;  %v3929_v40 = vmax.f32 %v9699_v53, %v3825_v51 }
 0x3ba   : > { %v3936_v45 = vmax.f32 %v9700_v29, %v3832_v34  ;;  %7593 = vmatpush1.bf16.msra.mxu0 %v10668_v6  ;;  %7190 = vmatprep.subr.bf16.mxu1 %v10673_v33  ;;  %v3938_v26 = vmax.f32 %v9726_v39, %v3834_v13  ;;  %v3537_v55 = vpop.f32.mrb[76].mxu1  ;;  %v3931_v47 = vmax.f32 %v9725_v4, %v3827_v3  ;;  %v10677_v34 = vld [vmem:[%s14912_s7 + $0xc40] ss:$28 sps:$4 sm:$0xff]   ;;  %v10682_v14 = vld [vmem:[%s14912_s7 + $0xc4c] ss:$28 sps:$4 sm:$0xff]  }
 0x3bb   : > { %v3937_v63 = vmax.f32 %v9701_v62, %v3833_v25  ;;  %7594 = vmatprep.subr.bf16.mxu0 %v10676_v21  ;;  %v3939_v9 = vmax.f32 %v9727_v32, %v3835_v37  ;;  %v9702_v6 = vadd.f32 %v3537_v55, %v13489_v22  ;;  %v3739_v33 = vpop.f32.mrb[104].mxu0  ;;  %v3539_v29 = vpop.f32.mrb[77].mxu1  ;;  %v10680_v39 = vld [vmem:[%s14912_s7 + $0xc48] ss:$28 sps:$4 sm:$0xff]   ;;  %v10685_v62 = vld [vmem:[%s14912_s7 + $0xc7c] ss:$28 sps:$4 sm:$0xff]  }
 0x3bc   : > { %v13718_v11 = vpack.c.bf16 %v3936_v45, %v3928_v48  ;;  %v13727_v53 = vpack.c.bf16 %v3938_v26, %v3930_v38  ;;  %v9728_v4 = vadd.f32 %v3739_v33, %v13496_v56  ;;  %v9703_v21 = vadd.f32 %v3539_v29, %v13503_v23  ;;  %v3741_v51 = vpop.f32.mrb[105].mxu0  ;;  %v3541_v55 = vpop.f32.mrb[78].mxu1  ;;  %v10683_v29 = vld [vmem:[%s14912_s7 + $0xc78] ss:$28 sps:$4 sm:$0xff]  }
 0x3bd   : > { %v13729_v44 = vpack.c.bf16 %v3937_v63, %v3929_v40  ;;  %7191 = vmatpush1.bf16.msra.mxu1 %v10671_v35  ;;  %v13739_v3 = vpack.c.bf16 %v3939_v9, %v3931_v47  ;;  %v3840_v26 = vmul.f32 0.2, %v9702_v6  ;;  %v9729_v63 = vadd.f32 %v3741_v51, %v13508_v24  ;;  %v3743_v13 = vpop.f32.mrb[106].mxu0  ;;  %v3543_v25 = vpop.f32.mrb[79].mxu1  ;;  %v10688_v35 = vld [vmem:[%s14912_s7 + $0xc84] ss:$28 sps:$4 sm:$0xff]  }
 0x3be   : > { %15029 = vst [vmem:[#allocation27_spill] sm:$0xff] %v13718_v11  ;;  %7595 = vmatpush1.bf16.msra.mxu0 %v10674_v19  ;;  %v9704_v32 = vadd.f32 %v3541_v55, %v13489_v22  ;;  %7192 = vmatprep.subr.bf16.mxu1 %v10679_v27  ;;  %v3842_v48 = vmul.f32 0.2, %v9728_v4  ;;  %v3841_v45 = vmul.f32 0.2, %v9703_v21  ;;  %v9730_v37 = vadd.f32 %v3743_v13, %v13496_v56  ;;  %v3745_v38 = vpop.f32.mrb[107].mxu0 }
 0x3bf   : > { %15030 = vst [vmem:[#allocation28_spill] sm:$0xff] %v13729_v44  ;;  %v9705_v47 = vadd.f32 %v3543_v25, %v13503_v23  ;;  %7147 = vmatprep.mubr.bf16.mxu1 %v13729_v44  ;;  %7551 = vmatprep.mubr.bf16.mxu0 %v13729_v44  ;;  %v3843_v19 = vmul.f32 0.2, %v9729_v63  ;;  %v9731_v9 = vadd.f32 %v3745_v38, %v13508_v24  ;;  %v10691_v25 = vld [vmem:[%s14912_s7 + $0xcb4] ss:$28 sps:$4 sm:$0xff]  }
 0x3c0   : > { %v3848_v40 = vmul.f32 0.2, %v9704_v32  ;;  %7596 = vmatprep.subr.bf16.mxu0 %v10682_v14  ;;  %7148 = vmatmul.mubr.bf16.gmra.mrb[100].mxu1 %v13718_v11  ;;  %v3850_v27 = vmul.f32 0.2, %v9730_v37  ;;  %v3944_v51 = vmax.f32 %v9702_v6, %v3840_v26  ;;  %v10686_v14 = vld [vmem:[%s14912_s7 + $0xc80] ss:$28 sps:$4 sm:$0xff]   ;;  %v3945_v38 = vmax.f32 %v9703_v21, %v3841_v45 }
 0x3c1   : > { %v3849_v33 = vmul.f32 0.2, %v9705_v47  ;;  %7193 = vmatpush1.bf16.msra.mxu1 %v10677_v34  ;;  %7552 = vmatmul.mubr.bf16.gmra.mrb[128].mxu0 %v13718_v11  ;;  %v3851_v13 = vmul.f32 0.2, %v9731_v9  ;;  %v3946_v34 = vmax.f32 %v9728_v4, %v3842_v48  ;;  %v3947_v7 = vmax.f32 %v9729_v63, %v3843_v19 }
 0x3c2   : > { %v3952_v55 = vmax.f32 %v9704_v32, %v3848_v40  ;;  %7597 = vmatpush1.bf16.msra.mxu0 %v10680_v39  ;;  %7194 = vmatprep.subr.bf16.mxu1 %v10685_v62  ;;  %v3954_v11 = vmax.f32 %v9730_v37, %v3850_v27  ;;  %v3547_v52 = vpop.f32.mrb[80].mxu1  ;;  %v10694_v40 = vld [vmem:[%s14912_s7 + $0xcbc] ss:$28 sps:$4 sm:$0xff]  }
 0x3c3   : > { %v3953_v44 = vmax.f32 %v9705_v47, %v3849_v33  ;;  %7598 = vmatprep.subr.bf16.mxu0 %v10688_v35  ;;  %v3955_v26 = vmax.f32 %v9731_v9, %v3851_v13  ;;  %v9706_v39 = vadd.f32 %v3547_v52, %v13489_v22  ;;  %v13765_v62 = vpop.f32.mrb[108].mxu0  ;;  %v3549_v32 = vpop.f32.mrb[81].mxu1  ;;  %v10689_v52 = vld [vmem:[%s14912_s7 + $0xcb0] ss:$28 sps:$4 sm:$0xff]   ;;  %v10692_v22 = vld [vmem:[%s14912_s7 + $0xcb8] ss:$28 sps:$4 sm:$0xff]  }
 0x3c4   : > { %v13762_v6 = vpack.c.bf16 %v3952_v55, %v3944_v51  ;;  %v13770_v54 = vpack.c.bf16 %v3954_v11, %v3946_v34  ;;  %v9707_v21 = vadd.f32 %v3549_v32, %v13503_v23  ;;  %v13775_v35 = vpop.f32.mrb[109].mxu0  ;;  %v3551_v63 = vpop.f32.mrb[82].mxu1  ;;  %v10697_v23 = vld [vmem:[%s14912_s7 + $0xcec] ss:$28 sps:$4 sm:$0xff]   ;;  %v10703_v51 = vld [vmem:[%s14912_s7 + $0xd24] ss:$28 sps:$4 sm:$0xff]  }
 0x3c5   : > { %v13772_v4 = vpack.c.bf16 %v3953_v44, %v3945_v38  ;;  %7195 = vmatpush1.bf16.msra.mxu1 %v10683_v29  ;;  %v13783_v48 = vpack.c.bf16 %v3955_v26, %v3947_v7  ;;  %v3856_v11 = vmul.f32 0.2, %v9706_v39  ;;  %v3753_v44 = vpop.f32.mrb[110].mxu0  ;;  %v3552_v45 = vpop.f32.mrb[83].mxu1  ;;  %v10700_v7 = vld [vmem:[%s14912_s7 + $0xcf4] ss:$28 sps:$4 sm:$0xff]  }
 0x3c6   : > { %7599 = vmatpush1.bf16.msra.mxu0 %v10686_v14  ;;  %7196 = vmatprep.subr.bf16.mxu1 %v10691_v25  ;;  %v3857_v37 = vmul.f32 0.2, %v9707_v21  ;;  %v3754_v47 = vpop.f32.mrb[111].mxu0  ;;  %v10695_v9 = vld [vmem:[%s14912_s7 + $0xce8] ss:$28 sps:$4 sm:$0xff]  }
 0x3c7   : > { %7157 = vmatprep.mubr.bf16.mxu1 %v13772_v4  ;;  %7561 = vmatprep.mubr.bf16.mxu0 %v13772_v4  ;;  %v3960_v27 = vmax.f32 %v9706_v39, %v3856_v11  ;;  %v10698_v33 = vld [vmem:[%s14912_s7 + $0xcf0] ss:$28 sps:$4 sm:$0xff]   ;;  %v10701_v13 = vld [vmem:[%s14912_s7 + $0xd20] ss:$28 sps:$4 sm:$0xff]   ;;  %v10704_v25 = vld [vmem:[%s14912_s7 + $0xd28] ss:$28 sps:$4 sm:$0xff]  }
 0x3c8   : > { %7600 = vmatprep.subr.bf16.mxu0 %v10694_v40  ;;  %7158 = vmatmul.mubr.bf16.gmra.mrb[104].mxu1 %v13762_v6  ;;  %v3961_v19 = vmax.f32 %v9707_v21, %v3857_v37  ;;  %v10706_v55 = vld [vmem:[%s14912_s7 + $0xd2c] ss:$28 sps:$4 sm:$0xff]   ;;  %v10709_v34 = vld [vmem:[%s14912_s7 + $0xd5c] ss:$28 sps:$4 sm:$0xff]   ;;  %v10712_v38 = vld [vmem:[%s14912_s7 + $0xd64] ss:$28 sps:$4 sm:$0xff]  }
 0x3c9   : > { %7197 = vmatpush1.bf16.msra.mxu1 %v10689_v52  ;;  %7562 = vmatmul.mubr.bf16.gmra.mrb[132].mxu0 %v13762_v6  ;;  %v13813_v14 = vpack.c.bf16 %v3960_v27, %v3960_v27  ;;  %v10707_v26 = vld [vmem:[%s14912_s7 + $0xd58] ss:$28 sps:$4 sm:$0xff]   ;;  %v10710_v39 = vld [vmem:[%s14912_s7 + $0xd60] ss:$28 sps:$4 sm:$0xff]   ;;  %v10713_v21 = vld [vmem:[%s14912_s7 + $0xd90] ss:$28 sps:$4 sm:$0xff]  }
 0x3ca   : > { %7601 = vmatpush1.bf16.msra.mxu0 %v10692_v22  ;;  %7198 = vmatprep.subr.bf16.mxu1 %v10697_v23  ;;  %v13801_v29 = vpack.c.bf16 %v3961_v19, %v3961_v19  ;;  %v10715_v32 = vld [vmem:[%s14912_s7 + $0xd94] ss:$28 sps:$4 sm:$0xff]   ;;  %v10718_v40 = vld [vmem:[%s14912_s7 + $0xd9c] ss:$28 sps:$4 sm:$0xff]   ;;  %v10721_v52 = vld [vmem:[%s14912_s7 + $0xdcc] ss:$28 sps:$4 sm:$0xff]  }
 0x3cb   : > { %7602 = vmatprep.subr.bf16.mxu0 %v10700_v7  ;;  %v10716_v63 = vld [vmem:[%s14912_s7 + $0xd98] ss:$28 sps:$4 sm:$0xff]   ;;  %v10719_v11 = vld [vmem:[%s14912_s7 + $0xdc8] ss:$28 sps:$4 sm:$0xff]   ;;  %v10722_v44 = vld [vmem:[%s14912_s7 + $0xdd0] ss:$28 sps:$4 sm:$0xff]  }
 0x3cc   : > { %7167 = vmatprep.mubr.bf16.mxu1 %v13801_v29  ;;  %7571 = vmatprep.mubr.bf16.mxu0 %v13801_v29  ;;  %v10724_v22 = vld [vmem:[%s14912_s7 + $0xdd4] ss:$28 sps:$4 sm:$0xff]   ;;  %v10730_v47 = vld [vmem:[%s14912_s7 + $0x4c] ss:$28 sps:$4 sm:$0xff]   ;;  %v10733_v27 = vld [vmem:[%s14912_s7 + $0x84] ss:$28 sps:$4 sm:$0xff]  }
 0x3cd   : > { %7199 = vmatpush1.bf16.msra.mxu1 %v10695_v9  ;;  %v10727_v45 = vld [vmem:[%s14912_s7 + $0x14] ss:$28 sps:$4 sm:$0xff]   ;;  %v10728_v9 = vld [vmem:[%s14912_s7 + $0x48] ss:$28 sps:$4 sm:$0xff]  }
 0x3ce   : > { %7603 = vmatpush1.bf16.msra.mxu0 %v10698_v33  ;;  %7200 = vmatprep.subr.bf16.mxu1 %v10703_v51  ;;  %v10746_v23 = vld [vmem:[%s14912_s7 + $0x1d8] ss:$28 sps:$4 sm:$0xff]   ;;  %v10725_v37 = vld [vmem:[%s14912_s7 + $0x10] ss:$28 sps:$4 sm:$0xff]   ;;  %v10756_v51 = vld [vmem:[%s14912_s7 + $0x248] ss:$28 sps:$4 sm:$0xff]  }
 0x3cf   : > { %7604 = vmatprep.subr.bf16.mxu0 %v10706_v55  ;;  %v10747_v7 = vld [vmem:[%s14912_s7 + $0x18] ss:$28 sps:$4 sm:$0xff]   ;;  %v10751_v19 = vld [vmem:[%s14912_s7 + $0x210] ss:$28 sps:$4 sm:$0xff]   ;;  %v10731_v55 = vld [vmem:[%s14912_s7 + $0x80] ss:$28 sps:$4 sm:$0xff]  }
 0x3d0   : > { %7168 = vmatmul.mubr.bf16.gmra.mrb[108].mxu1 %v13813_v14  ;;  %v10752_v33 = vld [vmem:[%s14912_s7 + $0x50] ss:$28 sps:$4 sm:$0xff]  }
 0x3d1   : > { %7201 = vmatpush1.bf16.msra.mxu1 %v10701_v13  ;;  %7572 = vmatmul.mubr.bf16.gmra.mrb[136].mxu0 %v13813_v14  ;;  %v10736_v13 = vld [vmem:[%s14912_s7 + $0xbc] ss:$28 sps:$4 sm:$0xff]  }
 0x3d2   : > { %7605 = vmatpush1.bf16.msra.mxu0 %v10704_v25  ;;  %7208 = vmatprep.mubr.bf16.mxu1 %v13563_v10  ;;  %v10757_v25 = vld [vmem:[%s14912_s7 + $0x88] ss:$28 sps:$4 sm:$0xff]  }
 0x3d3   : > { %7612 = vmatprep.mubr.bf16.mxu0 %v13563_v10  ;;  %7202 = vmatprep.subr.bf16.mxu1 %v10709_v34  ;;  %v10761_v34 = vld [vmem:[%s14912_s7 + $0x280] ss:$28 sps:$4 sm:$0xff]  }
 0x3d4   : > { %7606 = vmatprep.subr.bf16.mxu0 %v10712_v38  ;;  %v10734_v38 = vld [vmem:[%s14912_s7 + $0xb8] ss:$28 sps:$4 sm:$0xff]  }
 0x3d5   : > { %7203 = vmatpush1.bf16.msra.mxu1 %v10707_v26  ;;  %v10739_v26 = vld [vmem:[%s14912_s7 + $0xf4] ss:$28 sps:$4 sm:$0xff]  }
 0x3d6   : > { %7607 = vmatpush1.bf16.msra.mxu0 %v10710_v39  ;;  %7204 = vmatprep.subr.bf16.mxu1 %v10715_v32  ;;  %v10762_v39 = vld [vmem:[%s14912_s7 + $0xc0] ss:$28 sps:$4 sm:$0xff]   ;;  %v10766_v32 = vld [vmem:[%s14912_s7 + $0x2b8] ss:$28 sps:$4 sm:$0xff]  }
 0x3d7   : > { %7608 = vmatprep.subr.bf16.mxu0 %v10718_v40  ;;  %v10737_v40 = vld [vmem:[%s14912_s7 + $0xf0] ss:$28 sps:$4 sm:$0xff]  }
 0x3d9   : > { %7205 = vmatpush1.bf16.msra.mxu1 %v10713_v21  ;;  %v10742_v21 = vld [vmem:[%s14912_s7 + $0x12c] ss:$28 sps:$4 sm:$0xff]  }
 0x3da   : > { %7609 = vmatpush1.bf16.msra.mxu0 %v10716_v63  ;;  %7206 = vmatprep.subr.bf16.mxu1 %v10721_v52  ;;  %v10767_v63 = vld [vmem:[%s14912_s7 + $0xf8] ss:$28 sps:$4 sm:$0xff]   ;;  %v10771_v52 = vld [vmem:[%s14912_s7 + $0x2f0] ss:$28 sps:$4 sm:$0xff]  }
 0x3db   : > { %7610 = vmatprep.subr.bf16.mxu0 %v10724_v22  ;;  %v10740_v22 = vld [vmem:[%s14912_s7 + $0x128] ss:$28 sps:$4 sm:$0xff]  }
 0x3dd   : > { %7207 = vmatpush1.bf16.msra.mxu1 %v10719_v11  ;;  %v10745_v11 = vld [vmem:[%s14912_s7 + $0x164] ss:$28 sps:$4 sm:$0xff]  }
 0x3de   : > { %7611 = vmatpush1.bf16.msra.mxu0 %v10722_v44  ;;  %7681 = vmatprep.subr.bf16.mxu1 %v10727_v45  ;;  %v10772_v44 = vld [vmem:[%s14912_s7 + $0x130] ss:$28 sps:$4 sm:$0xff]   ;;  %v10776_v45 = vld [vmem:[%s14912_s7 + $0x328] ss:$28 sps:$4 sm:$0xff]  }
 0x3df   : > { %9398 = vmatprep.subr.bf16.mxu0 %v10746_v23  ;;  %v10743_v23 = vld [vmem:[%s14912_s7 + $0x160] ss:$28 sps:$4 sm:$0xff]  }
 0x3e0   : > { %7209 = vmatmul.mubr.bf16.vlgmr.msra.gmra.mrb[84].mxu1 %v13551_v49 }
 0x3e1   : > { %7613 = vmatmul.mubr.bf16.vlgmr.msra.gmra.mrb[112].mxu0 %v13551_v49  ;;  %7218 = vmatprep.mubr.bf16.mxu1 %v13607_v5 }
 0x3e2   : > { %7622 = vmatprep.mubr.bf16.mxu0 %v13607_v5  ;;  %7682 = vmatpush1.bf16.msra.mxu1 %v10725_v37  ;;  %v10750_v37 = vld [vmem:[%s14912_s7 + $0x19c] ss:$28 sps:$4 sm:$0xff]  }
 0x3e3   : > { %7683 = vmatprep.subr.bf16.mxu1 %v10730_v47  ;;  %9399 = vmatpush3.bf16.msra.mxu0 %v10747_v7  ;;  %v10777_v47 = vld [vmem:[%s14912_s7 + $0x168] ss:$28 sps:$4 sm:$0xff]   ;;  %v10781_v7 = vld [vmem:[%s14912_s7 + $0x360] ss:$28 sps:$4 sm:$0xff]  }
 0x3e4   : > { %9400 = vmatprep.subr.bf16.mxu0 %v10751_v19  ;;  %v10748_v19 = vld [vmem:[%s14912_s7 + $0x198] ss:$28 sps:$4 sm:$0xff]  }
 0x3e6   : > { %7684 = vmatpush1.bf16.msra.mxu1 %v10728_v9  ;;  %v9733_v9 = vadd.f32 %v13775_v35, %v13508_v24  ;;  %v10753_v24 = vld [vmem:[%s14912_s7 + $0x1d0] ss:$28 sps:$4 sm:$0xff]  }
 0x3e7   : > { %7685 = vmatprep.subr.bf16.mxu1 %v10733_v27  ;;  %9401 = vmatpush3.bf16.msra.mxu0 %v10752_v33  ;;  %v10755_v27 = vld [vmem:[%s14912_s7 + $0x1d4] ss:$28 sps:$4 sm:$0xff]   ;;  %v10782_v33 = vld [vmem:[%s14912_s7 + $0x1a0] ss:$28 sps:$4 sm:$0xff]  }
 0x3e8   : > { %7219 = vmatmul.mubr.bf16.gmra.mrb[88].mxu1 %v13595_v2  ;;  %9402 = vmatprep.subr.bf16.mxu0 %v10756_v51  ;;  %v10804_v51 = vld [vmem:[%s14912_s7 + $0x558] ss:$28 sps:$4 sm:$0xff]   ;;  %v3859_v35 = vmul.f32 0.2, %v9733_v9 }
 0x3e9   : > { %7623 = vmatmul.mubr.bf16.gmra.mrb[116].mxu0 %v13595_v2  ;;  %7228 = vmatprep.mubr.bf16.mxu1 %v13651_v36 }
 0x3ea   : > { %7632 = vmatprep.mubr.bf16.mxu0 %v13651_v36  ;;  %7686 = vmatpush1.bf16.msra.mxu1 %v10731_v55  ;;  %v10760_v55 = vld [vmem:[%s14912_s7 + $0x20c] ss:$28 sps:$4 sm:$0xff]  }
 0x3eb   : > { %7687 = vmatprep.subr.bf16.mxu1 %v10736_v13  ;;  %9403 = vmatpush3.bf16.msra.mxu0 %v10757_v25  ;;  %v9732_v13 = vadd.f32 %v13765_v62, %v13496_v56  ;;  %v10758_v25 = vld [vmem:[%s14912_s7 + $0x208] ss:$28 sps:$4 sm:$0xff]   ;;  %v10770_v62 = vld [vmem:[%s14912_s7 + $0x27c] ss:$28 sps:$4 sm:$0xff]  }
 0x3ec   : > { %9404 = vmatprep.subr.bf16.mxu0 %v10761_v34  ;;  %v3963_v34 = vmax.f32 %v9733_v9, %v3859_v35  ;;  %v10814_v9 = vld [vmem:[%s14912_s7 + $0x5c8] ss:$28 sps:$4 sm:$0xff]  }
 0x3ed   : > { %v10792_v35 = vld [vmem:[%s14912_s7 + $0x3c8] ss:$28 sps:$4 sm:$0xff]  }
 0x3ee   : > { %7688 = vmatpush1.bf16.msra.mxu1 %v10734_v38  ;;  %v10765_v38 = vld [vmem:[%s14912_s7 + $0x244] ss:$28 sps:$4 sm:$0xff]   ;;  %v14000_v56 = vpack.c.bf16 %v3963_v34, %v3963_v34  ;;  %v10825_v34 = vld [vmem:[%s14912_s7 + $0x478] ss:$28 sps:$4 sm:$0xff]  }
 0x3ef   : > { %7689 = vmatprep.subr.bf16.mxu1 %v10739_v26  ;;  %9405 = vmatpush3.bf16.msra.mxu0 %v10762_v39  ;;  %v3858_v26 = vmul.f32 0.2, %v9732_v13  ;;  %v10763_v39 = vld [vmem:[%s14912_s7 + $0x240] ss:$28 sps:$4 sm:$0xff]  }
 0x3f0   : > { %7229 = vmatmul.mubr.bf16.gmra.mrb[92].mxu1 %v13639_v61  ;;  %9406 = vmatprep.subr.bf16.mxu0 %v10766_v32 }
 0x3f1   : > { %7633 = vmatmul.mubr.bf16.gmra.mrb[120].mxu0 %v13639_v61  ;;  %7238 = vmatprep.mubr.bf16.mxu1 %v13695_v42  ;;  %v3962_v32 = vmax.f32 %v9732_v13, %v3858_v26  ;;  %v10800_v13 = vld [vmem:[%s14912_s7 + $0x43c] ss:$28 sps:$4 sm:$0xff]   ;;  %v10829_v26 = vld [vmem:[%s14912_s7 + $0x670] ss:$28 sps:$4 sm:$0xff]  }
 0x3f2   : > { %7642 = vmatprep.mubr.bf16.mxu0 %v13695_v42  ;;  %7690 = vmatpush1.bf16.msra.mxu1 %v10737_v40  ;;  %v10768_v40 = vld [vmem:[%s14912_s7 + $0x278] ss:$28 sps:$4 sm:$0xff]  }
 0x3f3   : > { %7691 = vmatprep.subr.bf16.mxu1 %v10742_v21  ;;  %9407 = vmatpush3.bf16.msra.mxu0 %v10767_v63  ;;  %v10775_v21 = vld [vmem:[%s14912_s7 + $0x2b4] ss:$28 sps:$4 sm:$0xff]   ;;  %v14015_v63 = vpack.c.bf16 %v3962_v32, %v3962_v32  ;;  %v10834_v32 = vld [vmem:[%s14912_s7 + $0x6a8] ss:$28 sps:$4 sm:$0xff]  }
 0x3f4   : > { %9408 = vmatprep.subr.bf16.mxu0 %v10771_v52  ;;  %v10773_v52 = vld [vmem:[%s14912_s7 + $0x2b0] ss:$28 sps:$4 sm:$0xff]  }
 0x3f6   : > { %7692 = vmatpush1.bf16.msra.mxu1 %v10740_v22  ;;  %v10780_v22 = vld [vmem:[%s14912_s7 + $0x2ec] ss:$28 sps:$4 sm:$0xff]  }
 0x3f7   : > { %7693 = vmatprep.subr.bf16.mxu1 %v10745_v11  ;;  %9409 = vmatpush3.bf16.msra.mxu0 %v10772_v44  ;;  %v10778_v11 = vld [vmem:[%s14912_s7 + $0x2e8] ss:$28 sps:$4 sm:$0xff]  }
 0x3f8   : > { %7239 = vmatmul.mubr.bf16.gmra.mrb[96].mxu1 %v13683_v59  ;;  %9410 = vmatprep.subr.bf16.mxu0 %v10776_v45  ;;  %v10785_v44 = vld [vmem:[%s14912_s7 + $0x324] ss:$28 sps:$4 sm:$0xff]  }
 0x3f9   : > { %7643 = vmatmul.mubr.bf16.gmra.mrb[124].mxu0 %v13683_v59  ;;  %7248 = vmatprep.mubr.bf16.mxu1 %v13739_v3  ;;  %v10783_v45 = vld [vmem:[%s14912_s7 + $0x320] ss:$28 sps:$4 sm:$0xff]  }
 0x3fa   : > { %7652 = vmatprep.mubr.bf16.mxu0 %v13739_v3  ;;  %7694 = vmatpush1.bf16.msra.mxu1 %v10743_v23  ;;  %v10788_v23 = vld [vmem:[%s14912_s7 + $0x35c] ss:$28 sps:$4 sm:$0xff]  }
 0x3fb   : > { %7695 = vmatprep.subr.bf16.mxu1 %v10750_v37  ;;  %9411 = vmatpush3.bf16.msra.mxu0 %v10777_v47  ;;  %v10809_v37 = vld [vmem:[%s14912_s7 + $0x590] ss:$28 sps:$4 sm:$0xff]   ;;  %v10786_v47 = vld [vmem:[%s14912_s7 + $0x358] ss:$28 sps:$4 sm:$0xff]  }
 0x3fc   : > { %9412 = vmatprep.subr.bf16.mxu0 %v10781_v7  ;;  %v10791_v7 = vld [vmem:[%s14912_s7 + $0x394] ss:$28 sps:$4 sm:$0xff]  }
 0x3fe   : > { %7696 = vmatpush1.bf16.msra.mxu1 %v10748_v19  ;;  %v10810_v19 = vld [vmem:[%s14912_s7 + $0x3d0] ss:$28 sps:$4 sm:$0xff]  }
 0x3ff   : > { %7697 = vmatprep.subr.bf16.mxu1 %v10755_v27  ;;  %9413 = vmatpush3.bf16.msra.mxu0 %v10782_v33  ;;  %v10789_v27 = vld [vmem:[%s14912_s7 + $0x390] ss:$28 sps:$4 sm:$0xff]  }
 0x400   : > { %7249 = vmatmul.mubr.bf16.gmra.mrb[100].mxu1 %v13727_v53  ;;  %9456 = vmatprep.subr.bf16.mxu0 %v10804_v51  ;;  %v10794_v33 = vld [vmem:[%s14912_s7 + $0x3cc] ss:$28 sps:$4 sm:$0xff]  }
 0x401   : > { %7653 = vmatmul.mubr.bf16.gmra.mrb[128].mxu0 %v13727_v53  ;;  %7258 = vmatprep.mubr.bf16.mxu1 %v13783_v48  ;;  %v10815_v51 = vld [vmem:[%s14912_s7 + $0x408] ss:$28 sps:$4 sm:$0xff]  }
 0x402   : > { %7662 = vmatprep.mubr.bf16.mxu0 %v13783_v48  ;;  %7698 = vmatpush1.bf16.msra.mxu1 %v10753_v24  ;;  %v10819_v24 = vld [vmem:[%s14912_s7 + $0x600] ss:$28 sps:$4 sm:$0xff]  }
 0x403   : > { %7699 = vmatprep.subr.bf16.mxu1 %v10760_v55  ;;  %v10820_v55 = vld [vmem:[%s14912_s7 + $0x440] ss:$28 sps:$4 sm:$0xff]  }
 0x406   : > { %7700 = vmatpush1.bf16.msra.mxu1 %v10758_v25  ;;  %v10824_v25 = vld [vmem:[%s14912_s7 + $0x638] ss:$28 sps:$4 sm:$0xff]  }
 0x407   : > { %7701 = vmatprep.subr.bf16.mxu1 %v10765_v38  ;;  %v10798_v38 = vld [vmem:[%s14912_s7 + $0x438] ss:$28 sps:$4 sm:$0xff]  }
 0x408   : > { %7259 = vmatmul.mubr.bf16.gmra.mrb[104].mxu1 %v13770_v54 }
 0x409   : > { %7663 = vmatmul.mubr.bf16.gmra.mrb[132].mxu0 %v13770_v54  ;;  %7268 = vmatprep.mubr.bf16.mxu1 %v14000_v56 }
 0x40a   : > { %7672 = vmatprep.mubr.bf16.mxu0 %v14000_v56  ;;  %7702 = vmatpush1.bf16.msra.mxu1 %v10763_v39  ;;  %v10808_v39 = vld [vmem:[%s14912_s7 + $0x4ac] ss:$28 sps:$4 sm:$0xff]  }
 0x40b   : > { %7703 = vmatprep.subr.bf16.mxu1 %v10770_v62  ;;  %v10830_v62 = vld [vmem:[%s14912_s7 + $0x4b0] ss:$28 sps:$4 sm:$0xff]  }
 0x40e   : > { %7704 = vmatpush1.bf16.msra.mxu1 %v10768_v40  ;;  %v10806_v40 = vld [vmem:[%s14912_s7 + $0x4a8] ss:$28 sps:$4 sm:$0xff]  }
 0x40f   : > { %7705 = vmatprep.subr.bf16.mxu1 %v10775_v21  ;;  %v10835_v21 = vld [vmem:[%s14912_s7 + $0x4e8] ss:$28 sps:$4 sm:$0xff]  }
 0x410   : > { %7269 = vmatmul.mubr.bf16.gmra.mrb[108].mxu1 %v14015_v63 }
 0x411   : > { %7673 = vmatmul.mubr.bf16.gmra.mrb[136].mxu0 %v14015_v63  ;;  %7713 = vmatprep.mubr.bf16.mxu1 %v12978_v31 }
 0x412   : > { %7706 = vmatpush1.bf16.msra.mxu1 %v10773_v52  ;;  %8117 = vmatprep.mubr.bf16.mxu0 %v12978_v31  ;;  %v10805_v31 = vld [vmem:[%s14912_s7 + $0x398] ss:$28 sps:$4 sm:$0xff]  }
 0x413   : > { %7707 = vmatprep.subr.bf16.mxu1 %v10780_v22  ;;  %v10818_v52 = vld [vmem:[%s14912_s7 + $0x51c] ss:$28 sps:$4 sm:$0xff]  }
 0x414   : > { %v10839_v22 = vld [vmem:[%s14912_s7 + $0x6e0] ss:$28 sps:$4 sm:$0xff]  }
 0x416   : > { %7708 = vmatpush1.bf16.msra.mxu1 %v10778_v11  ;;  %v10840_v11 = vld [vmem:[%s14912_s7 + $0x520] ss:$28 sps:$4 sm:$0xff]  }
 0x417   : > { %7709 = vmatprep.subr.bf16.mxu1 %v10785_v44  ;;  %v10816_v44 = vld [vmem:[%s14912_s7 + $0x518] ss:$28 sps:$4 sm:$0xff]  }
 0x419   : > { %8118 = vmatmul.mubr.bf16.vlgmr.msra.gmra.mrb[140].mxu0 %v12970_v46 }
 0x41a   : > { %7710 = vmatpush1.bf16.msra.mxu1 %v10783_v45  ;;  %8125 = vmatprep.mubr.bf16.mxu0 %v13022_v16  ;;  %v10862_v45 = vld [vmem:[%s14912_s7 + $0x8d8] ss:$28 sps:$4 sm:$0xff]  }
 0x41b   : > { %7711 = vmatprep.subr.bf16.mxu1 %v10788_v23  ;;  %9457 = vmatpush3.bf16.msra.mxu0 %v10805_v31  ;;  %v10828_v23 = vld [vmem:[%s14912_s7 + $0x58c] ss:$28 sps:$4 sm:$0xff]  }
 0x41c   : > { %9458 = vmatprep.subr.bf16.mxu0 %v10809_v37  ;;  %v10826_v31 = vld [vmem:[%s14912_s7 + $0x588] ss:$28 sps:$4 sm:$0xff]  }
 0x41d   : > { %v10833_v37 = vld [vmem:[%s14912_s7 + $0x5c4] ss:$28 sps:$4 sm:$0xff]  }
 0x41e   : > { %7712 = vmatpush1.bf16.msra.mxu1 %v10786_v47  ;;  %v10836_v47 = vld [vmem:[%s14912_s7 + $0x5f8] ss:$28 sps:$4 sm:$0xff]  }
 0x41f   : > { %7782 = vmatprep.subr.bf16.mxu1 %v10791_v7  ;;  %9459 = vmatpush3.bf16.msra.mxu0 %v10810_v19  ;;  %v10843_v7 = vld [vmem:[%s14912_s7 + $0x634] ss:$28 sps:$4 sm:$0xff]  }
 0x420   : > { %9460 = vmatprep.subr.bf16.mxu0 %v10814_v9  ;;  %v10863_v19 = vld [vmem:[%s14912_s7 + $0x718] ss:$28 sps:$4 sm:$0xff]   ;;  %v10867_v9 = vld [vmem:[%s14912_s7 + $0x910] ss:$28 sps:$4 sm:$0xff]  }
 0x421   : > { %7714 = vmatmul.mubr.bf16.vlgmr.msra.gmra.mrb[112].mxu1 %v12970_v46  ;;  %8126 = vmatmul.mubr.bf16.gmra.mrb[144].mxu0 %v13011_v30  ;;  %v10797_v46 = vld [vmem:[%s14912_s7 + $0x404] ss:$28 sps:$4 sm:$0xff]  }
 0x422   : > { %7723 = vmatprep.mubr.bf16.mxu1 %v13022_v16  ;;  %7783 = vmatpush1.bf16.msra.mxu1 %v10789_v27  ;;  %v10795_v16 = vld [vmem:[%s14912_s7 + $0x400] ss:$28 sps:$4 sm:$0xff]   ;;  %v10844_v27 = vld [vmem:[%s14912_s7 + $0x668] ss:$28 sps:$4 sm:$0xff]  }
 0x423   : > { %8133 = vmatprep.mubr.bf16.mxu0 %v13066_v57  ;;  %7784 = vmatprep.subr.bf16.mxu1 %v10794_v33  ;;  %v10868_v33 = vld [vmem:[%s14912_s7 + $0x750] ss:$28 sps:$4 sm:$0xff]  }
 0x424   : > { %9461 = vmatpush3.bf16.msra.mxu0 %v10815_v51  ;;  %v10847_v51 = vld [vmem:[%s14912_s7 + $0x6a0] ss:$28 sps:$4 sm:$0xff]  }
 0x425   : > { %9462 = vmatprep.subr.bf16.mxu0 %v10819_v24  ;;  %v10852_v24 = vld [vmem:[%s14912_s7 + $0x6dc] ss:$28 sps:$4 sm:$0xff]  }
 0x426   : > { %7785 = vmatpush1.bf16.msra.mxu1 %v10792_v35  ;;  %v10873_v35 = vld [vmem:[%s14912_s7 + $0x788] ss:$28 sps:$4 sm:$0xff]  }
 0x427   : > { %7786 = vmatprep.subr.bf16.mxu1 %v10797_v46  ;;  %v10877_v46 = vld [vmem:[%s14912_s7 + $0x980] ss:$28 sps:$4 sm:$0xff]  }
 0x428   : > { %9463 = vmatpush3.bf16.msra.mxu0 %v10820_v55  ;;  %v10850_v55 = vld [vmem:[%s14912_s7 + $0x6d8] ss:$28 sps:$4 sm:$0xff]  }
 0x429   : > { %7724 = vmatmul.mubr.bf16.gmra.mrb[116].mxu1 %v13011_v30  ;;  %8134 = vmatmul.mubr.bf16.gmra.mrb[148].mxu0 %v13055_v20  ;;  %v10803_v30 = vld [vmem:[%s14912_s7 + $0x474] ss:$28 sps:$4 sm:$0xff]  }
 0x42a   : > { %7733 = vmatprep.mubr.bf16.mxu1 %v13066_v57  ;;  %7787 = vmatpush1.bf16.msra.mxu1 %v10795_v16  ;;  %v10801_v57 = vld [vmem:[%s14912_s7 + $0x470] ss:$28 sps:$4 sm:$0xff]  }
 0x42b   : > { %8141 = vmatprep.mubr.bf16.mxu0 %v13110_v15  ;;  %7788 = vmatprep.subr.bf16.mxu1 %v10800_v13  ;;  %v10855_v16 = vld [vmem:[%s14912_s7 + $0x714] ss:$28 sps:$4 sm:$0xff]   ;;  %v10878_v13 = vld [vmem:[%s14912_s7 + $0x7c0] ss:$28 sps:$4 sm:$0xff]  }
 0x42c   : > { %9464 = vmatprep.subr.bf16.mxu0 %v10824_v25  ;;  %v10853_v25 = vld [vmem:[%s14912_s7 + $0x710] ss:$28 sps:$4 sm:$0xff]  }
 0x42d   : > { %9465 = vmatpush3.bf16.msra.mxu0 %v10825_v34  ;;  %v10858_v34 = vld [vmem:[%s14912_s7 + $0x74c] ss:$28 sps:$4 sm:$0xff]  }
 0x42e   : > { %7789 = vmatpush1.bf16.msra.mxu1 %v10798_v38  ;;  %9466 = vmatprep.subr.bf16.mxu0 %v10829_v26  ;;  %v10882_v38 = vld [vmem:[%s14912_s7 + $0x9b8] ss:$28 sps:$4 sm:$0xff]  }
 0x42f   : > { %7790 = vmatprep.subr.bf16.mxu1 %v10803_v30  ;;  %v15031_v26 = vld [vmem:[#allocation10_spill] sm:$0xff] }
 0x430   : > { %v10883_v30 = vld [vmem:[%s14912_s7 + $0x7f8] ss:$28 sps:$4 sm:$0xff]  }
 0x431   : > { %7734 = vmatmul.mubr.bf16.gmra.mrb[120].mxu1 %v13055_v20  ;;  %8142 = vmatmul.mubr.bf16.gmra.mrb[152].mxu0 %v13099_v0  ;;  %v10813_v20 = vld [vmem:[%s14912_s7 + $0x4e4] ss:$28 sps:$4 sm:$0xff]  }
 0x432   : > { %7743 = vmatprep.mubr.bf16.mxu1 %v13110_v15  ;;  %7791 = vmatpush1.bf16.msra.mxu1 %v10801_v57  ;;  %v10811_v15 = vld [vmem:[%s14912_s7 + $0x4e0] ss:$28 sps:$4 sm:$0xff]   ;;  %v10856_v57 = vld [vmem:[%s14912_s7 + $0x748] ss:$28 sps:$4 sm:$0xff]  }
 0x433   : > { %8149 = vmatprep.mubr.bf16.mxu0 %v13154_v12  ;;  %7792 = vmatprep.subr.bf16.mxu1 %v10808_v39  ;;  %v10887_v39 = vld [vmem:[%s14912_s7 + $0x9f0] ss:$28 sps:$4 sm:$0xff]  }
 0x434   : > { %9467 = vmatpush3.bf16.msra.mxu0 %v10830_v62  ;;  %v15032_v62 = vld [vmem:[#allocation12_spill] sm:$0xff] }
 0x435   : > { %9468 = vmatprep.subr.bf16.mxu0 %v10834_v32  ;;  %v10866_v32 = vld [vmem:[%s14912_s7 + $0x7bc] ss:$28 sps:$4 sm:$0xff]  }
 0x436   : > { %7793 = vmatpush1.bf16.msra.mxu1 %v10806_v40  ;;  %v10888_v40 = vld [vmem:[%s14912_s7 + $0x830] ss:$28 sps:$4 sm:$0xff]  }
 0x437   : > { %7794 = vmatprep.subr.bf16.mxu1 %v10813_v20  ;;  %v15033_v20 = vld [vmem:[#allocation11_spill] sm:$0xff] }
 0x438   : > { %9469 = vmatpush3.bf16.msra.mxu0 %v10835_v21  ;;  %v10892_v21 = vld [vmem:[%s14912_s7 + $0xa28] ss:$28 sps:$4 sm:$0xff]  }
 0x439   : > { %7744 = vmatmul.mubr.bf16.gmra.mrb[124].mxu1 %v13099_v0  ;;  %8150 = vmatmul.mubr.bf16.gmra.mrb[156].mxu0 %v13143_v18  ;;  %v10823_v0 = vld [vmem:[%s14912_s7 + $0x554] ss:$28 sps:$4 sm:$0xff]  }
 0x43a   : > { %7753 = vmatprep.mubr.bf16.mxu1 %v13154_v12  ;;  %7795 = vmatpush1.bf16.msra.mxu1 %v10811_v15  ;;  %v10821_v12 = vld [vmem:[%s14912_s7 + $0x550] ss:$28 sps:$4 sm:$0xff]   ;;  %v10864_v15 = vld [vmem:[%s14912_s7 + $0x7b8] ss:$28 sps:$4 sm:$0xff]  }
 0x43b   : > { %8157 = vmatprep.mubr.bf16.mxu0 %v13197_v41  ;;  %7796 = vmatprep.subr.bf16.mxu1 %v10818_v52  ;;  %v15034_v52 = vld [vmem:[#allocation14_spill] sm:$0xff] }
 0x43c   : > { %9470 = vmatprep.subr.bf16.mxu0 %v10839_v22  ;;  %v10893_v22 = vld [vmem:[%s14912_s7 + $0x868] ss:$28 sps:$4 sm:$0xff]  }
 0x43d   : > { %9471 = vmatpush3.bf16.msra.mxu0 %v10840_v11  ;;  %v10876_v11 = vld [vmem:[%s14912_s7 + $0x82c] ss:$28 sps:$4 sm:$0xff]  }
 0x43e   : > { %7797 = vmatpush1.bf16.msra.mxu1 %v10816_v44  ;;  %9514 = vmatprep.subr.bf16.mxu0 %v10862_v45  ;;  %v10897_v44 = vld [vmem:[%s14912_s7 + $0xa60] ss:$28 sps:$4 sm:$0xff]   ;;  %v15035_v45 = vld [vmem:[#allocation13_spill] sm:$0xff] }
 0x43f   : > { %7798 = vmatprep.subr.bf16.mxu1 %v10823_v0  ;;  %v10898_v0 = vld [vmem:[%s14912_s7 + $0x8a0] ss:$28 sps:$4 sm:$0xff]  }
 0x441   : > { %7754 = vmatmul.mubr.bf16.gmra.mrb[128].mxu1 %v13143_v18  ;;  %8158 = vmatmul.mubr.bf16.gmra.mrb[160].mxu0 %v13187_v43  ;;  %v10831_v18 = vld [vmem:[%s14912_s7 + $0x5c0] ss:$28 sps:$4 sm:$0xff]  }
 0x442   : > { %7763 = vmatprep.mubr.bf16.mxu1 %v13197_v41  ;;  %7799 = vmatpush1.bf16.msra.mxu1 %v10821_v12  ;;  %v10838_v41 = vld [vmem:[%s14912_s7 + $0x5fc] ss:$28 sps:$4 sm:$0xff]   ;;  %v10874_v12 = vld [vmem:[%s14912_s7 + $0x828] ss:$28 sps:$4 sm:$0xff]  }
 0x443   : > { %8165 = vmatprep.mubr.bf16.mxu0 %v13226_v17  ;;  %7800 = vmatprep.subr.bf16.mxu1 %v10828_v23  ;;  %v10920_v23 = vld [vmem:[%s14912_s7 + $0xc58] ss:$28 sps:$4 sm:$0xff]  }
 0x446   : > { %7801 = vmatpush1.bf16.msra.mxu1 %v10826_v31  ;;  %v15036_v31 = vld [vmem:[#allocation16_spill] sm:$0xff] }
 0x447   : > { %7802 = vmatprep.subr.bf16.mxu1 %v10833_v37  ;;  %v10881_v37 = vld [vmem:[%s14912_s7 + $0x864] ss:$28 sps:$4 sm:$0xff]  }
 0x449   : > { %7764 = vmatmul.mubr.bf16.gmra.mrb[132].mxu1 %v13187_v43  ;;  %8166 = vmatmul.mubr.bf16.gmra.mrb[164].mxu0 %v13238_v60  ;;  %v10841_v43 = vld [vmem:[%s14912_s7 + $0x630] ss:$28 sps:$4 sm:$0xff]  }
 0x44a   : > { %7773 = vmatprep.mubr.bf16.mxu1 %v13226_v17  ;;  %7803 = vmatpush1.bf16.msra.mxu1 %v10831_v18  ;;  %v10846_v17 = vld [vmem:[%s14912_s7 + $0x66c] ss:$28 sps:$4 sm:$0xff]   ;;  %v10879_v18 = vld [vmem:[%s14912_s7 + $0x860] ss:$28 sps:$4 sm:$0xff]  }
 0x44b   : > { %8205 = vmatprep.mubr.bf16.mxu0 %v12988_v50  ;;  %7804 = vmatprep.subr.bf16.mxu1 %v10838_v41  ;;  %v10886_v41 = vld [vmem:[%s14912_s7 + $0x89c] ss:$28 sps:$4 sm:$0xff]  }
 0x44e   : > { %7805 = vmatpush1.bf16.msra.mxu1 %v10836_v47  ;;  %v15037_v47 = vld [vmem:[#allocation15_spill] sm:$0xff] }
 0x44f   : > { %7806 = vmatprep.subr.bf16.mxu1 %v10843_v7  ;;  %v10884_v7 = vld [vmem:[%s14912_s7 + $0x898] ss:$28 sps:$4 sm:$0xff]  }
 0x451   : > { %7774 = vmatmul.mubr.bf16.gmra.mrb[136].mxu1 %v13238_v60  ;;  %8206 = vmatmul.mubr.bf16.vlgmr.msra.gmra.mrb[168].mxu0 %v12976_v1  ;;  %v10849_v60 = vld [vmem:[%s14912_s7 + $0x6a4] ss:$28 sps:$4 sm:$0xff]  }
 0x452   : > { %7807 = vmatpush1.bf16.msra.mxu1 %v10841_v43  ;;  %7814 = vmatprep.mubr.bf16.mxu1 %v12988_v50  ;;  %v10872_v50 = vld [vmem:[%s14912_s7 + $0x948] ss:$28 sps:$4 sm:$0xff]   ;;  %v15038_v43 = vld [vmem:[#allocation17_spill] sm:$0xff] }
 0x453   : > { %8213 = vmatprep.mubr.bf16.mxu0 %v13032_v28  ;;  %7808 = vmatprep.subr.bf16.mxu1 %v10846_v17  ;;  %v10891_v17 = vld [vmem:[%s14912_s7 + $0x8d4] ss:$28 sps:$4 sm:$0xff]  }
 0x454   : > { %9515 = vmatpush3.bf16.msra.mxu0 %v10863_v19  ;;  %v10889_v19 = vld [vmem:[%s14912_s7 + $0x8d0] ss:$28 sps:$4 sm:$0xff]  }
 0x455   : > { %9516 = vmatprep.subr.bf16.mxu0 %v10867_v9  ;;  %v10896_v9 = vld [vmem:[%s14912_s7 + $0x90c] ss:$28 sps:$4 sm:$0xff]  }
 0x456   : > { %7809 = vmatpush1.bf16.msra.mxu1 %v10844_v27  ;;  %v15039_v27 = vld [vmem:[#allocation18_spill] sm:$0xff] }
 0x457   : > { %7810 = vmatprep.subr.bf16.mxu1 %v10849_v60  ;;  %v10894_v60 = vld [vmem:[%s14912_s7 + $0x908] ss:$28 sps:$4 sm:$0xff]  }
 0x458   : > { %9517 = vmatpush3.bf16.msra.mxu0 %v10868_v33  ;;  %v15040_v33 = vld [vmem:[#allocation20_spill] sm:$0xff] }
 0x459   : > { %8214 = vmatmul.mubr.bf16.gmra.mrb[172].mxu0 %v13020_v58  ;;  %9518 = vmatprep.subr.bf16.mxu0 %v10872_v50  ;;  %v10901_v50 = vld [vmem:[%s14912_s7 + $0x944] ss:$28 sps:$4 sm:$0xff]  }
 0x45a   : > { %7811 = vmatpush1.bf16.msra.mxu1 %v10847_v51  ;;  %8221 = vmatprep.mubr.bf16.mxu0 %v13076_v8  ;;  %v10899_v51 = vld [vmem:[%s14912_s7 + $0x940] ss:$28 sps:$4 sm:$0xff]  }
 0x45b   : > { %7812 = vmatprep.subr.bf16.mxu1 %v10852_v24  ;;  %v10904_v24 = vld [vmem:[%s14912_s7 + $0x97c] ss:$28 sps:$4 sm:$0xff]  }
 0x45c   : > { %9519 = vmatpush3.bf16.msra.mxu0 %v10873_v35  ;;  %v10921_v35 = vld [vmem:[%s14912_s7 + $0xa98] ss:$28 sps:$4 sm:$0xff]  }
 0x45d   : > { %9520 = vmatprep.subr.bf16.mxu0 %v10877_v46  ;;  %v15041_v46 = vld [vmem:[#allocation19_spill] sm:$0xff] }
 0x45e   : > { %7813 = vmatpush1.bf16.msra.mxu1 %v10850_v55  ;;  %v10925_v55 = vld [vmem:[%s14912_s7 + $0xc90] ss:$28 sps:$4 sm:$0xff]  }
 0x45f   : > { %7883 = vmatprep.subr.bf16.mxu1 %v10855_v16  ;;  %v10902_v16 = vld [vmem:[%s14912_s7 + $0x978] ss:$28 sps:$4 sm:$0xff]  }
 0x460   : > { %9521 = vmatpush3.bf16.msra.mxu0 %v10878_v13  ;;  %v15042_v13 = vld [vmem:[#allocation22_spill] sm:$0xff] }
 0x461   : > { %7815 = vmatmul.mubr.bf16.vlgmr.msra.gmra.mrb[112].mxu1 %v12976_v1  ;;  %8222 = vmatmul.mubr.bf16.gmra.mrb[176].mxu0 %v15031_v26  ;;  %v10861_v1 = vld [vmem:[%s14912_s7 + $0x784] ss:$28 sps:$4 sm:$0xff]  }
 0x462   : > { %7824 = vmatprep.mubr.bf16.mxu1 %v13032_v28  ;;  %7884 = vmatpush1.bf16.msra.mxu1 %v10853_v25  ;;  %v10859_v28 = vld [vmem:[%s14912_s7 + $0x780] ss:$28 sps:$4 sm:$0xff]   ;;  %v10907_v25 = vld [vmem:[%s14912_s7 + $0x9b4] ss:$28 sps:$4 sm:$0xff]  }
 0x463   : > { %8229 = vmatprep.mubr.bf16.mxu0 %v15032_v62  ;;  %7885 = vmatprep.subr.bf16.mxu1 %v10858_v34  ;;  %v10926_v34 = vld [vmem:[%s14912_s7 + $0xad0] ss:$28 sps:$4 sm:$0xff]  }
 0x464   : > { %9522 = vmatprep.subr.bf16.mxu0 %v10882_v38  ;;  %v10905_v38 = vld [vmem:[%s14912_s7 + $0x9b0] ss:$28 sps:$4 sm:$0xff]  }
 0x465   : > { %9523 = vmatpush3.bf16.msra.mxu0 %v10883_v30  ;;  %v10930_v30 = vld [vmem:[%s14912_s7 + $0xcc8] ss:$28 sps:$4 sm:$0xff]  }
 0x466   : > { %7886 = vmatpush1.bf16.msra.mxu1 %v10856_v57  ;;  %9524 = vmatprep.subr.bf16.mxu0 %v10887_v39  ;;  %v15043_v57 = vld [vmem:[#allocation21_spill] sm:$0xff]  ;;  %v10931_v39 = vld [vmem:[%s14912_s7 + $0xb08] ss:$28 sps:$4 sm:$0xff]  }
 0x467   : > { %7887 = vmatprep.subr.bf16.mxu1 %v10861_v1  ;;  %v10935_v1 = vld [vmem:[%s14912_s7 + $0xd00] ss:$28 sps:$4 sm:$0xff]  }
 0x469   : > { %7825 = vmatmul.mubr.bf16.gmra.mrb[116].mxu1 %v13020_v58  ;;  %8230 = vmatmul.mubr.bf16.gmra.mrb[180].mxu0 %v15033_v20  ;;  %v10871_v58 = vld [vmem:[%s14912_s7 + $0x7f4] ss:$28 sps:$4 sm:$0xff]  }
 0x46a   : > { %7834 = vmatprep.mubr.bf16.mxu1 %v13076_v8  ;;  %7888 = vmatpush1.bf16.msra.mxu1 %v10859_v28  ;;  %v10869_v8 = vld [vmem:[%s14912_s7 + $0x7f0] ss:$28 sps:$4 sm:$0xff]  }
 0x46b   : > { %8237 = vmatprep.mubr.bf16.mxu0 %v15034_v52  ;;  %7889 = vmatprep.subr.bf16.mxu1 %v10866_v32  ;;  %v15044_v28 = vld [vmem:[#allocation24_spill] sm:$0xff]  ;;  %v10913_v32 = vld [vmem:[%s14912_s7 + $0xa24] ss:$28 sps:$4 sm:$0xff]  }
 0x46c   : > { %9525 = vmatpush3.bf16.msra.mxu0 %v10888_v40  ;;  %v10911_v40 = vld [vmem:[%s14912_s7 + $0xa20] ss:$28 sps:$4 sm:$0xff]  }
 0x46d   : > { %9526 = vmatprep.subr.bf16.mxu0 %v10892_v21  ;;  %v10936_v21 = vld [vmem:[%s14912_s7 + $0xb40] ss:$28 sps:$4 sm:$0xff]  }
 0x46e   : > { %7890 = vmatpush1.bf16.msra.mxu1 %v10864_v15  ;;  %v10940_v15 = vld [vmem:[%s14912_s7 + $0xd38] ss:$28 sps:$4 sm:$0xff]  }
 0x46f   : > { %7891 = vmatprep.subr.bf16.mxu1 %v10871_v58  ;;  %v15046_v58 = vld [vmem:[#allocation26_spill] sm:$0xff] }
 0x470   : > { %9527 = vmatpush3.bf16.msra.mxu0 %v10893_v22  ;;  %v10914_v22 = vld [vmem:[%s14912_s7 + $0xa58] ss:$28 sps:$4 sm:$0xff]  }
 0x471   : > { %7835 = vmatmul.mubr.bf16.gmra.mrb[120].mxu1 %v15031_v26  ;;  %8238 = vmatmul.mubr.bf16.gmra.mrb[184].mxu0 %v15035_v45  ;;  %v10910_v26 = vld [vmem:[%s14912_s7 + $0x9ec] ss:$28 sps:$4 sm:$0xff]  }
 0x472   : > { %7844 = vmatprep.mubr.bf16.mxu1 %v15032_v62  ;;  %7892 = vmatpush1.bf16.msra.mxu1 %v10869_v8  ;;  %v10908_v62 = vld [vmem:[%s14912_s7 + $0x9e8] ss:$28 sps:$4 sm:$0xff]   ;;  %v10919_v8 = vld [vmem:[%s14912_s7 + $0xa94] ss:$28 sps:$4 sm:$0xff]  }
 0x473   : > { %8245 = vmatprep.mubr.bf16.mxu0 %v15036_v31  ;;  %7893 = vmatprep.subr.bf16.mxu1 %v10876_v11  ;;  %v10941_v11 = vld [vmem:[%s14912_s7 + $0xb78] ss:$28 sps:$4 sm:$0xff]  }
 0x474   : > { %9528 = vmatprep.subr.bf16.mxu0 %v10897_v44  ;;  %v10945_v44 = vld [vmem:[%s14912_s7 + $0xd70] ss:$28 sps:$4 sm:$0xff]  }
 0x475   : > { %9529 = vmatpush3.bf16.msra.mxu0 %v10898_v0  ;;  %v10924_v0 = vld [vmem:[%s14912_s7 + $0xacc] ss:$28 sps:$4 sm:$0xff]  }
 0x476   : > { %7894 = vmatpush1.bf16.msra.mxu1 %v10874_v12  ;;  %9572 = vmatprep.subr.bf16.mxu0 %v10920_v23  ;;  %v10946_v12 = vld [vmem:[%s14912_s7 + $0xbb0] ss:$28 sps:$4 sm:$0xff]  }
 0x477   : > { %7895 = vmatprep.subr.bf16.mxu1 %v10881_v37  ;;  %v15047_v23 = vld [vmem:[#allocation25_spill] sm:$0xff]  ;;  %v10922_v37 = vld [vmem:[%s14912_s7 + $0xac8] ss:$28 sps:$4 sm:$0xff]  }
 0x479   : > { %7845 = vmatmul.mubr.bf16.gmra.mrb[124].mxu1 %v15033_v20  ;;  %8246 = vmatmul.mubr.bf16.gmra.mrb[188].mxu0 %v15037_v47  ;;  %v10916_v20 = vld [vmem:[%s14912_s7 + $0xa5c] ss:$28 sps:$4 sm:$0xff]  }
 0x47a   : > { %7854 = vmatprep.mubr.bf16.mxu1 %v15034_v52  ;;  %7896 = vmatpush1.bf16.msra.mxu1 %v10879_v18  ;;  %v15045_v52 = vld [vmem:[#allocation23_spill] sm:$0xff]  ;;  %v15048_v18 = vld [vmem:[#allocation28_spill] sm:$0xff] }
 0x47b   : > { %8253 = vmatprep.mubr.bf16.mxu0 %v15038_v43  ;;  %7897 = vmatprep.subr.bf16.mxu1 %v10886_v41  ;;  %v10929_v41 = vld [vmem:[%s14912_s7 + $0xb04] ss:$28 sps:$4 sm:$0xff]  }
 0x47e   : > { %7898 = vmatpush1.bf16.msra.mxu1 %v10884_v7  ;;  %v10927_v7 = vld [vmem:[%s14912_s7 + $0xb00] ss:$28 sps:$4 sm:$0xff]  }
 0x47f   : > { %7899 = vmatprep.subr.bf16.mxu1 %v10891_v17  ;;  %v10955_v17 = vld [vmem:[%s14912_s7 + $0xde0] ss:$28 sps:$4 sm:$0xff]  }
 0x481   : > { %7855 = vmatmul.mubr.bf16.gmra.mrb[128].mxu1 %v15035_v45  ;;  %8254 = vmatmul.mubr.bf16.gmra.mrb[192].mxu0 %v15039_v27  ;;  %v10917_v45 = vld [vmem:[%s14912_s7 + $0xa90] ss:$28 sps:$4 sm:$0xff]  }
 0x482   : > { %7864 = vmatprep.mubr.bf16.mxu1 %v15036_v31  ;;  %7900 = vmatpush1.bf16.msra.mxu1 %v10889_v19  ;;  %v10950_v31 = vld [vmem:[%s14912_s7 + $0xda8] ss:$28 sps:$4 sm:$0xff]  }
 0x483   : > { %8293 = vmatprep.mubr.bf16.mxu0 %v15040_v33  ;;  %7901 = vmatprep.subr.bf16.mxu1 %v10896_v9  ;;  %v15049_v19 = vld [vmem:[#allocation27_spill] sm:$0xff] }
 0x484   : > { %v10956_v9 = vld [vmem:[%s14912_s7 + $0xc20] ss:$28 sps:$4 sm:$0xff]  }
 0x486   : > { %7902 = vmatpush1.bf16.msra.mxu1 %v10894_v60  ;;  %v10939_v60 = vld [vmem:[%s14912_s7 + $0xb74] ss:$28 sps:$4 sm:$0xff]  }
 0x487   : > { %7903 = vmatprep.subr.bf16.mxu1 %v10901_v50  ;;  %v10937_v50 = vld [vmem:[%s14912_s7 + $0xb70] ss:$28 sps:$4 sm:$0xff]  }
 0x489   : > { %7865 = vmatmul.mubr.bf16.gmra.mrb[132].mxu1 %v15037_v47  ;;  %8294 = vmatmul.mubr.bf16.vlgmr.msra.gmra.mrb[196].mxu0 %v15041_v46  ;;  %v10951_v47 = vld [vmem:[%s14912_s7 + $0xbe8] ss:$28 sps:$4 sm:$0xff]  }
 0x48a   : > { %7874 = vmatprep.mubr.bf16.mxu1 %v15038_v43  ;;  %7904 = vmatpush1.bf16.msra.mxu1 %v10899_v51  ;;  %v10934_v43 = vld [vmem:[%s14912_s7 + $0xb3c] ss:$28 sps:$4 sm:$0xff]   ;;  %v10944_v51 = vld [vmem:[%s14912_s7 + $0xbac] ss:$28 sps:$4 sm:$0xff]  }
 0x48b   : > { %8301 = vmatprep.mubr.bf16.mxu0 %v15042_v13  ;;  %7905 = vmatprep.subr.bf16.mxu1 %v10904_v24  ;;  %v15050_v24 = vld [vmem:[#allocation6_spill] sm:$0xff] }
 0x48c   : > { %9573 = vmatpush3.bf16.msra.mxu0 %v10921_v35 }
 0x48d   : > { %9574 = vmatprep.subr.bf16.mxu0 %v10925_v55 }
 0x48e   : > { %7906 = vmatpush1.bf16.msra.mxu1 %v10902_v16  ;;  %v15052_v16 = vld [vmem:[#allocation7_spill] sm:$0xff] }
 0x48f   : > { %7907 = vmatprep.subr.bf16.mxu1 %v10907_v25  ;;  %v15053_v25 = vld [vmem:[#allocation9_spill] sm:$0xff] }
 0x490   : > { %9575 = vmatpush3.bf16.msra.mxu0 %v10926_v34 }
 0x491   : > { %7875 = vmatmul.mubr.bf16.gmra.mrb[136].mxu1 %v15039_v27  ;;  %8302 = vmatmul.mubr.bf16.gmra.mrb[200].mxu0 %v15043_v57  ;;  %v10932_v27 = vld [vmem:[%s14912_s7 + $0xb38] ss:$28 sps:$4 sm:$0xff]  }
 0x492   : > { %7908 = vmatpush1.bf16.msra.mxu1 %v10905_v38  ;;  %7915 = vmatprep.mubr.bf16.mxu1 %v15040_v33  ;;  %v14476_v33 = vld [vmem:[%s14913_s8] sm:$0x7f] }
 0x493   : > { %8309 = vmatprep.mubr.bf16.mxu0 %v15044_v28  ;;  %7909 = vmatprep.subr.bf16.mxu1 %v10910_v26  ;;  %v14488_v35 = vrot.slane %v14476_v33, %v15050_v24  ;;  %v14503_v34 = vrot.slane %v14476_v33, %v15053_v25  ;;  %v10942_v38 = vld [vmem:[%s14912_s7 + $0xba8] ss:$28 sps:$4 sm:$0xff]  }
 0x494   : > { %9576 = vmatprep.subr.bf16.mxu0 %v10930_v30  ;;  %v10949_v30 = vld [vmem:[%s14912_s7 + $0xbe4] ss:$28 sps:$4 sm:$0xff]  }
 0x495   : > { %9577 = vmatpush3.bf16.msra.mxu0 %v10931_v39 }
 0x496   : > { %7910 = vmatpush1.bf16.msra.mxu1 %v10908_v62  ;;  %9578 = vmatprep.subr.bf16.mxu0 %v10935_v1 }
 0x497   : > { %7911 = vmatprep.subr.bf16.mxu1 %v10913_v32 }
 0x499   : > { %8310 = vmatmul.mubr.bf16.gmra.mrb[204].mxu0 %v15045_v52 }
 0x49a   : > { %7912 = vmatpush1.bf16.msra.mxu1 %v10911_v40  ;;  %8317 = vmatprep.mubr.bf16.mxu0 %v15046_v58 }
 0x49b   : > { %7913 = vmatprep.subr.bf16.mxu1 %v10916_v20  ;;  %9579 = vmatpush3.bf16.msra.mxu0 %v10936_v21 }
 0x49c   : > { %9580 = vmatprep.subr.bf16.mxu0 %v10940_v15 }
 0x49e   : > { %7914 = vmatpush1.bf16.msra.mxu1 %v10914_v22 }
 0x49f   : > { %7984 = vmatprep.subr.bf16.mxu1 %v10919_v8  ;;  %9581 = vmatpush3.bf16.msra.mxu0 %v10941_v11 }
 0x4a0   : > { %9582 = vmatprep.subr.bf16.mxu0 %v10945_v44  ;;  %v10954_v44 = vld [vmem:[%s14912_s7 + $0xc1c] ss:$28 sps:$4 sm:$0xff]  }
 0x4a1   : > { %7916 = vmatmul.mubr.bf16.vlgmr.msra.gmra.mrb[112].mxu1 %v15041_v46  ;;  %8318 = vmatmul.mubr.bf16.gmra.mrb[208].mxu0 %v15047_v23  ;;  %v15051_v46 = vld [vmem:[#allocation8_spill] sm:$0xff] }
 0x4a2   : > { %7925 = vmatprep.mubr.bf16.mxu1 %v15042_v13  ;;  %7985 = vmatpush1.bf16.msra.mxu1 %v10917_v45  ;;  %v14494_v55 = vrot.slane %v14476_v33, %v15051_v46  ;;  %v14498_v13 = vrot.slane %v14476_v33, %v15052_v16  ;;  %v10962_v16 = vld [vmem:[%s14912_s7 + $0xc8c] ss:$28 sps:$4 sm:$0xff]  }
 0x4a3   : > { %8325 = vmatprep.mubr.bf16.mxu0 %v15048_v18  ;;  %7986 = vmatprep.subr.bf16.mxu1 %v10924_v0  ;;  %v10952_v0 = vld [vmem:[%s14912_s7 + $0xc18] ss:$28 sps:$4 sm:$0xff]  }
 0x4a4   : > { %9583 = vmatpush3.bf16.msra.mxu0 %v10946_v12 }
 0x4a5   : > { %9584 = vmatprep.subr.bf16.mxu0 %v10950_v31 }
 0x4a6   : > { %7987 = vmatpush1.bf16.msra.mxu1 %v10922_v37 }
 0x4a7   : > { %7988 = vmatprep.subr.bf16.mxu1 %v10929_v41 }
 0x4a8   : > { %9585 = vmatpush3.bf16.msra.mxu0 %v10951_v47 }
 0x4a9   : > { %7926 = vmatmul.mubr.bf16.gmra.mrb[116].mxu1 %v15043_v57  ;;  %8326 = vmatmul.mubr.bf16.gmra.mrb[212].mxu0 %v15049_v19 }
 0x4aa   : > { %7935 = vmatprep.mubr.bf16.mxu1 %v15044_v28  ;;  %7989 = vmatpush1.bf16.msra.mxu1 %v10927_v7 }
 0x4ab   : > { %8333 = vmatprep.mubr.bf16.mxu0 %v13772_v4  ;;  %7990 = vmatprep.subr.bf16.mxu1 %v10934_v43 }
 0x4ac   : > { %9586 = vmatprep.subr.bf16.mxu0 %v10955_v17 }
 0x4ad   : > { %9587 = vmatpush3.bf16.msra.mxu0 %v10956_v9 }
 0x4ae   : > { %7991 = vmatpush1.bf16.msra.mxu1 %v10932_v27 }
 0x4af   : > { %7992 = vmatprep.subr.bf16.mxu1 %v10939_v60 }
 0x4b1   : > { %7936 = vmatmul.mubr.bf16.gmra.mrb[120].mxu1 %v15045_v52  ;;  %8334 = vmatmul.mubr.bf16.gmra.mrb[216].mxu0 %v13762_v6 }
 0x4b2   : > { %7945 = vmatprep.mubr.bf16.mxu1 %v15046_v58  ;;  %7993 = vmatpush1.bf16.msra.mxu1 %v10937_v50  ;;  %v10947_v58 = vld [vmem:[%s14912_s7 + $0xbe0] ss:$28 sps:$4 sm:$0xff]   ;;  %v10957_v50 = vld [vmem:[%s14912_s7 + $0xc50] ss:$28 sps:$4 sm:$0xff]  }
 0x4b3   : > { %8341 = vmatprep.mubr.bf16.mxu0 %v13801_v29  ;;  %v7210_v26 = vpop.f32.mrb[84].mxu1  ;;  %7994 = vmatprep.subr.bf16.mxu1 %v10944_v51 }
 0x4b4   : > { %v9734_v57 = vadd.f32 %v7210_v26, %v14488_v35  ;;  %v7614_v39 = vpop.f32.mrb[112].mxu0  ;;  %v7212_v62 = vpop.f32.mrb[85].mxu1 }
 0x4b5   : > { %v9760_v1 = vadd.f32 %v7614_v39, %v14494_v55  ;;  %v9735_v28 = vadd.f32 %v7212_v62, %v14498_v13  ;;  %v7616_v32 = vpop.f32.mrb[113].mxu0  ;;  %v7214_v40 = vpop.f32.mrb[86].mxu1 }
 0x4b6   : > { %8437 = vst [vmem:[%s14515_s29] sm:$0xff] %v9734_v57  ;;  %v9761_v20 = vadd.f32 %v7616_v32, %v14503_v34  ;;  %v9736_v21 = vadd.f32 %v7214_v40, %v14488_v35  ;;  %v7618_v15 = vpop.f32.mrb[114].mxu0  ;;  %7995 = vmatpush1.bf16.msra.mxu1 %v10942_v38  ;;  %v7216_v52 = vpop.f32.mrb[87].mxu1  ;;  %v10960_v38 = vld [vmem:[%s14912_s7 + $0xc88] ss:$28 sps:$4 sm:$0xff]  }
 0x4b7   : > { %8439 = vst [vmem:[%s14515_s29 + $0x10] sm:$0xff] %v9760_v1  ;;  %8438 = vst [vmem:[%s14515_s29 + $0x8] sm:$0xff] %v9735_v28  ;;  %v9762_v22 = vadd.f32 %v7618_v15, %v14494_v55  ;;  %v9737_v8 = vadd.f32 %v7216_v52, %v14498_v13  ;;  %v7620_v11 = vpop.f32.mrb[115].mxu0  ;;  %7996 = vmatprep.subr.bf16.mxu1 %v10949_v30  ;;  %v10963_v15 = vld [vmem:[%s14912_s7 + $0xcc0] ss:$28 sps:$4 sm:$0xff]  }
 0x4b8   : > { %8440 = vst [vmem:[%s14515_s29 + $0x18] sm:$0xff] %v9761_v20  ;;  %8445 = vst [vmem:[%s14515_s29 + $0x38] sm:$0xff] %v9736_v21  ;;  %v9763_v45 = vadd.f32 %v7620_v11, %v14503_v34 }
 0x4b9   : > { %8447 = vst [vmem:[%s14515_s29 + $0x48] sm:$0xff] %v9762_v22  ;;  %8446 = vst [vmem:[%s14515_s29 + $0x40] sm:$0xff] %v9737_v8  ;;  %7946 = vmatmul.mubr.bf16.gmra.mrb[124].mxu1 %v15047_v23  ;;  %8342 = vmatmul.mubr.bf16.gmra.mrb[220].mxu0 %v13813_v14  ;;  %v10959_v23 = vld [vmem:[%s14912_s7 + $0xc54] ss:$28 sps:$4 sm:$0xff]   ;;  %v10968_v8 = vld [vmem:[%s14912_s7 + $0xcfc] ss:$28 sps:$4 sm:$0xff]  }
 0x4ba   : > { %8448 = vst [vmem:[%s14515_s29 + $0x50] sm:$0xff] %v9763_v45  ;;  %7955 = vmatprep.mubr.bf16.mxu1 %v15048_v18  ;;  %7997 = vmatpush1.bf16.msra.mxu1 %v10947_v58 }
 0x4bb   : > { %8381 = vmatprep.mubr.bf16.mxu0 %v13563_v10  ;;  %v7220_v12 = vpop.f32.mrb[88].mxu1  ;;  %7998 = vmatprep.subr.bf16.mxu1 %v10954_v44  ;;  %v10966_v44 = vld [vmem:[%s14912_s7 + $0xcf8] ss:$28 sps:$4 sm:$0xff]  }
 0x4bc   : > { %v9738_v31 = vadd.f32 %v7220_v12, %v14488_v35  ;;  %v7624_v37 = vpop.f32.mrb[116].mxu0  ;;  %v7222_v41 = vpop.f32.mrb[89].mxu1 }
 0x4bd   : > { %v9764_v18 = vadd.f32 %v7624_v37, %v14494_v55  ;;  %v9739_v47 = vadd.f32 %v7222_v41, %v14498_v13  ;;  %v7626_v7 = vpop.f32.mrb[117].mxu0  ;;  %v7224_v43 = vpop.f32.mrb[90].mxu1 }
 0x4be   : > { %8452 = vst [vmem:[%s14515_s29 + $0x70] sm:$0xff] %v9738_v31  ;;  %v9765_v17 = vadd.f32 %v7626_v7, %v14503_v34  ;;  %v9740_v9 = vadd.f32 %v7224_v43, %v14488_v35  ;;  %v7628_v27 = vpop.f32.mrb[118].mxu0  ;;  %7999 = vmatpush1.bf16.msra.mxu1 %v10952_v0  ;;  %v7226_v60 = vpop.f32.mrb[91].mxu1 }
 0x4bf   : > { %8454 = vst [vmem:[%s14515_s29 + $0x80] sm:$0xff] %v9764_v18  ;;  %8453 = vst [vmem:[%s14515_s29 + $0x78] sm:$0xff] %v9739_v47  ;;  %v9766_v51 = vadd.f32 %v7628_v27, %v14494_v55  ;;  %v9741_v24 = vadd.f32 %v7226_v60, %v14498_v13  ;;  %v7630_v46 = vpop.f32.mrb[119].mxu0  ;;  %8000 = vmatprep.subr.bf16.mxu1 %v10959_v23 }
 0x4c0   : > { %8455 = vst [vmem:[%s14515_s29 + $0x88] sm:$0xff] %v9765_v17  ;;  %8459 = vst [vmem:[%s14515_s29 + $0xa8] sm:$0xff] %v9740_v9  ;;  %v9767_v25 = vadd.f32 %v7630_v46, %v14503_v34  ;;  %v10969_v17 = vld [vmem:[%s14912_s7 + $0xd30] ss:$28 sps:$4 sm:$0xff]  }
 0x4c1   : > { %8461 = vst [vmem:[%s14515_s29 + $0xb8] sm:$0xff] %v9766_v51  ;;  %8460 = vst [vmem:[%s14515_s29 + $0xb0] sm:$0xff] %v9741_v24  ;;  %7956 = vmatmul.mubr.bf16.gmra.mrb[128].mxu1 %v15049_v19  ;;  %8382 = vmatmul.mubr.bf16.vlgmr.msra.gmra.mrb[224].mxu0 %v13551_v49  ;;  %v10965_v19 = vld [vmem:[%s14912_s7 + $0xcc4] ss:$28 sps:$4 sm:$0xff]  }
 0x4c2   : > { %8462 = vst [vmem:[%s14515_s29 + $0xc0] sm:$0xff] %v9767_v25  ;;  %7965 = vmatprep.mubr.bf16.mxu1 %v13772_v4  ;;  %8001 = vmatpush1.bf16.msra.mxu1 %v10957_v50  ;;  %v10974_v50 = vld [vmem:[%s14912_s7 + $0xd6c] ss:$28 sps:$4 sm:$0xff]  }
 0x4c3   : > { %8389 = vmatprep.mubr.bf16.mxu0 %v13607_v5  ;;  %v7230_v26 = vpop.f32.mrb[92].mxu1  ;;  %8002 = vmatprep.subr.bf16.mxu1 %v10962_v16  ;;  %v10972_v24 = vld [vmem:[%s14912_s7 + $0xd68] ss:$28 sps:$4 sm:$0xff]  }
 0x4c4   : > { %v9742_v30 = vadd.f32 %v7230_v26, %v14488_v35  ;;  %v7634_v57 = vpop.f32.mrb[120].mxu0  ;;  %v7232_v39 = vpop.f32.mrb[93].mxu1 }
 0x4c5   : > { %v9768_v4 = vadd.f32 %v7634_v57, %v14494_v55  ;;  %v9743_v62 = vadd.f32 %v7232_v39, %v14498_v13  ;;  %v7636_v1 = vpop.f32.mrb[121].mxu0  ;;  %v7234_v28 = vpop.f32.mrb[94].mxu1 }
 0x4c6   : > { %8466 = vst [vmem:[%s14515_s29 + $0xe0] sm:$0xff] %v9742_v30  ;;  %v9769_v32 = vadd.f32 %v7636_v1, %v14503_v34  ;;  %v9744_v40 = vadd.f32 %v7234_v28, %v14488_v35  ;;  %v7638_v20 = vpop.f32.mrb[122].mxu0  ;;  %8003 = vmatpush1.bf16.msra.mxu1 %v10960_v38  ;;  %v7236_v21 = vpop.f32.mrb[95].mxu1  ;;  %v10975_v1 = vld [vmem:[%s14912_s7 + $0xda0] ss:$28 sps:$4 sm:$0xff]  }
 0x4c7   : > { %8468 = vst [vmem:[%s14515_s29 + $0xf0] sm:$0xff] %v9768_v4  ;;  %8467 = vst [vmem:[%s14515_s29 + $0xe8] sm:$0xff] %v9743_v62  ;;  %v9770_v52 = vadd.f32 %v7638_v20, %v14494_v55  ;;  %v9745_v58 = vadd.f32 %v7236_v21, %v14498_v13  ;;  %v7640_v22 = vpop.f32.mrb[123].mxu0  ;;  %8004 = vmatprep.subr.bf16.mxu1 %v10965_v19  ;;  %v10980_v20 = vld [vmem:[%s14912_s7 + $0xddc] ss:$28 sps:$4 sm:$0xff]  }
 0x4c8   : > { %8469 = vst [vmem:[%s14515_s29 + $0xf8] sm:$0xff] %v9769_v32  ;;  %8473 = vst [vmem:[%s14515_s29 + $0x118] sm:$0xff] %v9744_v40  ;;  %v9771_v11 = vadd.f32 %v7640_v22, %v14503_v34 }
 0x4c9   : > { %8475 = vst [vmem:[%s14515_s29 + $0x128] sm:$0xff] %v9770_v52  ;;  %8474 = vst [vmem:[%s14515_s29 + $0x120] sm:$0xff] %v9745_v58  ;;  %7966 = vmatmul.mubr.bf16.gmra.mrb[132].mxu1 %v13762_v6  ;;  %8390 = vmatmul.mubr.bf16.gmra.mrb[228].mxu0 %v13595_v2  ;;  %v10971_v6 = vld [vmem:[%s14912_s7 + $0xd34] ss:$28 sps:$4 sm:$0xff]  }
 0x4ca   : > { %8476 = vst [vmem:[%s14515_s29 + $0x130] sm:$0xff] %v9771_v11  ;;  %7975 = vmatprep.mubr.bf16.mxu1 %v13801_v29  ;;  %8005 = vmatpush1.bf16.msra.mxu1 %v10963_v15  ;;  %v10978_v15 = vld [vmem:[%s14912_s7 + $0xdd8] ss:$28 sps:$4 sm:$0xff]  }
 0x4cb   : > { %8397 = vmatprep.mubr.bf16.mxu0 %v13651_v36  ;;  %v7240_v45 = vpop.f32.mrb[96].mxu1  ;;  %8006 = vmatprep.subr.bf16.mxu1 %v10968_v8 }
 0x4cc   : > { %v9746_v0 = vadd.f32 %v7240_v45, %v14488_v35  ;;  %v7644_v12 = vpop.f32.mrb[124].mxu0  ;;  %v7242_v23 = vpop.f32.mrb[97].mxu1 }
 0x4cd   : > { %v9772_v29 = vadd.f32 %v7644_v12, %v14494_v55  ;;  %v9747_v31 = vadd.f32 %v7242_v23, %v14498_v13  ;;  %v7646_v37 = vpop.f32.mrb[125].mxu0  ;;  %v7244_v41 = vpop.f32.mrb[98].mxu1 }
 0x4ce   : > { %8480 = vst [vmem:[%s14515_s29 + $0x150] sm:$0xff] %v9746_v0  ;;  %v9773_v18 = vadd.f32 %v7646_v37, %v14503_v34  ;;  %v9748_v47 = vadd.f32 %v7244_v41, %v14488_v35  ;;  %v7648_v7 = vpop.f32.mrb[126].mxu0  ;;  %8007 = vmatpush1.bf16.msra.mxu1 %v10966_v44  ;;  %v7246_v43 = vpop.f32.mrb[99].mxu1 }
 0x4cf   : > { %8482 = vst [vmem:[%s14515_s29 + $0x160] sm:$0xff] %v9772_v29  ;;  %8481 = vst [vmem:[%s14515_s29 + $0x158] sm:$0xff] %v9747_v31  ;;  %v9774_v9 = vadd.f32 %v7648_v7, %v14494_v55  ;;  %v9749_v27 = vadd.f32 %v7246_v43, %v14498_v13  ;;  %v7650_v60 = vpop.f32.mrb[127].mxu0  ;;  %8008 = vmatprep.subr.bf16.mxu1 %v10971_v6 }
 0x4d0   : > { %8483 = vst [vmem:[%s14515_s29 + $0x168] sm:$0xff] %v9773_v18  ;;  %8487 = vst [vmem:[%s14515_s29 + $0x188] sm:$0xff] %v9748_v47  ;;  %v9775_v51 = vadd.f32 %v7650_v60, %v14503_v34 }
 0x4d1   : > { %8489 = vst [vmem:[%s14515_s29 + $0x198] sm:$0xff] %v9774_v9  ;;  %8488 = vst [vmem:[%s14515_s29 + $0x190] sm:$0xff] %v9749_v27  ;;  %7976 = vmatmul.mubr.bf16.gmra.mrb[136].mxu1 %v13813_v14  ;;  %8398 = vmatmul.mubr.bf16.gmra.mrb[232].mxu0 %v13639_v61  ;;  %v10977_v14 = vld [vmem:[%s14912_s7 + $0xda4] ss:$28 sps:$4 sm:$0xff]  }
 0x4d2   : > { %8490 = vst [vmem:[%s14515_s29 + $0x1a0] sm:$0xff] %v9775_v51  ;;  %8009 = vmatpush1.bf16.msra.mxu1 %v10969_v17  ;;  %8016 = vmatprep.mubr.bf16.mxu1 %v13563_v10 }
 0x4d3   : > { %8405 = vmatprep.mubr.bf16.mxu0 %v13695_v42  ;;  %v7250_v46 = vpop.f32.mrb[100].mxu1  ;;  %8010 = vmatprep.subr.bf16.mxu1 %v10974_v50 }
 0x4d4   : > { %v9750_v16 = vadd.f32 %v7250_v46, %v14488_v35  ;;  %v7654_v25 = vpop.f32.mrb[128].mxu0  ;;  %v7252_v38 = vpop.f32.mrb[101].mxu1 }
 0x4d5   : > { %v9776_v10 = vadd.f32 %v7654_v25, %v14494_v55  ;;  %v9751_v26 = vadd.f32 %v7252_v38, %v14498_v13  ;;  %v7656_v19 = vpop.f32.mrb[129].mxu0  ;;  %v7254_v30 = vpop.f32.mrb[102].mxu1 }
 0x4d6   : > { %8494 = vst [vmem:[%s14515_s29 + $0x1c0] sm:$0xff] %v9750_v16  ;;  %v9777_v57 = vadd.f32 %v7656_v19, %v14503_v34  ;;  %v9752_v39 = vadd.f32 %v7254_v30, %v14488_v35  ;;  %v7658_v4 = vpop.f32.mrb[130].mxu0  ;;  %8011 = vmatpush1.bf16.msra.mxu1 %v10972_v24  ;;  %v7256_v62 = vpop.f32.mrb[103].mxu1 }
 0x4d7   : > { %8496 = vst [vmem:[%s14515_s29 + $0x1d0] sm:$0xff] %v9776_v10  ;;  %8495 = vst [vmem:[%s14515_s29 + $0x1c8] sm:$0xff] %v9751_v26  ;;  %v9778_v28 = vadd.f32 %v7658_v4, %v14494_v55  ;;  %v9753_v32 = vadd.f32 %v7256_v62, %v14498_v13  ;;  %v7660_v40 = vpop.f32.mrb[131].mxu0  ;;  %8012 = vmatprep.subr.bf16.mxu1 %v10977_v14 }
 0x4d8   : > { %8497 = vst [vmem:[%s14515_s29 + $0x1d8] sm:$0xff] %v9777_v57  ;;  %8501 = vst [vmem:[%s14515_s29 + $0x1f8] sm:$0xff] %v9752_v39  ;;  %v9779_v21 = vadd.f32 %v7660_v40, %v14503_v34 }
 0x4d9   : > { %8503 = vst [vmem:[%s14515_s29 + $0x208] sm:$0xff] %v9778_v28  ;;  %8502 = vst [vmem:[%s14515_s29 + $0x200] sm:$0xff] %v9753_v32  ;;  %8406 = vmatmul.mubr.bf16.gmra.mrb[236].mxu0 %v13683_v59 }
 0x4da   : > { %8504 = vst [vmem:[%s14515_s29 + $0x210] sm:$0xff] %v9779_v21  ;;  %8013 = vmatpush1.bf16.msra.mxu1 %v10975_v1  ;;  %8413 = vmatprep.mubr.bf16.mxu0 %v13739_v3 }
 0x4db   : > { %v7260_v52 = vpop.f32.mrb[104].mxu1  ;;  %8014 = vmatprep.subr.bf16.mxu1 %v10980_v20 }
 0x4dc   : > { %v9754_v58 = vadd.f32 %v7260_v52, %v14488_v35  ;;  %v7664_v22 = vpop.f32.mrb[132].mxu0  ;;  %v7262_v8 = vpop.f32.mrb[105].mxu1 }
 0x4dd   : > { %v9780_v11 = vadd.f32 %v7664_v22, %v14494_v55  ;;  %v9755_v44 = vadd.f32 %v7262_v8, %v14498_v13  ;;  %v7666_v45 = vpop.f32.mrb[133].mxu0  ;;  %v7264_v6 = vpop.f32.mrb[106].mxu1 }
 0x4de   : > { %8508 = vst [vmem:[%s14515_s29 + $0x230] sm:$0xff] %v9754_v58  ;;  %v9781_v0 = vadd.f32 %v7666_v45, %v14503_v34  ;;  %v9756_v12 = vadd.f32 %v7264_v6, %v14488_v35  ;;  %v7668_v23 = vpop.f32.mrb[134].mxu0  ;;  %8015 = vmatpush1.bf16.msra.mxu1 %v10978_v15  ;;  %v7266_v29 = vpop.f32.mrb[107].mxu1  ;;  %v15054_v6 = vld [vmem:[#allocation5_spill] sm:$0xff] }
 0x4df   : > { %8510 = vst [vmem:[%s14515_s29 + $0x240] sm:$0xff] %v9780_v11  ;;  %8509 = vst [vmem:[%s14515_s29 + $0x238] sm:$0xff] %v9755_v44  ;;  %v9782_v31 = vadd.f32 %v7668_v23, %v14494_v55  ;;  %v9757_v37 = vadd.f32 %v7266_v29, %v14498_v13  ;;  %v7670_v41 = vpop.f32.mrb[135].mxu0 }
 0x4e0   : > { %8511 = vst [vmem:[%s14515_s29 + $0x248] sm:$0xff] %v9781_v0  ;;  %8515 = vst [vmem:[%s14515_s29 + $0x268] sm:$0xff] %v9756_v12  ;;  %v9783_v18 = vadd.f32 %v7670_v41, %v14503_v34  ;;  %v15055_v0 = vsub.s32 6, %v15054_v6 }
 0x4e1   : > { %8517 = vst [vmem:[%s14515_s29 + $0x278] sm:$0xff] %v9782_v31  ;;  %8516 = vst [vmem:[%s14515_s29 + $0x270] sm:$0xff] %v9757_v37  ;;  %8017 = vmatmul.mubr.bf16.vlgmr.msra.gmra.mrb[112].mxu1 %v13551_v49  ;;  %8414 = vmatmul.mubr.bf16.gmra.mrb[240].mxu0 %v13727_v53 }
 0x4e2   : > { %8518 = vst [vmem:[%s14515_s29 + $0x280] sm:$0xff] %v9783_v18  ;;  %8026 = vmatprep.mubr.bf16.mxu1 %v13607_v5  ;;  %8421 = vmatprep.mubr.bf16.mxu0 %v13783_v48  ;;  %v14718_v12 = vrot.slane %v14476_v33, %v15055_v0 }
 0x4e3   : > { %v7270_v47 = vpop.f32.mrb[108].mxu1 }
 0x4e4   : > { %v9758_v7 = vadd.f32 %v7270_v47, %v14488_v35  ;;  %v7674_v43 = vpop.f32.mrb[136].mxu0  ;;  %v7272_v17 = vpop.f32.mrb[109].mxu1 }
 0x4e5   : > { %v9784_v9 = vadd.f32 %v7674_v43, %v14494_v55  ;;  %v9759_v27 = vadd.f32 %v7272_v17, %v14498_v13  ;;  %v7676_v49 = vpop.f32.mrb[137].mxu0  ;;  %v7274_v60 = vpop.f32.mrb[110].mxu1 }
 0x4e6   : > { %8522 = vst [vmem:[%s14515_s29 + $0x2a0] sm:$0xff] %v9758_v7  ;;  %v9785_v50 = vadd.f32 %v7676_v49, %v14503_v34  ;;  %v7678_v51 = vpop.f32.mrb[138].mxu0  ;;  %v7275_v24 = vpop.f32.mrb[111].mxu1 }
 0x4e7   : > { %8524 = vst [vmem:[%s14515_s29 + $0x2b0] sm:$0xff] %v9784_v9  ;;  %8523 = vst [vmem:[%s14515_s29 + $0x2a8] sm:$0xff] %v9759_v27  ;;  %v7679_v5 = vpop.f32.mrb[139].mxu0 }
 0x4e8   : > { %8525 = vst [vmem:[%s14515_s29 + $0x2b8] sm:$0xff] %v9785_v50 }
 0x4e9   : > { %8027 = vmatmul.mubr.bf16.gmra.mrb[116].mxu1 %v13595_v2  ;;  %8422 = vmatmul.mubr.bf16.gmra.mrb[244].mxu0 %v13770_v54 }
 0x4ea   : > { %8036 = vmatprep.mubr.bf16.mxu1 %v13651_v36  ;;  %8429 = vmatprep.mubr.bf16.mxu0 %v14000_v56 }
 0x4ec   : > { %v9414_v35 = vpop.f32.mrb[140].mxu0 }
 0x4ed   : > { %v9415_v55 = vpop.f32.mrb[141].mxu0 }
 0x4ee   : > { %v9416_v13 = vadd.f32 %v9415_v55, %v9414_v35  ;;  %v9417_v46 = vpop.f32.mrb[142].mxu0 }
 0x4ef   : > { %v9418_v14 = vpop.f32.mrb[143].mxu0 }
 0x4f0   : > { %v9419_v34 = vadd.f32 %v9418_v14, %v9417_v46  ;;  %v8120_v29 = vadd.f32 %v9416_v13, %v14718_v12 }
 0x4f1   : > { %8037 = vmatmul.mubr.bf16.gmra.mrb[120].mxu1 %v13639_v61  ;;  %8430 = vmatmul.mubr.bf16.gmra.mrb[248].mxu0 %v14015_v63 }
 0x4f2   : > { %8046 = vmatprep.mubr.bf16.mxu1 %v13695_v42  ;;  %v8123_v18 = vadd.f32 %v9419_v34, %v14718_v12 }
 0x4f4   : > { %v9420_v16 = vpop.f32.mrb[144].mxu0 }
 0x4f5   : > { %v9421_v2 = vpop.f32.mrb[145].mxu0 }
 0x4f6   : > { %v9422_v25 = vadd.f32 %v9421_v2, %v9420_v16  ;;  %v9423_v38 = vpop.f32.mrb[146].mxu0 }
 0x4f7   : > { %v9424_v10 = vpop.f32.mrb[147].mxu0 }
 0x4f8   : > { %v9425_v36 = vadd.f32 %v9424_v10, %v9423_v38  ;;  %v8128_v27 = vadd.f32 %v9422_v25, %v14718_v12 }
 0x4f9   : > { %8047 = vmatmul.mubr.bf16.gmra.mrb[124].mxu1 %v13683_v59 }
 0x4fa   : > { %8056 = vmatprep.mubr.bf16.mxu1 %v13739_v3  ;;  %v8131_v51 = vadd.f32 %v9425_v36, %v14718_v12 }
 0x4fc   : > { %v9426_v26 = vpop.f32.mrb[148].mxu0 }
 0x4fd   : > { %v9427_v19 = vpop.f32.mrb[149].mxu0 }
 0x4fe   : > { %v9428_v30 = vadd.f32 %v9427_v19, %v9426_v26  ;;  %v9429_v57 = vpop.f32.mrb[150].mxu0 }
 0x4ff   : > { %v9430_v39 = vpop.f32.mrb[151].mxu0 }
 0x500   : > { %v9431_v61 = vadd.f32 %v9430_v39, %v9429_v57  ;;  %v8136_v46 = vadd.f32 %v9428_v30, %v14718_v12 }
 0x501   : > { %8057 = vmatmul.mubr.bf16.gmra.mrb[128].mxu1 %v13727_v53 }
 0x502   : > { %8066 = vmatprep.mubr.bf16.mxu1 %v13783_v48  ;;  %v8139_v2 = vadd.f32 %v9431_v61, %v14718_v12 }
 0x504   : > { %v9432_v42 = vpop.f32.mrb[152].mxu0 }
 0x505   : > { %v9433_v4 = vpop.f32.mrb[153].mxu0 }
 0x506   : > { %v9434_v62 = vadd.f32 %v9433_v4, %v9432_v42  ;;  %v9435_v1 = vpop.f32.mrb[154].mxu0 }
 0x507   : > { %v9436_v28 = vpop.f32.mrb[155].mxu0 }
 0x508   : > { %v9437_v32 = vadd.f32 %v9436_v28, %v9435_v1  ;;  %v8144_v36 = vadd.f32 %v9434_v62, %v14718_v12 }
 0x509   : > { %8067 = vmatmul.mubr.bf16.gmra.mrb[132].mxu1 %v13770_v54 }
 0x50a   : > { %8076 = vmatprep.mubr.bf16.mxu1 %v14000_v56  ;;  %v8147_v4 = vadd.f32 %v9437_v32, %v14718_v12 }
 0x50c   : > { %v9438_v59 = vpop.f32.mrb[156].mxu0 }
 0x50d   : > { %v9439_v3 = vpop.f32.mrb[157].mxu0 }
 0x50e   : > { %v9440_v40 = vadd.f32 %v9439_v3, %v9438_v59  ;;  %v9441_v20 = vpop.f32.mrb[158].mxu0 }
 0x50f   : > { %v9442_v21 = vpop.f32.mrb[159].mxu0 }
 0x510   : > { %v9443_v15 = vadd.f32 %v9442_v21, %v9441_v20  ;;  %v8152_v20 = vadd.f32 %v9440_v40, %v14718_v12 }
 0x511   : > { %8077 = vmatmul.mubr.bf16.gmra.mrb[136].mxu1 %v14015_v63 }
 0x514   : > { %v9444_v53 = vpop.f32.mrb[160].mxu0 }
 0x515   : > { %v9445_v48 = vpop.f32.mrb[161].mxu0 }
 0x516   : > { %v9446_v52 = vadd.f32 %v9445_v48, %v9444_v53  ;;  %v9447_v58 = vpop.f32.mrb[162].mxu0  ;;  %v8155_v48 = vadd.f32 %v9443_v15, %v14718_v12 }
 0x517   : > { %v9448_v22 = vpop.f32.mrb[163].mxu0 }
 0x518   : > { %v14711_v8 = vadd.f32 %v9448_v22, %v9447_v58 }
 0x51c   : > { %v9450_v11 = vpop.f32.mrb[164].mxu0 }
 0x51d   : > { %v9451_v44 = vpop.f32.mrb[165].mxu0 }
 0x51e   : > { %v14713_v54 = vadd.f32 %v9451_v44, %v9450_v11  ;;  %v9453_v56 = vpop.f32.mrb[166].mxu0 }
 0x51f   : > { %v9454_v45 = vpop.f32.mrb[167].mxu0  ;;  %v8160_v56 = vadd.f32 %v9446_v52, %v14718_v12 }
 0x520   : > { %v8168_v15 = vadd.f32 %v14713_v54, %v14718_v12 }
 0x524   : > { %v9472_v23 = vpop.f32.mrb[168].mxu0 }
 0x525   : > { %v9473_v63 = vpop.f32.mrb[169].mxu0 }
 0x526   : > { %v9474_v31 = vadd.f32 %v9473_v63, %v9472_v23  ;;  %v9475_v37 = vpop.f32.mrb[170].mxu0  ;;  %v8163_v23 = vadd.f32 %v14711_v8, %v14718_v12 }
 0x527   : > { %v9476_v41 = vpop.f32.mrb[171].mxu0 }
 0x528   : > { %v14722_v47 = vadd.f32 %v9474_v31, %v8120_v29  ;;  %v9477_v7 = vadd.f32 %v9476_v41, %v9475_v37 }
 0x52a   : > { %v14724_v43 = vadd.f32 %v9477_v7, %v8123_v18 }
 0x52c   : > { %v9478_v17 = vpop.f32.mrb[172].mxu0 }
 0x52d   : > { %v9479_v9 = vpop.f32.mrb[173].mxu0 }
 0x52e   : > { %v9480_v49 = vadd.f32 %v9479_v9, %v9478_v17  ;;  %v9481_v60 = vpop.f32.mrb[174].mxu0 }
 0x52f   : > { %v9482_v50 = vpop.f32.mrb[175].mxu0 }
 0x530   : > { %v14728_v24 = vadd.f32 %v9480_v49, %v8128_v27  ;;  %v9483_v5 = vadd.f32 %v9482_v50, %v9481_v60 }
 0x532   : > { %v14730_v35 = vadd.f32 %v9483_v5, %v8131_v51 }
 0x534   : > { %v9484_v55 = vpop.f32.mrb[176].mxu0 }
 0x535   : > { %v9485_v13 = vpop.f32.mrb[177].mxu0 }
 0x536   : > { %v9486_v14 = vadd.f32 %v9485_v13, %v9484_v55  ;;  %v9487_v34 = vpop.f32.mrb[178].mxu0 }
 0x537   : > { %v9488_v16 = vpop.f32.mrb[179].mxu0 }
 0x538   : > { %v8224_v25 = vadd.f32 %v9486_v14, %v8136_v46  ;;  %v9489_v38 = vadd.f32 %v9488_v16, %v9487_v34 }
 0x53a   : > { %v8227_v10 = vadd.f32 %v9489_v38, %v8139_v2 }
 0x53c   : > { %v9490_v26 = vpop.f32.mrb[180].mxu0 }
 0x53d   : > { %v9491_v19 = vpop.f32.mrb[181].mxu0 }
 0x53e   : > { %v9492_v57 = vadd.f32 %v9491_v19, %v9490_v26  ;;  %v9493_v39 = vpop.f32.mrb[182].mxu0 }
 0x53f   : > { %v9494_v42 = vpop.f32.mrb[183].mxu0 }
 0x540   : > { %v8232_v1 = vadd.f32 %v9492_v57, %v8144_v36  ;;  %v9495_v28 = vadd.f32 %v9494_v42, %v9493_v39 }
 0x542   : > { %v8235_v30 = vadd.f32 %v9495_v28, %v8147_v4 }
 0x544   : > { %v9496_v59 = vpop.f32.mrb[184].mxu0 }
 0x545   : > { %v9497_v3 = vpop.f32.mrb[185].mxu0 }
 0x546   : > { %v9498_v61 = vadd.f32 %v9497_v3, %v9496_v59  ;;  %v9499_v21 = vpop.f32.mrb[186].mxu0 }
 0x547   : > { %v9500_v53 = vpop.f32.mrb[187].mxu0 }
 0x548   : > { %v8240_v58 = vadd.f32 %v9498_v61, %v8152_v20  ;;  %v9501_v22 = vadd.f32 %v9500_v53, %v9499_v21 }
 0x54a   : > { %v8243_v62 = vadd.f32 %v9501_v22, %v8155_v48 }
 0x54c   : > { %v9502_v11 = vpop.f32.mrb[188].mxu0 }
 0x54d   : > { %v9503_v44 = vpop.f32.mrb[189].mxu0 }
 0x54e   : > { %v9504_v32 = vadd.f32 %v9503_v44, %v9502_v11  ;;  %v9505_v45 = vpop.f32.mrb[190].mxu0 }
 0x54f   : > { %v9506_v0 = vpop.f32.mrb[191].mxu0 }
 0x550   : > { %v8248_v63 = vadd.f32 %v9504_v32, %v8160_v56  ;;  %v9507_v40 = vadd.f32 %v9506_v0, %v9505_v45 }
 0x552   : > { %v8251_v29 = vadd.f32 %v9507_v40, %v8163_v23 }
 0x554   : > { %v9508_v31 = vpop.f32.mrb[192].mxu0 }
 0x555   : > { %v9509_v37 = vpop.f32.mrb[193].mxu0 }
 0x556   : > { %v9510_v41 = vadd.f32 %v9509_v37, %v9508_v31  ;;  %v9511_v18 = vpop.f32.mrb[194].mxu0 }
 0x557   : > { %v9512_v7 = vpop.f32.mrb[195].mxu0 }
 0x558   : > { %v8256_v17 = vadd.f32 %v9510_v41, %v8168_v15 }
 0x55c   : > { %v9530_v9 = vpop.f32.mrb[196].mxu0 }
 0x55d   : > { %v9531_v52 = vpop.f32.mrb[197].mxu0 }
 0x55e   : > { %v9532_v27 = vadd.f32 %v9531_v52, %v9530_v9  ;;  %v9533_v49 = vpop.f32.mrb[198].mxu0 }
 0x55f   : > { %v9534_v60 = vpop.f32.mrb[199].mxu0 }
 0x560   : > { %v8296_v50 = vadd.f32 %v9532_v27, %v14722_v47  ;;  %v9535_v8 = vadd.f32 %v9534_v60, %v9533_v49 }
 0x562   : > { %v8299_v51 = vadd.f32 %v9535_v8, %v14724_v43 }
 0x564   : > { %v9536_v5 = vpop.f32.mrb[200].mxu0 }
 0x565   : > { %v9537_v55 = vpop.f32.mrb[201].mxu0 }
 0x566   : > { %v9538_v13 = vadd.f32 %v9537_v55, %v9536_v5  ;;  %v9539_v46 = vpop.f32.mrb[202].mxu0 }
 0x567   : > { %v9540_v14 = vpop.f32.mrb[203].mxu0 }
 0x568   : > { %v8304_v54 = vadd.f32 %v9538_v13, %v14728_v24  ;;  %v9541_v12 = vadd.f32 %v9540_v14, %v9539_v46 }
 0x56a   : > { %v8307_v34 = vadd.f32 %v9541_v12, %v14730_v35 }
 0x56c   : > { %v9542_v16 = vpop.f32.mrb[204].mxu0 }
 0x56d   : > { %v9543_v2 = vpop.f32.mrb[205].mxu0 }
 0x56e   : > { %v9544_v38 = vadd.f32 %v9543_v2, %v9542_v16  ;;  %v9545_v26 = vpop.f32.mrb[206].mxu0 }
 0x56f   : > { %v9546_v19 = vpop.f32.mrb[207].mxu0 }
 0x570   : > { %v8312_v36 = vadd.f32 %v9544_v38, %v8224_v25  ;;  %v9547_v47 = vadd.f32 %v9546_v19, %v9545_v26 }
 0x572   : > { %v8315_v57 = vadd.f32 %v9547_v47, %v8227_v10 }
 0x574   : > { %v9548_v39 = vpop.f32.mrb[208].mxu0 }
 0x575   : > { %v9549_v43 = vpop.f32.mrb[209].mxu0 }
 0x576   : > { %v9550_v42 = vadd.f32 %v9549_v43, %v9548_v39  ;;  %v9551_v4 = vpop.f32.mrb[210].mxu0  ;;  %v15056_v43 = vsub.s32 4, %v15054_v6 }
 0x577   : > { %v9552_v28 = vpop.f32.mrb[211].mxu0 }
 0x578   : > { %v8320_v59 = vadd.f32 %v9550_v42, %v8232_v1  ;;  %v9553_v3 = vadd.f32 %v9552_v28, %v9551_v4  ;;  %v14774_v42 = vrot.slane %v14476_v33, %v15056_v43 }
 0x57a   : > { %v14747_v20 = vadd.f32 %v9553_v3, %v8235_v30 }
 0x57c   : > { %v9554_v24 = vpop.f32.mrb[212].mxu0 }
 0x57d   : > { %v9555_v61 = vpop.f32.mrb[213].mxu0 }
 0x57e   : > { %v9556_v35 = vadd.f32 %v9555_v61, %v9554_v24  ;;  %v9557_v21 = vpop.f32.mrb[214].mxu0 }
 0x57f   : > { %v9558_v53 = vpop.f32.mrb[215].mxu0 }
 0x580   : > { %v14749_v48 = vadd.f32 %v9556_v35, %v8240_v58  ;;  %v9559_v22 = vadd.f32 %v9558_v53, %v9557_v21 }
 0x582   : > { %v14751_v25 = vadd.f32 %v9559_v22, %v8243_v62 }
 0x584   : > { %v9560_v10 = vpop.f32.mrb[216].mxu0 }
 0x585   : > { %v9561_v11 = vpop.f32.mrb[217].mxu0 }
 0x586   : > { %v9562_v44 = vadd.f32 %v9561_v11, %v9560_v10  ;;  %v9563_v56 = vpop.f32.mrb[218].mxu0 }
 0x587   : > { %v9564_v32 = vpop.f32.mrb[219].mxu0 }
 0x588   : > { %v14753_v45 = vadd.f32 %v9562_v44, %v8248_v63  ;;  %v9565_v1 = vadd.f32 %v9564_v32, %v9563_v56 }
 0x58a   : > { %v14755_v30 = vadd.f32 %v9565_v1, %v8251_v29 }
 0x58c   : > { %v9566_v0 = vpop.f32.mrb[220].mxu0 }
 0x58d   : > { %v9567_v23 = vpop.f32.mrb[221].mxu0 }
 0x58e   : > { %v9568_v40 = vadd.f32 %v9567_v23, %v9566_v0  ;;  %v9569_v58 = vpop.f32.mrb[222].mxu0 }
 0x58f   : > { %v9570_v31 = vpop.f32.mrb[223].mxu0 }
 0x590   : > { %v14757_v37 = vadd.f32 %v9568_v40, %v8256_v17 }
 0x594   : > { %v9588_v62 = vpop.f32.mrb[224].mxu0 }
 0x595   : > { %v9589_v15 = vpop.f32.mrb[225].mxu0 }
 0x596   : > { %v9590_v41 = vadd.f32 %v9589_v15, %v9588_v62  ;;  %v9591_v18 = vpop.f32.mrb[226].mxu0 }
 0x597   : > { %v9592_v63 = vpop.f32.mrb[227].mxu0 }
 0x598   : > { %v8384_v7 = vadd.f32 %v9590_v41, %v8296_v50  ;;  %v9593_v9 = vadd.f32 %v9592_v63, %v9591_v18 }
 0x59a   : > { %8444 = vst.msk [vmem:[%s14515_s29 + $0x30] sm:$0xff] %vm8443_vm0, %v8384_v7  ;;  %v8387_v29 = vadd.f32 %v9593_v9, %v8299_v51 }
 0x59c   : > { %8451 = vst.msk [vmem:[%s14515_s29 + $0x68] sm:$0xff] %vm8443_vm0, %v8387_v29  ;;  %v9594_v52 = vpop.f32.mrb[228].mxu0 }
 0x59d   : > { %v9595_v27 = vpop.f32.mrb[229].mxu0 }
 0x59e   : > { %v9596_v17 = vadd.f32 %v9595_v27, %v9594_v52  ;;  %v9597_v49 = vpop.f32.mrb[230].mxu0 }
 0x59f   : > { %v9598_v60 = vpop.f32.mrb[231].mxu0 }
 0x5a0   : > { %v8392_v8 = vadd.f32 %v9596_v17, %v8304_v54  ;;  %v9599_v5 = vadd.f32 %v9598_v60, %v9597_v49 }
 0x5a2   : > { %8458 = vst.msk [vmem:[%s14515_s29 + $0xa0] sm:$0xff] %vm8443_vm0, %v8392_v8  ;;  %v8395_v55 = vadd.f32 %v9599_v5, %v8307_v34 }
 0x5a4   : > { %8465 = vst.msk [vmem:[%s14515_s29 + $0xd8] sm:$0xff] %vm8443_vm0, %v8395_v55  ;;  %v9600_v50 = vpop.f32.mrb[232].mxu0 }
 0x5a5   : > { %v9601_v13 = vpop.f32.mrb[233].mxu0 }
 0x5a6   : > { %v9602_v46 = vadd.f32 %v9601_v13, %v9600_v50  ;;  %v9603_v51 = vpop.f32.mrb[234].mxu0 }
 0x5a7   : > { %v9604_v14 = vpop.f32.mrb[235].mxu0 }
 0x5a8   : > { %v8400_v12 = vadd.f32 %v9602_v46, %v8312_v36  ;;  %v9605_v16 = vadd.f32 %v9604_v14, %v9603_v51 }
 0x5aa   : > { %8472 = vst.msk [vmem:[%s14515_s29 + $0x110] sm:$0xff] %vm8443_vm0, %v8400_v12  ;;  %v8403_v2 = vadd.f32 %v9605_v16, %v8315_v57  ;;  %v15057_v57 = vsub.s32 5, %v15054_v6 }
 0x5ac   : > { %8479 = vst.msk [vmem:[%s14515_s29 + $0x148] sm:$0xff] %vm8443_vm0, %v8403_v2  ;;  %v9606_v54 = vpop.f32.mrb[236].mxu0  ;;  %v14782_v4 = vrot.slane %v14476_v33, %v15057_v57 }
 0x5ad   : > { %v9607_v38 = vpop.f32.mrb[237].mxu0 }
 0x5ae   : > { %v9608_v26 = vadd.f32 %v9607_v38, %v9606_v54  ;;  %v9609_v34 = vpop.f32.mrb[238].mxu0 }
 0x5af   : > { %v9610_v19 = vpop.f32.mrb[239].mxu0 }
 0x5b0   : > { %v8408_v47 = vadd.f32 %v9608_v26, %v8320_v59  ;;  %v9611_v39 = vadd.f32 %v9610_v19, %v9609_v34 }
 0x5b2   : > { %8486 = vst.msk [vmem:[%s14515_s29 + $0x180] sm:$0xff] %vm8443_vm0, %v8408_v47  ;;  %v8411_v36 = vadd.f32 %v9611_v39, %v14747_v20 }
 0x5b4   : > { %8493 = vst.msk [vmem:[%s14515_s29 + $0x1b8] sm:$0xff] %vm8443_vm0, %v8411_v36  ;;  %v8018_v28 = vpop.f32.mrb[112].mxu1  ;;  %v9612_v59 = vpop.f32.mrb[240].mxu0 }
 0x5b5   : > { %v9786_v3 = vadd.f32 %v8018_v28, %v14774_v42  ;;  %v8020_v24 = vpop.f32.mrb[113].mxu1  ;;  %v9613_v61 = vpop.f32.mrb[241].mxu0 }
 0x5b6   : > { %v9787_v35 = vadd.f32 %v8020_v24, %v14782_v4  ;;  %v9614_v20 = vadd.f32 %v9613_v61, %v9612_v59  ;;  %v8022_v6 = vpop.f32.mrb[114].mxu1  ;;  %v9615_v21 = vpop.f32.mrb[242].mxu0 }
 0x5b7   : > { %8441 = vst [vmem:[%s14515_s29 + $0x20] sm:$0xff] %v9786_v3  ;;  %v9788_v33 = vadd.f32 %v8022_v6, %v14774_v42  ;;  %v8024_v53 = vpop.f32.mrb[115].mxu1  ;;  %v9616_v22 = vpop.f32.mrb[243].mxu0 }
 0x5b8   : > { %8442 = vst [vmem:[%s14515_s29 + $0x28] sm:$0xff] %v9787_v35  ;;  %v8416_v10 = vadd.f32 %v9614_v20, %v14749_v48  ;;  %v9789_v11 = vadd.f32 %v8024_v53, %v14782_v4  ;;  %v9617_v44 = vadd.f32 %v9616_v22, %v9615_v21 }
 0x5b9   : > { %8449 = vst [vmem:[%s14515_s29 + $0x58] sm:$0xff] %v9788_v33 }
 0x5ba   : > { %8500 = vst.msk [vmem:[%s14515_s29 + $0x1f0] sm:$0xff] %vm8443_vm0, %v8416_v10  ;;  %8450 = vst [vmem:[%s14515_s29 + $0x60] sm:$0xff] %v9789_v11  ;;  %v8419_v56 = vadd.f32 %v9617_v44, %v14751_v25 }
 0x5bc   : > { %8507 = vst.msk [vmem:[%s14515_s29 + $0x228] sm:$0xff] %vm8443_vm0, %v8419_v56  ;;  %v8028_v32 = vpop.f32.mrb[116].mxu1  ;;  %v9618_v1 = vpop.f32.mrb[244].mxu0 }
 0x5bd   : > { %v9790_v0 = vadd.f32 %v8028_v32, %v14774_v42  ;;  %v8030_v48 = vpop.f32.mrb[117].mxu1  ;;  %v9619_v23 = vpop.f32.mrb[245].mxu0 }
 0x5be   : > { %v9791_v40 = vadd.f32 %v8030_v48, %v14782_v4  ;;  %v9620_v58 = vadd.f32 %v9619_v23, %v9618_v1  ;;  %v8032_v31 = vpop.f32.mrb[118].mxu1  ;;  %v9621_v62 = vpop.f32.mrb[246].mxu0 }
 0x5bf   : > { %8456 = vst [vmem:[%s14515_s29 + $0x90] sm:$0xff] %v9790_v0  ;;  %v9792_v25 = vadd.f32 %v8032_v31, %v14774_v42  ;;  %v8034_v15 = vpop.f32.mrb[119].mxu1  ;;  %v9622_v41 = vpop.f32.mrb[247].mxu0 }
 0x5c0   : > { %8457 = vst [vmem:[%s14515_s29 + $0x98] sm:$0xff] %v9791_v40  ;;  %v8424_v18 = vadd.f32 %v9620_v58, %v14753_v45  ;;  %v9793_v63 = vadd.f32 %v8034_v15, %v14782_v4  ;;  %v9623_v7 = vadd.f32 %v9622_v41, %v9621_v62 }
 0x5c1   : > { %8463 = vst [vmem:[%s14515_s29 + $0xc8] sm:$0xff] %v9792_v25 }
 0x5c2   : > { %8514 = vst.msk [vmem:[%s14515_s29 + $0x260] sm:$0xff] %vm8443_vm0, %v8424_v18  ;;  %8464 = vst [vmem:[%s14515_s29 + $0xd0] sm:$0xff] %v9793_v63  ;;  %v8427_v9 = vadd.f32 %v9623_v7, %v14755_v30 }
 0x5c4   : > { %8521 = vst.msk [vmem:[%s14515_s29 + $0x298] sm:$0xff] %vm8443_vm0, %v8427_v9  ;;  %v8038_v29 = vpop.f32.mrb[120].mxu1  ;;  %v9624_v52 = vpop.f32.mrb[248].mxu0 }
 0x5c5   : > { %v9794_v27 = vadd.f32 %v8038_v29, %v14774_v42  ;;  %v8040_v45 = vpop.f32.mrb[121].mxu1  ;;  %v9625_v17 = vpop.f32.mrb[249].mxu0 }
 0x5c6   : > { %v9795_v49 = vadd.f32 %v8040_v45, %v14782_v4  ;;  %v9626_v60 = vadd.f32 %v9625_v17, %v9624_v52  ;;  %v8042_v8 = vpop.f32.mrb[122].mxu1  ;;  %v9627_v5 = vpop.f32.mrb[250].mxu0 }
 0x5c7   : > { %8470 = vst [vmem:[%s14515_s29 + $0x100] sm:$0xff] %v9794_v27  ;;  %v9796_v30 = vadd.f32 %v8042_v8, %v14774_v42  ;;  %v8044_v55 = vpop.f32.mrb[123].mxu1  ;;  %v9628_v50 = vpop.f32.mrb[251].mxu0 }
 0x5c8   : > { %8471 = vst [vmem:[%s14515_s29 + $0x108] sm:$0xff] %v9795_v49  ;;  %v8432_v13 = vadd.f32 %v9626_v60, %v14757_v37  ;;  %v9797_v46 = vadd.f32 %v8044_v55, %v14782_v4 }
 0x5c9   : > { %8477 = vst [vmem:[%s14515_s29 + $0x138] sm:$0xff] %v9796_v30 }
 0x5ca   : > { %8528 = vst.msk [vmem:[%s14515_s29 + $0x2d0] sm:$0xff] %vm8443_vm0, %v8432_v13  ;;  %8478 = vst [vmem:[%s14515_s29 + $0x140] sm:$0xff] %v9797_v46 }
 0x5cc   : > { %v8048_v51 = vpop.f32.mrb[124].mxu1 }
 0x5cd   : > { %v9798_v14 = vadd.f32 %v8048_v51, %v14774_v42  ;;  %v8050_v12 = vpop.f32.mrb[125].mxu1 }
 0x5ce   : > { %v9799_v16 = vadd.f32 %v8050_v12, %v14782_v4  ;;  %v8052_v2 = vpop.f32.mrb[126].mxu1 }
 0x5cf   : > { %8484 = vst [vmem:[%s14515_s29 + $0x170] sm:$0xff] %v9798_v14  ;;  %v9800_v54 = vadd.f32 %v8052_v2, %v14774_v42  ;;  %v8054_v37 = vpop.f32.mrb[127].mxu1 }
 0x5d0   : > { %8485 = vst [vmem:[%s14515_s29 + $0x178] sm:$0xff] %v9799_v16  ;;  %v9801_v38 = vadd.f32 %v8054_v37, %v14782_v4 }
 0x5d1   : > { %8491 = vst [vmem:[%s14515_s29 + $0x1a8] sm:$0xff] %v9800_v54 }
 0x5d2   : > { %8492 = vst [vmem:[%s14515_s29 + $0x1b0] sm:$0xff] %v9801_v38 }
 0x5d4   : > { %v8058_v26 = vpop.f32.mrb[128].mxu1 }
 0x5d5   : > { %v9802_v34 = vadd.f32 %v8058_v26, %v14774_v42  ;;  %v8060_v19 = vpop.f32.mrb[129].mxu1 }
 0x5d6   : > { %v9803_v47 = vadd.f32 %v8060_v19, %v14782_v4  ;;  %v8062_v39 = vpop.f32.mrb[130].mxu1 }
 0x5d7   : > { %8498 = vst [vmem:[%s14515_s29 + $0x1e0] sm:$0xff] %v9802_v34  ;;  %v9804_v43 = vadd.f32 %v8062_v39, %v14774_v42  ;;  %v8064_v36 = vpop.f32.mrb[131].mxu1 }
 0x5d8   : > { %8499 = vst [vmem:[%s14515_s29 + $0x1e8] sm:$0xff] %v9803_v47  ;;  %v9805_v57 = vadd.f32 %v8064_v36, %v14782_v4 }
 0x5d9   : > { %8505 = vst [vmem:[%s14515_s29 + $0x218] sm:$0xff] %v9804_v43 }
 0x5da   : > { %8506 = vst [vmem:[%s14515_s29 + $0x220] sm:$0xff] %v9805_v57 }
 0x5dc   : > { %v8068_v28 = vpop.f32.mrb[132].mxu1 }
 0x5dd   : > { %v9806_v59 = vadd.f32 %v8068_v28, %v14774_v42  ;;  %v8070_v3 = vpop.f32.mrb[133].mxu1 }
 0x5de   : > { %v9807_v24 = vadd.f32 %v8070_v3, %v14782_v4  ;;  %v8072_v61 = vpop.f32.mrb[134].mxu1 }
 0x5df   : > { %8512 = vst [vmem:[%s14515_s29 + $0x250] sm:$0xff] %v9806_v59  ;;  %v9808_v35 = vadd.f32 %v8072_v61, %v14774_v42  ;;  %v8074_v20 = vpop.f32.mrb[135].mxu1 }
 0x5e0   : > { %8513 = vst [vmem:[%s14515_s29 + $0x258] sm:$0xff] %v9807_v24  ;;  %v9809_v6 = vadd.f32 %v8074_v20, %v14782_v4 }
 0x5e1   : > { %8519 = vst [vmem:[%s14515_s29 + $0x288] sm:$0xff] %v9808_v35 }
 0x5e2   : > { %8520 = vst [vmem:[%s14515_s29 + $0x290] sm:$0xff] %v9809_v6 }
 0x5e4   : > { %v8078_v21 = vpop.f32.mrb[136].mxu1 }
 0x5e5   : > { %v9810_v33 = vadd.f32 %v8078_v21, %v14774_v42  ;;  %v8080_v53 = vpop.f32.mrb[137].mxu1 }
 0x5e6   : > { %v9811_v22 = vadd.f32 %v8080_v53, %v14782_v4  ;;  %v8082_v10 = vpop.f32.mrb[138].mxu1 }
 0x5e7   : > { %8526 = vst [vmem:[%s14515_s29 + $0x2c0] sm:$0xff] %v9810_v33  ;;  %v8083_v11 = vpop.f32.mrb[139].mxu1 }
 0x5e8   : > { %8527 = vst [vmem:[%s14515_s29 + $0x2c8] sm:$0xff] %v9811_v22 }
 0x5e9   : > { %10995 = shalt.err (!%p10992_p3)
}
 0x5ea   : > { %s10996_s21 = scalar_lea.hbm %s14855_s23, 11648  ;;  %s11000_s14 = scalar_lea.hbm %s14914_s9, 23296 }
 0x5eb   : > { %p10997_p4 = scmp.ne.s32.totalorder %s14855_s23, %s10996_s21  ;;  %p11001_p9 = scmp.lt.u32.totalorder %s14855_s23, %s14914_s9 }
 0x5ec   : > { %p11002_p10 = scmp.lt.u32.totalorder %s11000_s14, %s10996_s21  ;;  %p11004_p12 = scmp.lt.u32.totalorder %s10996_s21, %s14855_s23 }
 0x5ed   : > { %p10998_p7 = pnand %p10997_p4, %p11138_p5 }
 0x5ee   : > { %p11003_p11 = por %p11002_p10, %p11001_p9 }
 0x5ef   : > { %p10999_p8 = pneg %p10998_p7 }
 0x5f0   : > { %p11005_p13 = por %p11004_p12, %p11003_p11 }
 0x5f2   : > { %p11006_p0 = pnand %p11005_p13, %p10999_p8 }
 0x5f4   : > { %11009 = shalt.err (!%p11006_p0)
}
 0x5f5   : > { %s11048_s24 = smov 896   ;;  %s11049_s25 = smov 56  }
 0x5f6   : > { %10178 = dma.vmem_to_hbm [thread:$0]  (%p11138_p5), %s14857_s28, 11648, %s14855_s23, %s14864_s13, %s11048_s24, %s11048_s24, %s11049_s25  }
 0x5f7 PF: > { %p10185_p1 = scmp.ge.s32.totalorder %s11044_s12, 2  ;;  %s8559_s26 = sand.u32 1, %s11032_s30  }
 0x5f8   : > { %s8560_s16 = scalar_lea.sflag [#allocation3], %s8559_s26 }
 0x5f9   : > { %p10181_p2 = pnand %p10185_p1, %p11142_p6 }
 0x5fb   : > { %11027 = dma.done.wait (!%p10181_p2), %s8560_s16, 11648  }
 0x5fc   : > { %11029 = vsyncadd (!%p10181_p2), %s8560_s16, 4294955648  ;;  %p19_p3 = scmp.ge.s32.totalorder %s11125_s15, 4   ;;  %s15058_s30 = smov %s11036_s10 }
 0x5fd   : > { %s15059_s10 = smov %s11040_s11  ;;  %s15060_s11 = smov %s11136_s18 }
 0x5fe   : > { %s15061_s12 = smov %s11125_s15  ;;  %21 = sbr.rel (!%p19_p3) target bundleno = 3 (0x3), region = 91 }
 0x605   :  { %8565 = vsyncpa [#allocation3], 1 }
 0x606   :  { %8567 = vsyncpa [#allocation3 + $0x1], 1 }

</bundles_post_ra>
